<compile_context>
chip_gen: v7x
topology: tpu7x:2x2x1
jax: 0.10.0
libtpu: 0.0.40
codegen_flags: <defaults>
</compile_context>

<pallas_src>
import jax
import jax.numpy as jnp
from jax import lax
from jax.experimental import pallas as pl
from jax.experimental.pallas import tpu as pltpu

N_WIRES = 3606  # module-level constant from networks250.py


def _round_up(x, m):
    return ((x + m - 1) // m) * m


def _pick_config():
    """Per-generation (tile extent, vmem_limit_bytes)."""
    try:
        vmem_cap = pltpu.get_tpu_info().vmem_capacity_bytes
    except Exception:  # unknown backend / query unavailable -> conservative
        vmem_cap = 0
    if vmem_cap >= (100 << 20):      # v5e / v6e: 128 MiB physical VMEM
        return 1024, 100 << 20
    return 512, 48 << 20             # v7x (64 MiB) or unknown


# --------------------------------------------------------------------------
# Kernels
# --------------------------------------------------------------------------

def _vae_rows_kernel(x_ref, w_enc_ref, w_dec_ref, o_ref):
    # x_ref: (TM, W) row tile; w_enc_ref: (E, W); w_dec_ref: (W, E); o_ref: (TM, W)
    x = x_ref[...].astype(jnp.bfloat16)
    we = w_enc_ref[...].astype(jnp.bfloat16)
    wd = w_dec_ref[...].astype(jnp.bfloat16)
    # h = x @ W_enc^T  (contract over n_wires), f32 accumulation.
    h = lax.dot_general(x, we, (((1,), (1,)), ((), ())),
                        preferred_element_type=jnp.float32)        # (TM, E)
    h = jnp.tanh(h)                                                # EUP, f32
    # y = tanh(h) @ W_dec^T  (contract over E), written straight to o_ref.
    y = lax.dot_general(h.astype(jnp.bfloat16), wd, (((1,), (1,)), ((), ())),
                        preferred_element_type=jnp.float32)        # (TM, W)
    o_ref[...] = y.astype(o_ref.dtype)


def _vae_ncw_kernel(x_ref, w_enc_ref, w_dec_ref, o_ref):
    # NCW-native: x_ref: (W, TS); w_enc_ref: (E, W); w_dec_ref: (W, E); o_ref: (W, TS)
    x = x_ref[...].astype(jnp.bfloat16)
    we = w_enc_ref[...].astype(jnp.bfloat16)
    wd = w_dec_ref[...].astype(jnp.bfloat16)
    # h = W_enc @ x  (standard (M,K)x(K,N) MXU orientation, contract over W).
    h = lax.dot_general(we, x, (((1,), (0,)), ((), ())),
                        preferred_element_type=jnp.float32)        # (E, TS)
    h = jnp.tanh(h)
    # y = W_dec @ tanh(h)  (contract over E).
    y = lax.dot_general(wd, h.astype(jnp.bfloat16), (((1,), (0,)), ((), ())),
                        preferred_element_type=jnp.float32)        # (W, TS)
    o_ref[...] = y.astype(o_ref.dtype)


# --------------------------------------------------------------------------
# Wrappers
# --------------------------------------------------------------------------

def vae_forward_rows(x_rows, w_enc, w_dec, *, tm=None):
    """Row-major fast path: x_rows (N, n_wires) -> (N, n_wires).

    Weights are passed in their PyTorch layouts:
      w_enc: (E, n_wires) == enc.lin1.weight
      w_dec: (n_wires, E) == dec.lin1.weight
    """
    N, W = x_rows.shape
    E = w_enc.shape[0]
    assert W == N_WIRES and w_enc.shape == (E, W) and w_dec.shape == (W, E)

    tm_auto, vmem_limit = _pick_config()
    if tm is None:
        tm = tm_auto
    if N <= tm:
        # Guarantee >= 2 grid blocks (keeps both v7x TensorCores busy);
        # costs ~one extra pipeline step on single-core parts.
        tm = _round_up(pl.cdiv(N, 2), 8) if N > 8 else N
    grid = (pl.cdiv(N, tm),)

    itemsize = jnp.dtype(x_rows.dtype).itemsize
    cost = pl.CostEstimate(
        flops=4 * N * W * E,                       # two matmuls
        transcendentals=N * E,                     # tanh
        bytes_accessed=2 * N * W * itemsize + 2 * W * E * 4,
    )

    return pl.pallas_call(
        _vae_rows_kernel,
        out_shape=jax.ShapeDtypeStruct((N, W), x_rows.dtype),
        grid_spec=pltpu.PrefetchScalarGridSpec(
            num_scalar_prefetch=0,
            grid=grid,
            in_specs=[
                pl.BlockSpec((tm, W), lambda i: (i, 0)),
                pl.BlockSpec((E, W), lambda i: (0, 0)),   # VMEM-resident weight
                pl.BlockSpec((W, E), lambda i: (0, 0)),   # VMEM-resident weight
            ],
            out_specs=pl.BlockSpec((tm, W), lambda i: (i, 0)),
        ),
        compiler_params=pltpu.CompilerParams(
            dimension_semantics=("parallel",),
            vmem_limit_bytes=vmem_limit,
        ),
        cost_estimate=cost,
    )(x_rows, w_enc, w_dec)


def vae_forward(x, w_enc, w_dec, *, ts=None):
    """PyTorch-layout (NCW-native) forward: x (B, n_wires, S) -> (B, n_wires, S).

    No HBM activation transposes: x is tiled as (n_wires, TS) blocks and the
    kernel computes y_tile = W_dec @ tanh(W_enc @ x_tile) directly in the
    (B, n_wires, S) layout.
    """
    B, W, S = x.shape
    E = w_enc.shape[0]
    assert W == N_WIRES and w_enc.shape == (E, W) and w_dec.shape == (W, E)

    ts_auto, vmem_limit = _pick_config()
    if ts is None:
        ts = ts_auto
    if S <= ts:
        # Split S only if the batch axis alone would leave a v7x core idle
        # (block last dim must be a multiple of 128 or the full extent).
        ts = _round_up(pl.cdiv(S, 2), 128) if (B == 1 and S >= 256) else S
    else:
        ts = max(128, (ts // 128) * 128)
    grid = (B, pl.cdiv(S, ts))

    itemsize = jnp.dtype(x.dtype).itemsize
    cost = pl.CostEstimate(
        flops=4 * B * S * W * E,
        transcendentals=B * S * E,
        bytes_accessed=2 * B * S * W * itemsize + 2 * W * E * 4,
    )

    return pl.pallas_call(
        _vae_ncw_kernel,
        out_shape=jax.ShapeDtypeStruct((B, W, S), x.dtype),
        grid_spec=pltpu.PrefetchScalarGridSpec(
            num_scalar_prefetch=0,
            grid=grid,
            in_specs=[
                pl.BlockSpec((None, W, ts), lambda b, s: (b, 0, s)),
                pl.BlockSpec((E, W), lambda b, s: (0, 0)),   # VMEM-resident
                pl.BlockSpec((W, E), lambda b, s: (0, 0)),   # VMEM-resident
            ],
            out_specs=pl.BlockSpec((None, W, ts), lambda b, s: (b, 0, s)),
        ),
        compiler_params=pltpu.CompilerParams(
            dimension_semantics=("parallel", "parallel"),
            vmem_limit_bytes=vmem_limit,
        ),
        cost_estimate=cost,
    )(x, w_enc, w_dec)


if __name__ == "__main__":
    key = jax.random.PRNGKey(0)
    k_x, k_enc, k_dec = jax.random.split(key, 3)

    B, S = 2, 8
    encoded_dim = 32

    # nn.Linear default init (U(-1/sqrt(fan_in), 1/sqrt(fan_in)), bias=False).
    bound_enc = 1.0 / jnp.sqrt(jnp.float32(N_WIRES))
    bound_dec = 1.0 / jnp.sqrt(jnp.float32(encoded_dim))
    w_enc = jax.random.uniform(k_enc, (encoded_dim, N_WIRES), jnp.float32,
                               minval=-bound_enc, maxval=bound_enc)
    w_dec = jax.random.uniform(k_dec, (N_WIRES, encoded_dim), jnp.float32,
                               minval=-bound_dec, maxval=bound_dec)

    x = jax.random.normal(k_x, (B, N_WIRES, S), jnp.float32)

    # Primary NCW-native path (matches VAE.forward exactly).
    y = jax.block_until_ready(vae_forward(x, w_enc, w_dec))

    # Pure-JAX f32 reference (same math as the PyTorch forward).
    x_t = jnp.transpose(x, (0, 2, 1))                       # (B, S, W)
    y_ref = jnp.transpose(jnp.tanh(x_t @ w_enc.T) @ w_dec.T, (0, 2, 1))
    assert y.shape == (B, N_WIRES, S)
    # bf16 matmul operands -> looser tolerance than the pure-f32 version.
    assert jnp.allclose(y, y_ref, atol=2e-2, rtol=2e-2), \
        float(jnp.max(jnp.abs(y - y_ref)))

    # Row-major fast path (callers that already hold seq-major data).
    x_rows = x_t.reshape(B * S, N_WIRES)
    y_rows = jax.block_until_ready(vae_forward_rows(x_rows, w_enc, w_dec))
    y_rows_ref = jnp.tanh(x_rows @ w_enc.T) @ w_dec.T
    assert jnp.allclose(y_rows, y_rows_ref, atol=2e-2, rtol=2e-2), \
        float(jnp.max(jnp.abs(y_rows - y_rows_ref)))

    print("KERNEL_OK")
</pallas_src>

<mosaic_0001>
module attributes {stable_mosaic.version = 11 : i64} {
  func.func @_vae_ncw_kernel(%arg0: i32, %arg1: i32, %arg2: memref<1x3606x8xf32, #tpu.memory_space<vmem>>, %arg3: memref<32x3606xf32, #tpu.memory_space<vmem>>, %arg4: memref<3606x32xf32, #tpu.memory_space<vmem>>, %arg5: memref<1x3606x8xf32, #tpu.memory_space<vmem>>) attributes {dimension_semantics = [#tpu.dimension_semantics<parallel>, #tpu.dimension_semantics<parallel>], iteration_bounds = array<i64: 2, 1>, scalar_prefetch = 0 : i64, scratch_operands = 0 : i64, tpu.core_type = #tpu.core_type<tc>, window_params = [{transform_indices = @transform_0, window_bounds = array<i64: 1, 3606, 8>}, {pipeline_mode = #tpu.pipeline_mode<synchronous>, transform_indices = @transform_1, window_bounds = array<i64: 32, 3606>}, {pipeline_mode = #tpu.pipeline_mode<synchronous>, transform_indices = @transform_2, window_bounds = array<i64: 3606, 32>}, {transform_indices = @transform_3, window_bounds = array<i64: 1, 3606, 8>}]} {
    %c0 = arith.constant 0 : index
    %c0_0 = arith.constant 0 : index
    %c0_1 = arith.constant 0 : index
    %0 = vector.load %arg2[%c0, %c0_0, %c0_1] : memref<1x3606x8xf32, #tpu.memory_space<vmem>>, vector<1x3606x8xf32>
    %1 = vector.shape_cast %0 : vector<1x3606x8xf32> to vector<3606x8xf32>
    %2 = arith.truncf %1 : vector<3606x8xf32> to vector<3606x8xbf16>
    %c0_2 = arith.constant 0 : index
    %c0_3 = arith.constant 0 : index
    %3 = vector.load %arg3[%c0_2, %c0_3] : memref<32x3606xf32, #tpu.memory_space<vmem>>, vector<32x3606xf32>
    %4 = arith.truncf %3 : vector<32x3606xf32> to vector<32x3606xbf16>
    %c0_4 = arith.constant 0 : index
    %c0_5 = arith.constant 0 : index
    %5 = vector.load %arg4[%c0_4, %c0_5] : memref<3606x32xf32, #tpu.memory_space<vmem>>, vector<3606x32xf32>
    %6 = arith.truncf %5 : vector<3606x32xf32> to vector<3606x32xbf16>
    %cst = arith.constant dense<0.000000e+00> : vector<32x8xf32>
    %7 = tpu.matmul %4, %2, %cst {dimension_numbers = #tpu.dot_dimension_numbers<[1], [0], [0], [1], [0, 0, 1, 1], [], []>} : vector<32x3606xbf16>, vector<3606x8xbf16>, vector<32x8xf32> -> vector<32x8xf32>
    %8 = math.tanh %7 : vector<32x8xf32>
    %9 = arith.truncf %8 : vector<32x8xf32> to vector<32x8xbf16>
    %cst_6 = arith.constant dense<0.000000e+00> : vector<3606x8xf32>
    %10 = tpu.matmul %6, %9, %cst_6 {dimension_numbers = #tpu.dot_dimension_numbers<[1], [0], [0], [1], [0, 0, 1, 1], [], []>} : vector<3606x32xbf16>, vector<32x8xbf16>, vector<3606x8xf32> -> vector<3606x8xf32>
    %c0_7 = arith.constant 0 : index
    %c0_8 = arith.constant 0 : index
    %c0_9 = arith.constant 0 : index
    %11 = vector.load %arg5[%c0_7, %c0_8, %c0_9] : memref<1x3606x8xf32, #tpu.memory_space<vmem>>, vector<1x3606x8xf32>
    %12 = vector.shape_cast %11 : vector<1x3606x8xf32> to vector<3606x8xf32>
    %13 = vector.shape_cast %10 : vector<3606x8xf32> to vector<1x3606x8xf32>
    tpu.vector_store %arg5[%c0_7, %c0_8, %c0_9], %13 {strides = array<i32>} : memref<1x3606x8xf32, #tpu.memory_space<vmem>>, vector<1x3606x8xf32>,
    return
  }
  func.func @transform_0(%arg0: i32, %arg1: i32) -> (i32, i32, i32) {
    %c0_i32 = arith.constant 0 : i32
    %c0_i32_0 = arith.constant 0 : i32
    return %arg0, %c0_i32, %arg1 : i32, i32, i32
  }
  func.func @transform_1(%arg0: i32, %arg1: i32) -> (i32, i32) {
    %c0_i32 = arith.constant 0 : i32
    %c0_i32_0 = arith.constant 0 : i32
    %c0_i32_1 = arith.constant 0 : i32
    return %c0_i32, %c0_i32_0 : i32, i32
  }
  func.func @transform_2(%arg0: i32, %arg1: i32) -> (i32, i32) {
    %c0_i32 = arith.constant 0 : i32
    %c0_i32_0 = arith.constant 0 : i32
    %c0_i32_1 = arith.constant 0 : i32
    return %c0_i32, %c0_i32_0 : i32, i32
  }
  func.func @transform_3(%arg0: i32, %arg1: i32) -> (i32, i32, i32) {
    %c0_i32 = arith.constant 0 : i32
    %c0_i32_0 = arith.constant 0 : i32
    return %arg0, %c0_i32, %arg1 : i32, i32, i32
  }
}

</mosaic_0001>

<bundles_post_ra>
// kernel: tpu_custom_call.1
= control target key start
LH: loop header
LB: loop body
LE: loop exit
PB: predicated region body
PF: predicated region fallthrough
CT: control target
= control target key end

     0   :  { %s6945_s12 = smov 0   ;;  %s6947_s13 = smov 0   ;;  %s10268_s0 = inlined_call_operand.vmem [shape: f32[2,3606,8], index: 0, kind: input, shape index: {}]   ;;  %s10269_s1 = inlined_call_operand.vmem [shape: f32[32,3606], index: 1, kind: input, shape index: {}]   ;;  %s10270_s2 = inlined_call_operand.vmem [shape: f32[3606,32], index: 2, kind: input, shape index: {}]   ;;  %s10271_s3 = inlined_call_operand.vmem [shape: f32[2,3606,8], index: 3, kind: output, shape index: {}]  }
   0x1   :  { %s6949_s14 = smov 0  }
   0x2 LB: > { %s25_s15 = sadd.s32 1, %s6919_s13  ;;  %p5542_p0 = scmp.ge.s32.totalorder %s6923_s14, 1  ;;  %s6923_s14 = sphi %s6949_s14, %s13_s14   ;;  %s6919_s13 = sphi %s6947_s13, %s10273_s13   ;;  %s6915_s12 = sphi %s6945_s12, %s10272_s12  }
   0x3   : > { %p27_p1 = scmp.ge.s32.totalorder %s25_s15, 2  ;;  %p156_p2 = scmp.lt.s32.totalorder %s6923_s14, 3 }
   0x5   : > { %s10275_s15 = smov (%p27_p1, %s25_s15), 0  ;;  %p157_p3 = pnand %p5542_p0, %p156_p2 }
   0x6   : > { %p186_p4 = scmp.lt.s32.totalorder (!%p157_p3), %s6915_s12, 1  ;;  %v881_v0 = vld [vmem:[%s10269_s1 + $0x8] sm:$0xff] (!%p157_p3)  ;;  %v910_v1 = vld [vmem:[%s10269_s1 + $0xf0] sm:$0xff] (!%p157_p3)  ;;  %v883_v2 = vld [vmem:[%s10269_s1 + $0x18] sm:$0xff] (!%p157_p3)  ;;  %vm1738_vm0 = vcmask (!%p157_p3), 1042432   ;;  %vm1731_vm1 = vcmask (!%p157_p3), 179200  }
   0x7   : > { %160 = sbr.rel (%p157_p3) target bundleno = 1164 (0x48c), region = 32  ;;  %v997_v3 = vpack.c.bf16 (!%p157_p3), %v910_v1, %v881_v0  ;;  %v912_v4 = vld [vmem:[%s10269_s1 + $0x100] sm:$0xff] (!%p157_p3)  ;;  %vm2483_vm2 = vcmask (!%p157_p3), 261120   ;;  %vm5002_vm3 = vcmask (!%p157_p3), 64512   ;;  %vm5453_vm4 = vcmask (!%p157_p3), 62464  }
   0x8   : > { %v999_v5 = vpack.c.bf16 (!%p157_p3), %v912_v4, %v883_v2 }
   0x9   : > { %1774 = vmatprep.mubr.bf16.mxu0 (!%p157_p3), %v997_v3 }
   0xa   : > { %1823 = vmatprep.mubr.bf16.mxu1 (!%p157_p3), %v999_v5 }
   0xe   : > { %s10277_s12 = smov (!%p186_p4, %s6915_s12), 1 }
   0xf   : > { %s6868_s24 = smul.u32 3608, %s10277_s12 }
  0x11   : > { %s6983_s27 = scalar_lea.vmem %s10268_s0, %s6868_s24  ;;  %s8551_s25 = scalar_lea.vmem %s10271_s3, %s6868_s24 }
  0x12   : > { %v219_v6 = vld [vmem:[%s6983_s27 + $0x80] sm:$0xff]  ;;  %v220_v7 = vld [vmem:[%s6983_s27 + $0x88] sm:$0xff]  ;;  %v221_v17 = vld [vmem:[%s6983_s27 + $0x90] sm:$0xff] }
  0x13   : > { %v251_v8 = vld [vmem:[%s6983_s27 + $0x180] sm:$0xff]  ;;  %v662_v9 = vpack.c.bf16 %v220_v7, %v219_v6  ;;  %v252_v10 = vld [vmem:[%s6983_s27 + $0x188] sm:$0xff]  ;;  %v222_v19 = vld [vmem:[%s6983_s27 + $0x98] sm:$0xff] }
  0x14   : > { %v203_v11 = vld [vmem:[%s6983_s27] sm:$0xff]  ;;  %v204_v12 = vld [vmem:[%s6983_s27 + $0x8] sm:$0xff]  ;;  %v678_v13 = vpack.c.bf16 %v252_v10, %v251_v8  ;;  %v253_v20 = vld [vmem:[%s6983_s27 + $0x190] sm:$0xff]  ;;  %v663_v22 = vpack.c.bf16 %v222_v19, %v221_v17 }
  0x15   : > { %v654_v14 = vpack.c.bf16 %v204_v12, %v203_v11  ;;  %v235_v15 = vld [vmem:[%s6983_s27 + $0x100] sm:$0xff]  ;;  %v236_v16 = vld [vmem:[%s6983_s27 + $0x108] sm:$0xff]  ;;  %5775 = vmatprep.subr.bf16.mxu0 %v662_v9  ;;  %v254_v21 = vld [vmem:[%s6983_s27 + $0x198] sm:$0xff] }
  0x16   : > { %v670_v18 = vpack.c.bf16 %v236_v16, %v235_v15  ;;  %5803 = vmatprep.subr.bf16.mxu1 %v678_v13  ;;  %v679_v23 = vpack.c.bf16 %v254_v21, %v253_v20  ;;  %v205_v24 = vld [vmem:[%s6983_s27 + $0x10] sm:$0xff]  ;;  %v206_v25 = vld [vmem:[%s6983_s27 + $0x18] sm:$0xff]  ;;  %v223_v29 = vld [vmem:[%s6983_s27 + $0xa0] sm:$0xff] }
  0x17   : > { %5776 = vmatpush3.bf16.msra.mxu0 %v654_v14  ;;  %v237_v26 = vld [vmem:[%s6983_s27 + $0x110] sm:$0xff]  ;;  %v655_v27 = vpack.c.bf16 %v206_v25, %v205_v24  ;;  %v238_v28 = vld [vmem:[%s6983_s27 + $0x118] sm:$0xff]  ;;  %v224_v30 = vld [vmem:[%s6983_s27 + $0xa8] sm:$0xff] }
  0x18   : > { %5804 = vmatpush3.bf16.msra.mxu1 %v670_v18  ;;  %5777 = vmatprep.subr.bf16.mxu0 %v663_v22  ;;  %v671_v31 = vpack.c.bf16 %v238_v28, %v237_v26  ;;  %v664_v32 = vpack.c.bf16 %v224_v30, %v223_v29  ;;  %v255_v33 = vld [vmem:[%s6983_s27 + $0x1a0] sm:$0xff]  ;;  %v256_v34 = vld [vmem:[%s6983_s27 + $0x1a8] sm:$0xff]  ;;  %v225_v41 = vld [vmem:[%s6983_s27 + $0xb0] sm:$0xff] }
  0x19   : > { %5805 = vmatprep.subr.bf16.mxu1 %v679_v23  ;;  %v207_v35 = vld [vmem:[%s6983_s27 + $0x20] sm:$0xff]  ;;  %v680_v36 = vpack.c.bf16 %v256_v34, %v255_v33  ;;  %v208_v37 = vld [vmem:[%s6983_s27 + $0x28] sm:$0xff]  ;;  %v226_v42 = vld [vmem:[%s6983_s27 + $0xb8] sm:$0xff] }
  0x1a   : > { %v239_v38 = vld [vmem:[%s6983_s27 + $0x120] sm:$0xff]  ;;  %v240_v39 = vld [vmem:[%s6983_s27 + $0x128] sm:$0xff]  ;;  %v656_v40 = vpack.c.bf16 %v208_v37, %v207_v35  ;;  %v257_v43 = vld [vmem:[%s6983_s27 + $0x1b0] sm:$0xff]  ;;  %v665_v45 = vpack.c.bf16 %v226_v42, %v225_v41 }
  0x1b   : > { %5778 = vmatpush3.bf16.msra.mxu0 %v655_v27  ;;  %v672_v44 = vpack.c.bf16 %v240_v39, %v239_v38  ;;  %v258_v46 = vld [vmem:[%s6983_s27 + $0x1b8] sm:$0xff]  ;;  %v209_v47 = vld [vmem:[%s6983_s27 + $0x30] sm:$0xff]  ;;  %v227_v52 = vld [vmem:[%s6983_s27 + $0xc0] sm:$0xff] }
  0x1c   : > { %5806 = vmatpush3.bf16.msra.mxu1 %v671_v31  ;;  %5779 = vmatprep.subr.bf16.mxu0 %v664_v32  ;;  %v210_v48 = vld [vmem:[%s6983_s27 + $0x38] sm:$0xff]  ;;  %v681_v49 = vpack.c.bf16 %v258_v46, %v257_v43  ;;  %v241_v50 = vld [vmem:[%s6983_s27 + $0x130] sm:$0xff]  ;;  %v228_v53 = vld [vmem:[%s6983_s27 + $0xc8] sm:$0xff] }
  0x1d   : > { %5807 = vmatprep.subr.bf16.mxu1 %v680_v36  ;;  %v242_v51 = vld [vmem:[%s6983_s27 + $0x138] sm:$0xff]  ;;  %v259_v54 = vld [vmem:[%s6983_s27 + $0x1c0] sm:$0xff]  ;;  %v260_v55 = vld [vmem:[%s6983_s27 + $0x1c8] sm:$0xff]  ;;  %v657_v56 = vpack.c.bf16 %v210_v48, %v209_v47  ;;  %v666_v58 = vpack.c.bf16 %v228_v53, %v227_v52 }
  0x1e   : > { %v673_v57 = vpack.c.bf16 %v242_v51, %v241_v50  ;;  %v211_v59 = vld [vmem:[%s6983_s27 + $0x40] sm:$0xff]  ;;  %v212_v60 = vld [vmem:[%s6983_s27 + $0x48] sm:$0xff]  ;;  %v682_v62 = vpack.c.bf16 %v260_v55, %v259_v54  ;;  %v229_v0 = vld [vmem:[%s6983_s27 + $0xd0] sm:$0xff] }
  0x1f   : > { %5780 = vmatpush3.bf16.msra.mxu0 %v656_v40  ;;  %v243_v61 = vld [vmem:[%s6983_s27 + $0x140] sm:$0xff]  ;;  %v244_v63 = vld [vmem:[%s6983_s27 + $0x148] sm:$0xff]  ;;  %v230_v1 = vld [vmem:[%s6983_s27 + $0xd8] sm:$0xff]  ;;  %v658_v4 = vpack.c.bf16 %v212_v60, %v211_v59 }
  0x20   : > { %5808 = vmatpush3.bf16.msra.mxu1 %v672_v44  ;;  %5781 = vmatprep.subr.bf16.mxu0 %v665_v45  ;;  %v261_v2 = vld [vmem:[%s6983_s27 + $0x1d0] sm:$0xff]  ;;  %v262_v3 = vld [vmem:[%s6983_s27 + $0x1d8] sm:$0xff]  ;;  %v674_v5 = vpack.c.bf16 %v244_v63, %v243_v61  ;;  %v667_v6 = vpack.c.bf16 %v230_v1, %v229_v0  ;;  %v231_v12 = vld [vmem:[%s6983_s27 + $0xe0] sm:$0xff] }
  0x21   : > { %5809 = vmatprep.subr.bf16.mxu1 %v681_v49  ;;  %v213_v7 = vld [vmem:[%s6983_s27 + $0x50] sm:$0xff]  ;;  %v214_v8 = vld [vmem:[%s6983_s27 + $0x58] sm:$0xff]  ;;  %v683_v10 = vpack.c.bf16 %v262_v3, %v261_v2  ;;  %v232_v13 = vld [vmem:[%s6983_s27 + $0xe8] sm:$0xff] }
  0x22   : > { %v245_v9 = vld [vmem:[%s6983_s27 + $0x150] sm:$0xff]  ;;  %v246_v11 = vld [vmem:[%s6983_s27 + $0x158] sm:$0xff]  ;;  %v263_v14 = vld [vmem:[%s6983_s27 + $0x1e0] sm:$0xff]  ;;  %v659_v16 = vpack.c.bf16 %v214_v8, %v213_v7  ;;  %v668_v18 = vpack.c.bf16 %v232_v13, %v231_v12 }
  0x23   : > { %5782 = vmatpush3.bf16.msra.mxu0 %v657_v56  ;;  %v264_v15 = vld [vmem:[%s6983_s27 + $0x1e8] sm:$0xff]  ;;  %v675_v17 = vpack.c.bf16 %v246_v11, %v245_v9  ;;  %v215_v19 = vld [vmem:[%s6983_s27 + $0x60] sm:$0xff]  ;;  %v233_v24 = vld [vmem:[%s6983_s27 + $0xf0] sm:$0xff] }
  0x24   : > { %5810 = vmatpush3.bf16.msra.mxu1 %v673_v57  ;;  %5783 = vmatprep.subr.bf16.mxu0 %v666_v58  ;;  %v216_v20 = vld [vmem:[%s6983_s27 + $0x68] sm:$0xff]  ;;  %v247_v21 = vld [vmem:[%s6983_s27 + $0x160] sm:$0xff]  ;;  %v684_v22 = vpack.c.bf16 %v264_v15, %v263_v14  ;;  %v234_v25 = vld [vmem:[%s6983_s27 + $0xf8] sm:$0xff] }
  0x25   : > { %5811 = vmatprep.subr.bf16.mxu1 %v682_v62  ;;  %v248_v23 = vld [vmem:[%s6983_s27 + $0x168] sm:$0xff]  ;;  %v265_v26 = vld [vmem:[%s6983_s27 + $0x1f0] sm:$0xff]  ;;  %v266_v27 = vld [vmem:[%s6983_s27 + $0x1f8] sm:$0xff]  ;;  %v660_v28 = vpack.c.bf16 %v216_v20, %v215_v19  ;;  %v669_v30 = vpack.c.bf16 %v234_v25, %v233_v24 }
  0x26   : > { %v676_v29 = vpack.c.bf16 %v248_v23, %v247_v21  ;;  %v217_v31 = vld [vmem:[%s6983_s27 + $0x70] sm:$0xff]  ;;  %v218_v32 = vld [vmem:[%s6983_s27 + $0x78] sm:$0xff]  ;;  %v685_v34 = vpack.c.bf16 %v266_v27, %v265_v26  ;;  %v283_v36 = vld [vmem:[%s6983_s27 + $0x280] sm:$0xff] }
  0x27   : > { %5784 = vmatpush3.bf16.msra.mxu0 %v658_v4  ;;  %v249_v33 = vld [vmem:[%s6983_s27 + $0x170] sm:$0xff]  ;;  %v250_v35 = vld [vmem:[%s6983_s27 + $0x178] sm:$0xff]  ;;  %v284_v37 = vld [vmem:[%s6983_s27 + $0x288] sm:$0xff]  ;;  %v661_v41 = vpack.c.bf16 %v218_v32, %v217_v31 }
  0x28   : > { %5812 = vmatpush3.bf16.msra.mxu1 %v674_v5  ;;  %5785 = vmatprep.subr.bf16.mxu0 %v667_v6  ;;  %v880_v38 = vld [vmem:[%s10269_s1] sm:$0xff]  ;;  %v316_v40 = vld [vmem:[%s6983_s27 + $0x388] sm:$0xff]  ;;  %v882_v43 = vld [vmem:[%s10269_s1 + $0x10] sm:$0xff]  ;;  %v677_v45 = vpack.c.bf16 %v250_v35, %v249_v33  ;;  %v694_v46 = vpack.c.bf16 %v284_v37, %v283_v36 }
  0x29   : > { %5813 = vmatprep.subr.bf16.mxu1 %v683_v10  ;;  %v315_v39 = vld [vmem:[%s6983_s27 + $0x380] sm:$0xff]  ;;  %v909_v42 = vld [vmem:[%s10269_s1 + $0xe8] sm:$0xff]  ;;  %v911_v44 = vld [vmem:[%s10269_s1 + $0xf8] sm:$0xff] }
  0x2a   : > { %v267_v47 = vld [vmem:[%s6983_s27 + $0x200] sm:$0xff]  ;;  %v268_v48 = vld [vmem:[%s6983_s27 + $0x208] sm:$0xff]  ;;  %v939_v50 = vld [vmem:[%s10269_s1 + $0x1d8] sm:$0xff]  ;;  %v710_v51 = vpack.c.bf16 %v316_v40, %v315_v39  ;;  %v996_v55 = vpack.c.bf16 %v909_v42, %v880_v38  ;;  %v998_v59 = vpack.c.bf16 %v911_v44, %v882_v43 }
  0x2b   : > { %5786 = vmatpush3.bf16.msra.mxu0 %v659_v16  ;;  %v299_v49 = vld [vmem:[%s6983_s27 + $0x300] sm:$0xff]  ;;  %v300_v52 = vld [vmem:[%s6983_s27 + $0x308] sm:$0xff]  ;;  %v285_v53 = vld [vmem:[%s6983_s27 + $0x290] sm:$0xff]  ;;  %v686_v60 = vpack.c.bf16 %v268_v48, %v267_v47 }
  0x2c   : > { %5814 = vmatpush3.bf16.msra.mxu1 %v675_v17  ;;  %5787 = vmatprep.subr.bf16.mxu0 %v668_v18  ;;  %v286_v54 = vld [vmem:[%s6983_s27 + $0x298] sm:$0xff]  ;;  %v317_v56 = vld [vmem:[%s6983_s27 + $0x390] sm:$0xff]  ;;  %v968_v58 = vld [vmem:[%s10269_s1 + $0x2c0] sm:$0xff]  ;;  %v702_v63 = vpack.c.bf16 %v300_v52, %v299_v49 }
  0x2d   : > { %5815 = vmatprep.subr.bf16.mxu1 %v684_v22  ;;  %v318_v57 = vld [vmem:[%s6983_s27 + $0x398] sm:$0xff]  ;;  %v941_v61 = vld [vmem:[%s10269_s1 + $0x1e8] sm:$0xff]  ;;  %v970_v62 = vld [vmem:[%s10269_s1 + $0x2d0] sm:$0xff]  ;;  %v695_v0 = vpack.c.bf16 %v286_v54, %v285_v53  ;;  %v1026_v8 = vpack.c.bf16 %v968_v58, %v939_v50 }
  0x2e   : > { %v269_v1 = vld [vmem:[%s6983_s27 + $0x210] sm:$0xff]  ;;  %v270_v2 = vld [vmem:[%s6983_s27 + $0x218] sm:$0xff]  ;;  %v711_v4 = vpack.c.bf16 %v318_v57, %v317_v56  ;;  %v287_v6 = vld [vmem:[%s6983_s27 + $0x2a0] sm:$0xff]  ;;  %v1028_v11 = vpack.c.bf16 %v970_v62, %v941_v61 }
  0x2f   : > { %5788 = vmatpush3.bf16.msra.mxu0 %v660_v28  ;;  %v301_v3 = vld [vmem:[%s6983_s27 + $0x310] sm:$0xff]  ;;  %v302_v5 = vld [vmem:[%s6983_s27 + $0x318] sm:$0xff]  ;;  %v288_v7 = vld [vmem:[%s6983_s27 + $0x2a8] sm:$0xff]  ;;  %v687_v13 = vpack.c.bf16 %v270_v2, %v269_v1 }
  0x30   : > { %5816 = vmatpush3.bf16.msra.mxu1 %v676_v29  ;;  %5789 = vmatprep.subr.bf16.mxu0 %v669_v30  ;;  %v319_v9 = vld [vmem:[%s6983_s27 + $0x3a0] sm:$0xff]  ;;  %v320_v10 = vld [vmem:[%s6983_s27 + $0x3a8] sm:$0xff]  ;;  %v938_v12 = vld [vmem:[%s10269_s1 + $0x1d0] sm:$0xff]  ;;  %v703_v17 = vpack.c.bf16 %v302_v5, %v301_v3  ;;  %v696_v18 = vpack.c.bf16 %v288_v7, %v287_v6 }
  0x31   : > { %5817 = vmatprep.subr.bf16.mxu1 %v685_v34  ;;  %v967_v14 = vld [vmem:[%s10269_s1 + $0x2b8] sm:$0xff]  ;;  %v940_v15 = vld [vmem:[%s10269_s1 + $0x1e0] sm:$0xff]  ;;  %v969_v16 = vld [vmem:[%s10269_s1 + $0x2c8] sm:$0xff]  ;;  %v712_v23 = vpack.c.bf16 %v320_v10, %v319_v9 }
  0x32   : > { %v271_v19 = vld [vmem:[%s6983_s27 + $0x220] sm:$0xff]  ;;  %v272_v20 = vld [vmem:[%s6983_s27 + $0x228] sm:$0xff]  ;;  %v289_v25 = vld [vmem:[%s6983_s27 + $0x2b0] sm:$0xff]  ;;  %v1025_v29 = vpack.c.bf16 %v967_v14, %v938_v12  ;;  %v1027_v32 = vpack.c.bf16 %v969_v16, %v940_v15 }
  0x33   : > { %5790 = vmatpush3.bf16.msra.mxu0 %v661_v41  ;;  %v303_v21 = vld [vmem:[%s6983_s27 + $0x320] sm:$0xff]  ;;  %v885_v22 = vld [vmem:[%s10269_s1 + $0x28] sm:$0xff]  ;;  %v290_v26 = vld [vmem:[%s6983_s27 + $0x2b8] sm:$0xff]  ;;  %v688_v31 = vpack.c.bf16 %v272_v20, %v271_v19 }
  0x34   : > { %5818 = vmatpush3.bf16.msra.mxu1 %v677_v45  ;;  %5831 = vmatprep.subr.bf16.mxu0 %v694_v46  ;;  %v304_v24 = vld [vmem:[%s6983_s27 + $0x328] sm:$0xff]  ;;  %v321_v27 = vld [vmem:[%s6983_s27 + $0x3b0] sm:$0xff]  ;;  %v322_v28 = vld [vmem:[%s6983_s27 + $0x3b8] sm:$0xff]  ;;  %v697_v35 = vpack.c.bf16 %v290_v26, %v289_v25 }
  0x35   : > { %5859 = vmatprep.subr.bf16.mxu1 %v710_v51  ;;  %v914_v30 = vld [vmem:[%s10269_s1 + $0x110] sm:$0xff]  ;;  %v887_v33 = vld [vmem:[%s10269_s1 + $0x38] sm:$0xff]  ;;  %v704_v34 = vpack.c.bf16 %v304_v24, %v303_v21  ;;  %v713_v39 = vpack.c.bf16 %v322_v28, %v321_v27  ;;  %v291_v41 = vld [vmem:[%s6983_s27 + $0x2c0] sm:$0xff] }
  0x36   : > { %1775 = vmatmul.mubr.bf16.vlgmr.msra.gmra.mrb[0].mxu0 %v996_v55  ;;  %v273_v36 = vld [vmem:[%s6983_s27 + $0x230] sm:$0xff]  ;;  %v274_v37 = vld [vmem:[%s6983_s27 + $0x238] sm:$0xff]  ;;  %v292_v42 = vld [vmem:[%s6983_s27 + $0x2c8] sm:$0xff]  ;;  %v1001_v43 = vpack.c.bf16 %v914_v30, %v885_v22 }
  0x37   : > { %1824 = vmatmul.mubr.bf16.vlgmr.msra.gmra.mrb[0].mxu1 %v998_v59  ;;  %5832 = vmatpush3.bf16.msra.mxu0 %v686_v60  ;;  %v305_v38 = vld [vmem:[%s6983_s27 + $0x330] sm:$0xff]  ;;  %v306_v40 = vld [vmem:[%s6983_s27 + $0x338] sm:$0xff]  ;;  %v323_v44 = vld [vmem:[%s6983_s27 + $0x3c0] sm:$0xff]  ;;  %v689_v47 = vpack.c.bf16 %v274_v37, %v273_v36  ;;  %v698_v50 = vpack.c.bf16 %v292_v42, %v291_v41 }
  0x38   : > { %5860 = vmatpush3.bf16.msra.mxu1 %v702_v63  ;;  %5833 = vmatprep.subr.bf16.mxu0 %v695_v0  ;;  %v324_v45 = vld [vmem:[%s6983_s27 + $0x3c8] sm:$0xff]  ;;  %v916_v46 = vld [vmem:[%s10269_s1 + $0x120] sm:$0xff]  ;;  %v705_v49 = vpack.c.bf16 %v306_v40, %v305_v38  ;;  %v293_v56 = vld [vmem:[%s6983_s27 + $0x2d0] sm:$0xff] }
  0x39   : > { %5861 = vmatprep.subr.bf16.mxu1 %v711_v4  ;;  %1782 = vmatprep.mubr.bf16.mxu0 %v1026_v8  ;;  %v1003_v48 = vpack.c.bf16 %v916_v46, %v887_v33  ;;  %v275_v51 = vld [vmem:[%s6983_s27 + $0x240] sm:$0xff]  ;;  %v276_v52 = vld [vmem:[%s6983_s27 + $0x248] sm:$0xff]  ;;  %v714_v54 = vpack.c.bf16 %v324_v45, %v323_v44  ;;  %v294_v57 = vld [vmem:[%s6983_s27 + $0x2d8] sm:$0xff] }
  0x3a   : > { %1831 = vmatprep.mubr.bf16.mxu1 %v1028_v11  ;;  %v307_v53 = vld [vmem:[%s6983_s27 + $0x340] sm:$0xff]  ;;  %v308_v55 = vld [vmem:[%s6983_s27 + $0x348] sm:$0xff]  ;;  %v325_v58 = vld [vmem:[%s6983_s27 + $0x3d0] sm:$0xff]  ;;  %v690_v60 = vpack.c.bf16 %v276_v52, %v275_v51  ;;  %v699_v62 = vpack.c.bf16 %v294_v57, %v293_v56 }
  0x3b   : > { %5834 = vmatpush3.bf16.msra.mxu0 %v687_v13  ;;  %v326_v59 = vld [vmem:[%s6983_s27 + $0x3d8] sm:$0xff]  ;;  %v706_v61 = vpack.c.bf16 %v308_v55, %v307_v53  ;;  %v277_v63 = vld [vmem:[%s6983_s27 + $0x250] sm:$0xff]  ;;  %v295_v4 = vld [vmem:[%s6983_s27 + $0x2e0] sm:$0xff] }
  0x3c   : > { %5862 = vmatpush3.bf16.msra.mxu1 %v703_v17  ;;  %5835 = vmatprep.subr.bf16.mxu0 %v696_v18  ;;  %v278_v0 = vld [vmem:[%s6983_s27 + $0x258] sm:$0xff]  ;;  %v309_v1 = vld [vmem:[%s6983_s27 + $0x350] sm:$0xff]  ;;  %v715_v2 = vpack.c.bf16 %v326_v59, %v325_v58  ;;  %v296_v5 = vld [vmem:[%s6983_s27 + $0x2e8] sm:$0xff] }
  0x3d   : > { %5863 = vmatprep.subr.bf16.mxu1 %v712_v23  ;;  %v310_v3 = vld [vmem:[%s6983_s27 + $0x358] sm:$0xff]  ;;  %v327_v6 = vld [vmem:[%s6983_s27 + $0x3e0] sm:$0xff]  ;;  %v328_v7 = vld [vmem:[%s6983_s27 + $0x3e8] sm:$0xff]  ;;  %v691_v8 = vpack.c.bf16 %v278_v0, %v277_v63  ;;  %v700_v10 = vpack.c.bf16 %v296_v5, %v295_v4 }
  0x3e   : > { %1783 = vmatmul.mubr.bf16.gmra.mrb[4].mxu0 %v1025_v29  ;;  %v707_v9 = vpack.c.bf16 %v310_v3, %v309_v1  ;;  %v279_v11 = vld [vmem:[%s6983_s27 + $0x260] sm:$0xff]  ;;  %v280_v12 = vld [vmem:[%s6983_s27 + $0x268] sm:$0xff]  ;;  %v716_v14 = vpack.c.bf16 %v328_v7, %v327_v6  ;;  %v297_v16 = vld [vmem:[%s6983_s27 + $0x2f0] sm:$0xff] }
  0x3f   : > { %5836 = vmatpush3.bf16.msra.mxu0 %v688_v31  ;;  %1832 = vmatmul.mubr.bf16.gmra.mrb[4].mxu1 %v1027_v32  ;;  %v311_v13 = vld [vmem:[%s6983_s27 + $0x360] sm:$0xff]  ;;  %v312_v15 = vld [vmem:[%s6983_s27 + $0x368] sm:$0xff]  ;;  %v298_v17 = vld [vmem:[%s6983_s27 + $0x2f8] sm:$0xff]  ;;  %v692_v20 = vpack.c.bf16 %v280_v12, %v279_v11 }
  0x40   : > { %5864 = vmatpush3.bf16.msra.mxu1 %v704_v34  ;;  %5837 = vmatprep.subr.bf16.mxu0 %v697_v35  ;;  %v329_v18 = vld [vmem:[%s6983_s27 + $0x3f0] sm:$0xff]  ;;  %v330_v19 = vld [vmem:[%s6983_s27 + $0x3f8] sm:$0xff]  ;;  %v708_v21 = vpack.c.bf16 %v312_v15, %v311_v13  ;;  %v701_v22 = vpack.c.bf16 %v298_v17, %v297_v16  ;;  %v884_v28 = vld [vmem:[%s10269_s1 + $0x20] sm:$0xff] }
  0x41   : > { %5865 = vmatprep.subr.bf16.mxu1 %v713_v39  ;;  %1872 = vmatprep.mubr.bf16.mxu0 %v1001_v43  ;;  %v281_v23 = vld [vmem:[%s6983_s27 + $0x270] sm:$0xff]  ;;  %v282_v24 = vld [vmem:[%s6983_s27 + $0x278] sm:$0xff]  ;;  %v717_v26 = vpack.c.bf16 %v330_v19, %v329_v18  ;;  %v347_v29 = vld [vmem:[%s6983_s27 + $0x480] sm:$0xff] }
  0x42   : > { %1921 = vmatprep.mubr.bf16.mxu1 %v1003_v48  ;;  %v313_v25 = vld [vmem:[%s6983_s27 + $0x370] sm:$0xff]  ;;  %v314_v27 = vld [vmem:[%s6983_s27 + $0x378] sm:$0xff]  ;;  %v348_v30 = vld [vmem:[%s6983_s27 + $0x488] sm:$0xff]  ;;  %v693_v34 = vpack.c.bf16 %v282_v24, %v281_v23 }
  0x43   : > { %5838 = vmatpush3.bf16.msra.mxu0 %v689_v47  ;;  %v913_v31 = vld [vmem:[%s10269_s1 + $0x108] sm:$0xff]  ;;  %v379_v32 = vld [vmem:[%s6983_s27 + $0x580] sm:$0xff]  ;;  %v886_v37 = vld [vmem:[%s10269_s1 + $0x30] sm:$0xff]  ;;  %v709_v38 = vpack.c.bf16 %v314_v27, %v313_v25  ;;  %v726_v39 = vpack.c.bf16 %v348_v30, %v347_v29 }
  0x44   : > { %5866 = vmatpush3.bf16.msra.mxu1 %v705_v49  ;;  %5839 = vmatprep.subr.bf16.mxu0 %v698_v50  ;;  %v380_v33 = vld [vmem:[%s6983_s27 + $0x588] sm:$0xff]  ;;  %v331_v35 = vld [vmem:[%s6983_s27 + $0x400] sm:$0xff]  ;;  %v915_v40 = vld [vmem:[%s10269_s1 + $0x118] sm:$0xff]  ;;  %v1000_v47 = vpack.c.bf16 %v913_v31, %v884_v28 }
  0x45   : > { %5867 = vmatprep.subr.bf16.mxu1 %v714_v54  ;;  %v332_v36 = vld [vmem:[%s6983_s27 + $0x408] sm:$0xff]  ;;  %v363_v41 = vld [vmem:[%s6983_s27 + $0x500] sm:$0xff]  ;;  %v742_v43 = vpack.c.bf16 %v380_v33, %v379_v32  ;;  %v349_v44 = vld [vmem:[%s6983_s27 + $0x490] sm:$0xff]  ;;  %v1002_v52 = vpack.c.bf16 %v915_v40, %v886_v37 }
  0x46   : > { %v364_v42 = vld [vmem:[%s6983_s27 + $0x508] sm:$0xff]  ;;  %v350_v45 = vld [vmem:[%s6983_s27 + $0x498] sm:$0xff]  ;;  %v381_v46 = vld [vmem:[%s6983_s27 + $0x590] sm:$0xff]  ;;  %v718_v51 = vpack.c.bf16 %v332_v36, %v331_v35 }
  0x47   : > { %5840 = vmatpush3.bf16.msra.mxu0 %v690_v60  ;;  %v382_v48 = vld [vmem:[%s6983_s27 + $0x598] sm:$0xff]  ;;  %v972_v50 = vld [vmem:[%s10269_s1 + $0x2e0] sm:$0xff]  ;;  %v333_v53 = vld [vmem:[%s6983_s27 + $0x410] sm:$0xff]  ;;  %v734_v56 = vpack.c.bf16 %v364_v42, %v363_v41  ;;  %v727_v57 = vpack.c.bf16 %v350_v45, %v349_v44 }
  0x48   : > { %5868 = vmatpush3.bf16.msra.mxu1 %v706_v61  ;;  %5841 = vmatprep.subr.bf16.mxu0 %v699_v62  ;;  %v943_v49 = vld [vmem:[%s10269_s1 + $0x1f8] sm:$0xff]  ;;  %v945_v54 = vld [vmem:[%s10269_s1 + $0x208] sm:$0xff]  ;;  %v974_v55 = vld [vmem:[%s10269_s1 + $0x2f0] sm:$0xff]  ;;  %v743_v61 = vpack.c.bf16 %v382_v48, %v381_v46 }
  0x49   : > { %5869 = vmatprep.subr.bf16.mxu1 %v715_v2  ;;  %v334_v58 = vld [vmem:[%s6983_s27 + $0x418] sm:$0xff]  ;;  %v365_v59 = vld [vmem:[%s6983_s27 + $0x510] sm:$0xff]  ;;  %v1030_v62 = vpack.c.bf16 %v972_v50, %v943_v49  ;;  %v351_v0 = vld [vmem:[%s6983_s27 + $0x4a0] sm:$0xff]  ;;  %v1032_v3 = vpack.c.bf16 %v974_v55, %v945_v54 }
  0x4a   : > { %v366_v60 = vld [vmem:[%s6983_s27 + $0x518] sm:$0xff]  ;;  %v942_v63 = vld [vmem:[%s10269_s1 + $0x1f0] sm:$0xff]  ;;  %v352_v1 = vld [vmem:[%s6983_s27 + $0x4a8] sm:$0xff]  ;;  %v719_v6 = vpack.c.bf16 %v334_v58, %v333_v53 }
  0x4b   : > { %5842 = vmatpush3.bf16.msra.mxu0 %v691_v8  ;;  %v971_v2 = vld [vmem:[%s10269_s1 + $0x2d8] sm:$0xff]  ;;  %v383_v4 = vld [vmem:[%s6983_s27 + $0x5a0] sm:$0xff]  ;;  %v384_v5 = vld [vmem:[%s6983_s27 + $0x5a8] sm:$0xff]  ;;  %v728_v11 = vpack.c.bf16 %v352_v1, %v351_v0 }
  0x4c   : > { %5870 = vmatpush3.bf16.msra.mxu1 %v707_v9  ;;  %5843 = vmatprep.subr.bf16.mxu0 %v700_v10  ;;  %v335_v7 = vld [vmem:[%s6983_s27 + $0x420] sm:$0xff]  ;;  %v336_v8 = vld [vmem:[%s6983_s27 + $0x428] sm:$0xff]  ;;  %v735_v10 = vpack.c.bf16 %v366_v60, %v365_v59  ;;  %v744_v15 = vpack.c.bf16 %v384_v5, %v383_v4  ;;  %v353_v16 = vld [vmem:[%s6983_s27 + $0x4b0] sm:$0xff]  ;;  %v1029_v19 = vpack.c.bf16 %v971_v2, %v942_v63 }
  0x4d   : > { %5871 = vmatprep.subr.bf16.mxu1 %v716_v14  ;;  %v944_v9 = vld [vmem:[%s10269_s1 + $0x200] sm:$0xff]  ;;  %v973_v12 = vld [vmem:[%s10269_s1 + $0x2e8] sm:$0xff]  ;;  %v354_v17 = vld [vmem:[%s6983_s27 + $0x4b8] sm:$0xff]  ;;  %v720_v23 = vpack.c.bf16 %v336_v8, %v335_v7 }
  0x4e   : > { %v367_v13 = vld [vmem:[%s6983_s27 + $0x520] sm:$0xff]  ;;  %v368_v14 = vld [vmem:[%s6983_s27 + $0x528] sm:$0xff]  ;;  %v385_v18 = vld [vmem:[%s6983_s27 + $0x5b0] sm:$0xff]  ;;  %v1031_v24 = vpack.c.bf16 %v973_v12, %v944_v9  ;;  %v729_v28 = vpack.c.bf16 %v354_v17, %v353_v16 }
  0x4f   : > { %5844 = vmatpush3.bf16.msra.mxu0 %v692_v20  ;;  %v386_v20 = vld [vmem:[%s6983_s27 + $0x5b8] sm:$0xff]  ;;  %v736_v27 = vpack.c.bf16 %v368_v14, %v367_v13  ;;  %v337_v29 = vld [vmem:[%s6983_s27 + $0x430] sm:$0xff]  ;;  %v356_v35 = vld [vmem:[%s6983_s27 + $0x4c8] sm:$0xff] }
  0x50   : > { %5872 = vmatpush3.bf16.msra.mxu1 %v708_v21  ;;  %5845 = vmatprep.subr.bf16.mxu0 %v701_v22  ;;  %v889_v21 = vld [vmem:[%s10269_s1 + $0x48] sm:$0xff]  ;;  %v918_v22 = vld [vmem:[%s10269_s1 + $0x130] sm:$0xff]  ;;  %v891_v25 = vld [vmem:[%s10269_s1 + $0x58] sm:$0xff]  ;;  %v745_v32 = vpack.c.bf16 %v386_v20, %v385_v18 }
  0x51   : > { %5873 = vmatprep.subr.bf16.mxu1 %v717_v26  ;;  %v920_v26 = vld [vmem:[%s10269_s1 + $0x140] sm:$0xff]  ;;  %v338_v30 = vld [vmem:[%s6983_s27 + $0x438] sm:$0xff]  ;;  %v369_v31 = vld [vmem:[%s6983_s27 + $0x530] sm:$0xff]  ;;  %v1005_v36 = vpack.c.bf16 %v918_v22, %v889_v21 }
  0x52   : > { %v370_v33 = vld [vmem:[%s6983_s27 + $0x538] sm:$0xff]  ;;  %v387_v37 = vld [vmem:[%s6983_s27 + $0x5c0] sm:$0xff]  ;;  %v721_v40 = vpack.c.bf16 %v338_v30, %v337_v29  ;;  %v340_v44 = vld [vmem:[%s6983_s27 + $0x448] sm:$0xff] }
  0x53   : > { %5846 = vmatpush3.bf16.msra.mxu0 %v693_v34  ;;  %v355_v34 = vld [vmem:[%s6983_s27 + $0x4c0] sm:$0xff]  ;;  %v737_v41 = vpack.c.bf16 %v370_v33, %v369_v31  ;;  %v357_v48 = vld [vmem:[%s6983_s27 + $0x4d0] sm:$0xff]  ;;  %v358_v49 = vld [vmem:[%s6983_s27 + $0x4d8] sm:$0xff] }
  0x54   : > { %5874 = vmatpush3.bf16.msra.mxu1 %v709_v38  ;;  %5887 = vmatprep.subr.bf16.mxu0 %v726_v39  ;;  %v388_v38 = vld [vmem:[%s6983_s27 + $0x5c8] sm:$0xff]  ;;  %v1007_v39 = vpack.c.bf16 %v920_v26, %v891_v25  ;;  %v730_v42 = vpack.c.bf16 %v356_v35, %v355_v34  ;;  %v371_v45 = vld [vmem:[%s6983_s27 + $0x540] sm:$0xff]  ;;  %v389_v50 = vld [vmem:[%s6983_s27 + $0x5d0] sm:$0xff]  ;;  %v731_v54 = vpack.c.bf16 %v358_v49, %v357_v48 }
  0x55   : > { %5915 = vmatprep.subr.bf16.mxu1 %v742_v43  ;;  %v339_v43 = vld [vmem:[%s6983_s27 + $0x440] sm:$0xff]  ;;  %v746_v46 = vpack.c.bf16 %v388_v38, %v387_v37  ;;  %v341_v55 = vld [vmem:[%s6983_s27 + $0x450] sm:$0xff]  ;;  %v374_v59 = vld [vmem:[%s6983_s27 + $0x558] sm:$0xff] }
  0x56   : > { %1873 = vmatmul.mubr.bf16.vlgmr.msra.gmra.mrb[8].mxu0 %v1000_v47  ;;  %v372_v47 = vld [vmem:[%s6983_s27 + $0x548] sm:$0xff]  ;;  %v359_v60 = vld [vmem:[%s6983_s27 + $0x4e0] sm:$0xff]  ;;  %v361_v8 = vld [vmem:[%s6983_s27 + $0x4f0] sm:$0xff] }
  0x57   : > { %5888 = vmatpush3.bf16.msra.mxu0 %v718_v51  ;;  %1922 = vmatmul.mubr.bf16.vlgmr.msra.gmra.mrb[8].mxu1 %v1002_v52  ;;  %v390_v51 = vld [vmem:[%s6983_s27 + $0x5d8] sm:$0xff]  ;;  %v722_v52 = vpack.c.bf16 %v340_v44, %v339_v43  ;;  %v738_v53 = vpack.c.bf16 %v372_v47, %v371_v45  ;;  %v392_v63 = vld [vmem:[%s6983_s27 + $0x5e8] sm:$0xff]  ;;  %v375_v5 = vld [vmem:[%s6983_s27 + $0x560] sm:$0xff] }
  0x58   : > { %5916 = vmatpush3.bf16.msra.mxu1 %v734_v56  ;;  %5889 = vmatprep.subr.bf16.mxu0 %v727_v57  ;;  %v342_v56 = vld [vmem:[%s6983_s27 + $0x458] sm:$0xff]  ;;  %v373_v57 = vld [vmem:[%s6983_s27 + $0x550] sm:$0xff]  ;;  %v747_v58 = vpack.c.bf16 %v390_v51, %v389_v50  ;;  %v344_v4 = vld [vmem:[%s6983_s27 + $0x468] sm:$0xff] }
  0x59   : > { %5917 = vmatprep.subr.bf16.mxu1 %v743_v61  ;;  %1880 = vmatprep.mubr.bf16.mxu0 %v1030_v62  ;;  %v360_v61 = vld [vmem:[%s6983_s27 + $0x4e8] sm:$0xff]  ;;  %v391_v62 = vld [vmem:[%s6983_s27 + $0x5e0] sm:$0xff]  ;;  %v723_v0 = vpack.c.bf16 %v342_v56, %v341_v55  ;;  %v739_v1 = vpack.c.bf16 %v374_v59, %v373_v57  ;;  %v362_v9 = vld [vmem:[%s6983_s27 + $0x4f8] sm:$0xff] }
  0x5a   : > { %1929 = vmatprep.mubr.bf16.mxu1 %v1032_v3  ;;  %v732_v2 = vpack.c.bf16 %v360_v61, %v359_v60  ;;  %v343_v3 = vld [vmem:[%s6983_s27 + $0x460] sm:$0xff]  ;;  %v376_v7 = vld [vmem:[%s6983_s27 + $0x568] sm:$0xff]  ;;  %v345_v13 = vld [vmem:[%s6983_s27 + $0x470] sm:$0xff] }
  0x5b   : > { %5890 = vmatpush3.bf16.msra.mxu0 %v719_v6  ;;  %v748_v6 = vpack.c.bf16 %v392_v63, %v391_v62  ;;  %v724_v12 = vpack.c.bf16 %v344_v4, %v343_v3  ;;  %v740_v14 = vpack.c.bf16 %v376_v7, %v375_v5  ;;  %v346_v16 = vld [vmem:[%s6983_s27 + $0x478] sm:$0xff]  ;;  %v377_v17 = vld [vmem:[%s6983_s27 + $0x570] sm:$0xff]  ;;  %v888_v20 = vld [vmem:[%s10269_s1 + $0x40] sm:$0xff] }
  0x5c   : > { %5918 = vmatpush3.bf16.msra.mxu1 %v735_v10  ;;  %5891 = vmatprep.subr.bf16.mxu0 %v728_v11  ;;  %v393_v10 = vld [vmem:[%s6983_s27 + $0x5f0] sm:$0xff]  ;;  %v394_v11 = vld [vmem:[%s6983_s27 + $0x5f8] sm:$0xff]  ;;  %v411_v21 = vld [vmem:[%s6983_s27 + $0x680] sm:$0xff]  ;;  %v725_v26 = vpack.c.bf16 %v346_v16, %v345_v13 }
  0x5d   : > { %5919 = vmatprep.subr.bf16.mxu1 %v744_v15  ;;  %v733_v15 = vpack.c.bf16 %v362_v9, %v361_v8  ;;  %v378_v18 = vld [vmem:[%s6983_s27 + $0x578] sm:$0xff]  ;;  %v412_v22 = vld [vmem:[%s6983_s27 + $0x688] sm:$0xff]  ;;  %v890_v29 = vld [vmem:[%s10269_s1 + $0x50] sm:$0xff] }
  0x5e   : > { %1881 = vmatmul.mubr.bf16.gmra.mrb[12].mxu0 %v1029_v19  ;;  %v749_v19 = vpack.c.bf16 %v394_v11, %v393_v10  ;;  %v444_v25 = vld [vmem:[%s6983_s27 + $0x788] sm:$0xff]  ;;  %v741_v30 = vpack.c.bf16 %v378_v18, %v377_v17  ;;  %v758_v31 = vpack.c.bf16 %v412_v22, %v411_v21  ;;  %v427_v33 = vld [vmem:[%s6983_s27 + $0x700] sm:$0xff]  ;;  %v414_v37 = vld [vmem:[%s6983_s27 + $0x698] sm:$0xff] }
  0x5f   : > { %5892 = vmatpush3.bf16.msra.mxu0 %v720_v23  ;;  %1930 = vmatmul.mubr.bf16.gmra.mrb[12].mxu1 %v1031_v24  ;;  %v917_v23 = vld [vmem:[%s10269_s1 + $0x128] sm:$0xff]  ;;  %v443_v24 = vld [vmem:[%s6983_s27 + $0x780] sm:$0xff]  ;;  %v445_v38 = vld [vmem:[%s6983_s27 + $0x790] sm:$0xff] }
  0x60   : > { %5920 = vmatpush3.bf16.msra.mxu1 %v736_v27  ;;  %5893 = vmatprep.subr.bf16.mxu0 %v729_v28  ;;  %v395_v27 = vld [vmem:[%s6983_s27 + $0x600] sm:$0xff]  ;;  %v396_v28 = vld [vmem:[%s6983_s27 + $0x608] sm:$0xff]  ;;  %v774_v35 = vpack.c.bf16 %v444_v25, %v443_v24  ;;  %v397_v45 = vld [vmem:[%s6983_s27 + $0x610] sm:$0xff] }
  0x61   : > { %5921 = vmatprep.subr.bf16.mxu1 %v745_v32  ;;  %1970 = vmatprep.mubr.bf16.mxu0 %v1005_v36  ;;  %v919_v32 = vld [vmem:[%s10269_s1 + $0x138] sm:$0xff]  ;;  %v428_v34 = vld [vmem:[%s6983_s27 + $0x708] sm:$0xff]  ;;  %v413_v36 = vld [vmem:[%s6983_s27 + $0x690] sm:$0xff]  ;;  %v750_v43 = vpack.c.bf16 %v396_v28, %v395_v27 }
  0x62   : > { %2019 = vmatprep.mubr.bf16.mxu1 %v1007_v39  ;;  %v1004_v39 = vpack.c.bf16 %v917_v23, %v888_v20  ;;  %v1006_v44 = vpack.c.bf16 %v919_v32, %v890_v29  ;;  %v978_v47 = vld [vmem:[%s10269_s1 + $0x310] sm:$0xff]  ;;  %v766_v48 = vpack.c.bf16 %v428_v34, %v427_v33  ;;  %v759_v49 = vpack.c.bf16 %v414_v37, %v413_v36  ;;  %v398_v50 = vld [vmem:[%s6983_s27 + $0x618] sm:$0xff]  ;;  %v415_v56 = vld [vmem:[%s6983_s27 + $0x6a0] sm:$0xff] }
  0x63   : > { %5894 = vmatpush3.bf16.msra.mxu0 %v721_v40  ;;  %v446_v40 = vld [vmem:[%s6983_s27 + $0x798] sm:$0xff]  ;;  %v429_v51 = vld [vmem:[%s6983_s27 + $0x710] sm:$0xff]  ;;  %v416_v57 = vld [vmem:[%s6983_s27 + $0x6a8] sm:$0xff]  ;;  %v751_v62 = vpack.c.bf16 %v398_v50, %v397_v45 }
  0x64   : > { %5922 = vmatpush3.bf16.msra.mxu1 %v737_v41  ;;  %5895 = vmatprep.subr.bf16.mxu0 %v730_v42  ;;  %v947_v41 = vld [vmem:[%s10269_s1 + $0x218] sm:$0xff]  ;;  %v976_v42 = vld [vmem:[%s10269_s1 + $0x300] sm:$0xff]  ;;  %v946_v55 = vld [vmem:[%s10269_s1 + $0x210] sm:$0xff]  ;;  %v760_v3 = vpack.c.bf16 %v416_v57, %v415_v56 }
  0x65   : > { %5923 = vmatprep.subr.bf16.mxu1 %v746_v46  ;;  %v949_v46 = vld [vmem:[%s10269_s1 + $0x228] sm:$0xff]  ;;  %v447_v60 = vld [vmem:[%s6983_s27 + $0x7a0] sm:$0xff]  ;;  %v417_v8 = vld [vmem:[%s6983_s27 + $0x6b0] sm:$0xff] }
  0x66   : > { %v1036_v59 = vpack.c.bf16 %v978_v47, %v949_v46  ;;  %v448_v61 = vld [vmem:[%s6983_s27 + $0x7a8] sm:$0xff]  ;;  %v399_v63 = vld [vmem:[%s6983_s27 + $0x620] sm:$0xff]  ;;  %v418_v9 = vld [vmem:[%s6983_s27 + $0x6b8] sm:$0xff] }
  0x67   : > { %5896 = vmatpush3.bf16.msra.mxu0 %v722_v52  ;;  %v430_v52 = vld [vmem:[%s6983_s27 + $0x718] sm:$0xff]  ;;  %v977_v4 = vld [vmem:[%s10269_s1 + $0x308] sm:$0xff]  ;;  %v431_v5 = vld [vmem:[%s6983_s27 + $0x720] sm:$0xff]  ;;  %v776_v7 = vpack.c.bf16 %v448_v61, %v447_v60  ;;  %v761_v20 = vpack.c.bf16 %v418_v9, %v417_v8 }
  0x68   : > { %5924 = vmatpush3.bf16.msra.mxu1 %v738_v53  ;;  %5897 = vmatprep.subr.bf16.mxu0 %v731_v54  ;;  %v775_v53 = vpack.c.bf16 %v446_v40, %v445_v38  ;;  %v1034_v54 = vpack.c.bf16 %v976_v42, %v947_v41  ;;  %v449_v10 = vld [vmem:[%s6983_s27 + $0x7b0] sm:$0xff]  ;;  %v893_v13 = vld [vmem:[%s10269_s1 + $0x68] sm:$0xff]  ;;  %v895_v17 = vld [vmem:[%s10269_s1 + $0x78] sm:$0xff] }
  0x69   : > { %5925 = vmatprep.subr.bf16.mxu1 %v747_v58  ;;  %v975_v58 = vld [vmem:[%s10269_s1 + $0x2f8] sm:$0xff]  ;;  %v924_v18 = vld [vmem:[%s10269_s1 + $0x160] sm:$0xff]  ;;  %v401_v21 = vld [vmem:[%s6983_s27 + $0x630] sm:$0xff] }
  0x6a   : > { %v1033_v11 = vpack.c.bf16 %v975_v58, %v946_v55  ;;  %v402_v22 = vld [vmem:[%s6983_s27 + $0x638] sm:$0xff]  ;;  %v433_v23 = vld [vmem:[%s6983_s27 + $0x730] sm:$0xff]  ;;  %v420_v27 = vld [vmem:[%s6983_s27 + $0x6c8] sm:$0xff] }
  0x6b   : > { %5898 = vmatpush3.bf16.msra.mxu0 %v723_v0  ;;  %v400_v0 = vld [vmem:[%s6983_s27 + $0x628] sm:$0xff]  ;;  %v434_v25 = vld [vmem:[%s6983_s27 + $0x738] sm:$0xff]  ;;  %v451_v29 = vld [vmem:[%s6983_s27 + $0x7c0] sm:$0xff]  ;;  %v753_v32 = vpack.c.bf16 %v402_v22, %v401_v21 }
  0x6c   : > { %5926 = vmatpush3.bf16.msra.mxu1 %v739_v1  ;;  %5899 = vmatprep.subr.bf16.mxu0 %v732_v2  ;;  %v948_v1 = vld [vmem:[%s10269_s1 + $0x220] sm:$0xff]  ;;  %v767_v2 = vpack.c.bf16 %v430_v52, %v429_v51  ;;  %v769_v33 = vpack.c.bf16 %v434_v25, %v433_v23  ;;  %v404_v36 = vld [vmem:[%s6983_s27 + $0x648] sm:$0xff]  ;;  %v421_v40 = vld [vmem:[%s6983_s27 + $0x6d0] sm:$0xff] }
  0x6d   : > { %5927 = vmatprep.subr.bf16.mxu1 %v748_v6  ;;  %v432_v6 = vld [vmem:[%s6983_s27 + $0x728] sm:$0xff]  ;;  %v1035_v16 = vpack.c.bf16 %v977_v4, %v948_v1  ;;  %v435_v37 = vld [vmem:[%s6983_s27 + $0x740] sm:$0xff]  ;;  %v422_v41 = vld [vmem:[%s6983_s27 + $0x6d8] sm:$0xff] }
  0x6e   : > { %v453_v42 = vld [vmem:[%s6983_s27 + $0x7d0] sm:$0xff]  ;;  %v763_v46 = vpack.c.bf16 %v422_v41, %v421_v40  ;;  %v438_v51 = vld [vmem:[%s6983_s27 + $0x758] sm:$0xff]  ;;  %v423_v52 = vld [vmem:[%s6983_s27 + $0x6e0] sm:$0xff] }
  0x6f   : > { %5900 = vmatpush3.bf16.msra.mxu0 %v724_v12  ;;  %v450_v12 = vld [vmem:[%s6983_s27 + $0x7b8] sm:$0xff]  ;;  %v405_v47 = vld [vmem:[%s6983_s27 + $0x650] sm:$0xff]  ;;  %v456_v55 = vld [vmem:[%s6983_s27 + $0x7e8] sm:$0xff] }
  0x70   : > { %5928 = vmatpush3.bf16.msra.mxu1 %v740_v14  ;;  %5901 = vmatprep.subr.bf16.mxu0 %v733_v15  ;;  %v922_v14 = vld [vmem:[%s10269_s1 + $0x150] sm:$0xff]  ;;  %v752_v15 = vpack.c.bf16 %v400_v0, %v399_v63  ;;  %v777_v24 = vpack.c.bf16 %v450_v12, %v449_v10  ;;  %v408_v60 = vld [vmem:[%s6983_s27 + $0x668] sm:$0xff]  ;;  %v439_v61 = vld [vmem:[%s6983_s27 + $0x760] sm:$0xff] }
  0x71   : > { %5929 = vmatprep.subr.bf16.mxu1 %v749_v19  ;;  %v768_v19 = vpack.c.bf16 %v432_v6, %v431_v5  ;;  %v1009_v28 = vpack.c.bf16 %v922_v14, %v893_v13  ;;  %v440_v63 = vld [vmem:[%s6983_s27 + $0x768] sm:$0xff]  ;;  %v425_v0 = vld [vmem:[%s6983_s27 + $0x6f0] sm:$0xff]  ;;  %v426_v1 = vld [vmem:[%s6983_s27 + $0x6f8] sm:$0xff] }
  0x72   : > { %v409_v5 = vld [vmem:[%s6983_s27 + $0x670] sm:$0xff]  ;;  %v772_v6 = vpack.c.bf16 %v440_v63, %v439_v61  ;;  %v410_v8 = vld [vmem:[%s6983_s27 + $0x678] sm:$0xff]  ;;  %v892_v12 = vld [vmem:[%s10269_s1 + $0x60] sm:$0xff] }
  0x73   : > { %5902 = vmatpush3.bf16.msra.mxu0 %v725_v26  ;;  %v419_v26 = vld [vmem:[%s6983_s27 + $0x6c0] sm:$0xff]  ;;  %v441_v9 = vld [vmem:[%s6983_s27 + $0x770] sm:$0xff]  ;;  %v442_v10 = vld [vmem:[%s6983_s27 + $0x778] sm:$0xff] }
  0x74   : > { %5930 = vmatpush3.bf16.msra.mxu1 %v741_v30  ;;  %5943 = vmatprep.subr.bf16.mxu0 %v758_v31  ;;  %v452_v30 = vld [vmem:[%s6983_s27 + $0x7c8] sm:$0xff]  ;;  %v1011_v31 = vpack.c.bf16 %v924_v18, %v895_v17  ;;  %v762_v34 = vpack.c.bf16 %v420_v27, %v419_v26  ;;  %v475_v13 = vld [vmem:[%s6983_s27 + $0x880] sm:$0xff]  ;;  %v757_v18 = vpack.c.bf16 %v410_v8, %v409_v5  ;;  %v894_v21 = vld [vmem:[%s10269_s1 + $0x70] sm:$0xff] }
  0x75   : > { %5971 = vmatprep.subr.bf16.mxu1 %v774_v35  ;;  %v403_v35 = vld [vmem:[%s6983_s27 + $0x640] sm:$0xff]  ;;  %v778_v38 = vpack.c.bf16 %v452_v30, %v451_v29  ;;  %v476_v14 = vld [vmem:[%s6983_s27 + $0x888] sm:$0xff]  ;;  %v773_v22 = vpack.c.bf16 %v442_v10, %v441_v9  ;;  %v478_v29 = vld [vmem:[%s6983_s27 + $0x898] sm:$0xff] }
  0x76   : > { %1971 = vmatmul.mubr.bf16.vlgmr.msra.gmra.mrb[16].mxu0 %v1004_v39  ;;  %v436_v39 = vld [vmem:[%s6983_s27 + $0x748] sm:$0xff]  ;;  %v790_v23 = vpack.c.bf16 %v476_v14, %v475_v13  ;;  %v491_v25 = vld [vmem:[%s6983_s27 + $0x900] sm:$0xff]  ;;  %v509_v30 = vld [vmem:[%s6983_s27 + $0x990] sm:$0xff] }
  0x77   : > { %5944 = vmatpush3.bf16.msra.mxu0 %v750_v43  ;;  %2020 = vmatmul.mubr.bf16.vlgmr.msra.gmra.mrb[16].mxu1 %v1006_v44  ;;  %v454_v43 = vld [vmem:[%s6983_s27 + $0x7d8] sm:$0xff]  ;;  %v754_v44 = vpack.c.bf16 %v404_v36, %v403_v35  ;;  %v770_v45 = vpack.c.bf16 %v436_v39, %v435_v37  ;;  %v508_v17 = vld [vmem:[%s6983_s27 + $0x988] sm:$0xff]  ;;  %v461_v37 = vld [vmem:[%s6983_s27 + $0x810] sm:$0xff] }
  0x78   : > { %5972 = vmatpush3.bf16.msra.mxu1 %v766_v48  ;;  %5945 = vmatprep.subr.bf16.mxu0 %v759_v49  ;;  %v406_v48 = vld [vmem:[%s6983_s27 + $0x658] sm:$0xff]  ;;  %v437_v49 = vld [vmem:[%s6983_s27 + $0x750] sm:$0xff]  ;;  %v779_v50 = vpack.c.bf16 %v454_v43, %v453_v42  ;;  %v492_v26 = vld [vmem:[%s6983_s27 + $0x908] sm:$0xff] }
  0x79   : > { %5973 = vmatprep.subr.bf16.mxu1 %v775_v53  ;;  %1978 = vmatprep.mubr.bf16.mxu0 %v1034_v54  ;;  %v424_v53 = vld [vmem:[%s6983_s27 + $0x6e8] sm:$0xff]  ;;  %v455_v54 = vld [vmem:[%s6983_s27 + $0x7e0] sm:$0xff]  ;;  %v755_v56 = vpack.c.bf16 %v406_v48, %v405_v47  ;;  %v771_v57 = vpack.c.bf16 %v438_v51, %v437_v49  ;;  %v982_v39 = vld [vmem:[%s10269_s1 + $0x330] sm:$0xff]  ;;  %v798_v40 = vpack.c.bf16 %v492_v26, %v491_v25 }
  0x7a   : > { %2027 = vmatprep.mubr.bf16.mxu1 %v1036_v59  ;;  %v764_v58 = vpack.c.bf16 %v424_v53, %v423_v52  ;;  %v407_v59 = vld [vmem:[%s6983_s27 + $0x660] sm:$0xff]  ;;  %v462_v42 = vld [vmem:[%s6983_s27 + $0x818] sm:$0xff]  ;;  %v493_v43 = vld [vmem:[%s6983_s27 + $0x910] sm:$0xff] }
  0x7b   : > { %5946 = vmatpush3.bf16.msra.mxu0 %v751_v62  ;;  %v780_v62 = vpack.c.bf16 %v456_v55, %v455_v54  ;;  %v756_v4 = vpack.c.bf16 %v408_v60, %v407_v59  ;;  %v950_v47 = vld [vmem:[%s10269_s1 + $0x230] sm:$0xff]  ;;  %v479_v48 = vld [vmem:[%s6983_s27 + $0x8a0] sm:$0xff]  ;;  %v480_v49 = vld [vmem:[%s6983_s27 + $0x8a8] sm:$0xff]  ;;  %v783_v54 = vpack.c.bf16 %v462_v42, %v461_v37 }
  0x7c   : > { %5974 = vmatpush3.bf16.msra.mxu1 %v767_v2  ;;  %5947 = vmatprep.subr.bf16.mxu0 %v760_v3  ;;  %v457_v2 = vld [vmem:[%s6983_s27 + $0x7f0] sm:$0xff]  ;;  %v458_v3 = vld [vmem:[%s6983_s27 + $0x7f8] sm:$0xff]  ;;  %v511_v52 = vld [vmem:[%s6983_s27 + $0x9a0] sm:$0xff]  ;;  %v792_v59 = vpack.c.bf16 %v480_v49, %v479_v48 }
  0x7d   : > { %5975 = vmatprep.subr.bf16.mxu1 %v776_v7  ;;  %v765_v7 = vpack.c.bf16 %v426_v1, %v425_v0  ;;  %v512_v53 = vld [vmem:[%s6983_s27 + $0x9a8] sm:$0xff]  ;;  %v463_v55 = vld [vmem:[%s6983_s27 + $0x820] sm:$0xff]  ;;  %v481_v0 = vld [vmem:[%s6983_s27 + $0x8b0] sm:$0xff] }
  0x7e   : > { %1979 = vmatmul.mubr.bf16.gmra.mrb[20].mxu0 %v1033_v11  ;;  %v781_v11 = vpack.c.bf16 %v458_v3, %v457_v2  ;;  %v981_v60 = vld [vmem:[%s10269_s1 + $0x328] sm:$0xff]  ;;  %v495_v61 = vld [vmem:[%s6983_s27 + $0x920] sm:$0xff]  ;;  %v808_v63 = vpack.c.bf16 %v512_v53, %v511_v52  ;;  %v482_v1 = vld [vmem:[%s6983_s27 + $0x8b8] sm:$0xff] }
  0x7f   : > { %5948 = vmatpush3.bf16.msra.mxu0 %v752_v15  ;;  %2028 = vmatmul.mubr.bf16.gmra.mrb[20].mxu1 %v1035_v16  ;;  %v921_v15 = vld [vmem:[%s10269_s1 + $0x148] sm:$0xff]  ;;  %v507_v16 = vld [vmem:[%s6983_s27 + $0x980] sm:$0xff]  ;;  %v513_v2 = vld [vmem:[%s6983_s27 + $0x9b0] sm:$0xff] }
  0x80   : > { %5976 = vmatpush3.bf16.msra.mxu1 %v768_v19  ;;  %5949 = vmatprep.subr.bf16.mxu0 %v761_v20  ;;  %v459_v19 = vld [vmem:[%s6983_s27 + $0x800] sm:$0xff]  ;;  %v460_v20 = vld [vmem:[%s6983_s27 + $0x808] sm:$0xff]  ;;  %v806_v27 = vpack.c.bf16 %v508_v17, %v507_v16  ;;  %v899_v9 = vld [vmem:[%s10269_s1 + $0x98] sm:$0xff] }
  0x81   : > { %5977 = vmatprep.subr.bf16.mxu1 %v777_v24  ;;  %2068 = vmatprep.mubr.bf16.mxu0 %v1009_v28  ;;  %v923_v24 = vld [vmem:[%s10269_s1 + $0x158] sm:$0xff]  ;;  %v477_v28 = vld [vmem:[%s6983_s27 + $0x890] sm:$0xff]  ;;  %v782_v35 = vpack.c.bf16 %v460_v20, %v459_v19  ;;  %v897_v5 = vld [vmem:[%s10269_s1 + $0x88] sm:$0xff] }
  0x82   : > { %2117 = vmatprep.mubr.bf16.mxu1 %v1011_v31  ;;  %v1008_v31 = vpack.c.bf16 %v921_v15, %v892_v12  ;;  %v1010_v36 = vpack.c.bf16 %v923_v24, %v894_v21  ;;  %v791_v41 = vpack.c.bf16 %v478_v29, %v477_v28  ;;  %v928_v10 = vld [vmem:[%s10269_s1 + $0x180] sm:$0xff]  ;;  %v793_v12 = vpack.c.bf16 %v482_v1, %v481_v0  ;;  %v465_v13 = vld [vmem:[%s6983_s27 + $0x830] sm:$0xff]  ;;  %v466_v14 = vld [vmem:[%s6983_s27 + $0x838] sm:$0xff] }
  0x83   : > { %5950 = vmatpush3.bf16.msra.mxu0 %v753_v32  ;;  %v510_v32 = vld [vmem:[%s6983_s27 + $0x998] sm:$0xff]  ;;  %v497_v15 = vld [vmem:[%s6983_s27 + $0x930] sm:$0xff]  ;;  %v484_v19 = vld [vmem:[%s6983_s27 + $0x8c8] sm:$0xff]  ;;  %v785_v24 = vpack.c.bf16 %v466_v14, %v465_v13 }
  0x84   : > { %5978 = vmatpush3.bf16.msra.mxu1 %v769_v33  ;;  %5951 = vmatprep.subr.bf16.mxu0 %v762_v34  ;;  %v951_v33 = vld [vmem:[%s10269_s1 + $0x238] sm:$0xff]  ;;  %v980_v34 = vld [vmem:[%s10269_s1 + $0x320] sm:$0xff]  ;;  %v468_v28 = vld [vmem:[%s6983_s27 + $0x848] sm:$0xff] }
  0x85   : > { %5979 = vmatprep.subr.bf16.mxu1 %v778_v38  ;;  %v953_v38 = vld [vmem:[%s10269_s1 + $0x248] sm:$0xff]  ;;  %v498_v17 = vld [vmem:[%s6983_s27 + $0x938] sm:$0xff]  ;;  %v515_v21 = vld [vmem:[%s6983_s27 + $0x9c0] sm:$0xff] }
  0x86   : > { %v1040_v51 = vpack.c.bf16 %v982_v39, %v953_v38  ;;  %v801_v25 = vpack.c.bf16 %v498_v17, %v497_v15  ;;  %v499_v29 = vld [vmem:[%s6983_s27 + $0x940] sm:$0xff]  ;;  %v469_v39 = vld [vmem:[%s6983_s27 + $0x850] sm:$0xff]  ;;  %v472_v52 = vld [vmem:[%s6983_s27 + $0x868] sm:$0xff] }
  0x87   : > { %5952 = vmatpush3.bf16.msra.mxu0 %v754_v44  ;;  %v494_v44 = vld [vmem:[%s6983_s27 + $0x918] sm:$0xff]  ;;  %v503_v53 = vld [vmem:[%s6983_s27 + $0x960] sm:$0xff]  ;;  %v505_v1 = vld [vmem:[%s6983_s27 + $0x970] sm:$0xff] }
  0x88   : > { %5980 = vmatpush3.bf16.msra.mxu1 %v770_v45  ;;  %5953 = vmatprep.subr.bf16.mxu0 %v763_v46  ;;  %v807_v45 = vpack.c.bf16 %v510_v32, %v509_v30  ;;  %v1038_v46 = vpack.c.bf16 %v980_v34, %v951_v33  ;;  %v485_v32 = vld [vmem:[%s6983_s27 + $0x8d0] sm:$0xff]  ;;  %v486_v33 = vld [vmem:[%s6983_s27 + $0x8d8] sm:$0xff]  ;;  %v555_v17 = vld [vmem:[%s6983_s27 + $0xb00] sm:$0xff] }
  0x89   : > { %5981 = vmatprep.subr.bf16.mxu1 %v779_v50  ;;  %v979_v50 = vld [vmem:[%s10269_s1 + $0x318] sm:$0xff]  ;;  %v517_v34 = vld [vmem:[%s6983_s27 + $0x9d0] sm:$0xff]  ;;  %v795_v38 = vpack.c.bf16 %v486_v33, %v485_v32 }
  0x8a   : > { %v1037_v3 = vpack.c.bf16 %v979_v50, %v950_v47  ;;  %v520_v47 = vld [vmem:[%s6983_s27 + $0x9e8] sm:$0xff]  ;;  %v474_v0 = vld [vmem:[%s6983_s27 + $0x878] sm:$0xff]  ;;  %v898_v13 = vld [vmem:[%s10269_s1 + $0x90] sm:$0xff] }
  0x8b   : > { %5954 = vmatpush3.bf16.msra.mxu0 %v755_v56  ;;  %v464_v56 = vld [vmem:[%s6983_s27 + $0x828] sm:$0xff] }
  0x8c   : > { %5982 = vmatpush3.bf16.msra.mxu1 %v771_v57  ;;  %5955 = vmatprep.subr.bf16.mxu0 %v764_v58  ;;  %v952_v57 = vld [vmem:[%s10269_s1 + $0x240] sm:$0xff]  ;;  %v799_v58 = vpack.c.bf16 %v494_v44, %v493_v43  ;;  %v502_v43 = vld [vmem:[%s6983_s27 + $0x958] sm:$0xff] }
  0x8d   : > { %5983 = vmatprep.subr.bf16.mxu1 %v780_v62  ;;  %v496_v62 = vld [vmem:[%s6983_s27 + $0x928] sm:$0xff]  ;;  %v1039_v8 = vpack.c.bf16 %v981_v60, %v952_v57  ;;  %v487_v44 = vld [vmem:[%s6983_s27 + $0x8e0] sm:$0xff]  ;;  %v490_v57 = vld [vmem:[%s6983_s27 + $0x8f8] sm:$0xff] }
  0x8f   : > { %5956 = vmatpush3.bf16.msra.mxu0 %v756_v4  ;;  %v514_v4 = vld [vmem:[%s6983_s27 + $0x9b8] sm:$0xff] }
  0x90   : > { %5984 = vmatpush3.bf16.msra.mxu1 %v772_v6  ;;  %5957 = vmatprep.subr.bf16.mxu0 %v765_v7  ;;  %v926_v6 = vld [vmem:[%s10269_s1 + $0x170] sm:$0xff]  ;;  %v784_v7 = vpack.c.bf16 %v464_v56, %v463_v55  ;;  %v809_v16 = vpack.c.bf16 %v514_v4, %v513_v2  ;;  %v504_v55 = vld [vmem:[%s6983_s27 + $0x968] sm:$0xff]  ;;  %v506_v2 = vld [vmem:[%s6983_s27 + $0x978] sm:$0xff] }
  0x91   : > { %5985 = vmatprep.subr.bf16.mxu1 %v781_v11  ;;  %v800_v11 = vpack.c.bf16 %v496_v62, %v495_v61  ;;  %v1013_v20 = vpack.c.bf16 %v926_v6, %v897_v5  ;;  %v489_v56 = vld [vmem:[%s6983_s27 + $0x8f0] sm:$0xff]  ;;  %v804_v62 = vpack.c.bf16 %v504_v55, %v503_v53  ;;  %v896_v4 = vld [vmem:[%s10269_s1 + $0x80] sm:$0xff]  ;;  %v540_v6 = vld [vmem:[%s6983_s27 + $0xa88] sm:$0xff]  ;;  %v805_v14 = vpack.c.bf16 %v506_v2, %v505_v1 }
  0x92   : > { %v473_v61 = vld [vmem:[%s6983_s27 + $0x870] sm:$0xff]  ;;  %v539_v5 = vld [vmem:[%s6983_s27 + $0xa80] sm:$0xff]  ;;  %v903_v1 = vld [vmem:[%s10269_s1 + $0xb8] sm:$0xff] }
  0x93   : > { %5958 = vmatpush3.bf16.msra.mxu0 %v757_v18  ;;  %v483_v18 = vld [vmem:[%s6983_s27 + $0x8c0] sm:$0xff]  ;;  %v822_v15 = vpack.c.bf16 %v540_v6, %v539_v5  ;;  %v529_v5 = vld [vmem:[%s6983_s27 + $0xa30] sm:$0xff]  ;;  %v530_v6 = vld [vmem:[%s6983_s27 + $0xa38] sm:$0xff] }
  0x94   : > { %5986 = vmatpush3.bf16.msra.mxu1 %v773_v22  ;;  %5999 = vmatprep.subr.bf16.mxu0 %v790_v23  ;;  %v516_v22 = vld [vmem:[%s6983_s27 + $0x9c8] sm:$0xff]  ;;  %v1015_v23 = vpack.c.bf16 %v928_v10, %v899_v9  ;;  %v794_v26 = vpack.c.bf16 %v484_v19, %v483_v18  ;;  %v789_v10 = vpack.c.bf16 %v474_v0, %v473_v61  ;;  %v559_v53 = vld [vmem:[%s6983_s27 + $0xb20] sm:$0xff] }
  0x95   : > { %6027 = vmatprep.subr.bf16.mxu1 %v806_v27  ;;  %v467_v27 = vld [vmem:[%s6983_s27 + $0x840] sm:$0xff]  ;;  %v810_v30 = vpack.c.bf16 %v516_v22, %v515_v21  ;;  %v572_v9 = vld [vmem:[%s6983_s27 + $0xb88] sm:$0xff]  ;;  %v542_v21 = vld [vmem:[%s6983_s27 + $0xa98] sm:$0xff] }
  0x96   : > { %2069 = vmatmul.mubr.bf16.vlgmr.msra.gmra.mrb[24].mxu0 %v1008_v31  ;;  %v500_v31 = vld [vmem:[%s6983_s27 + $0x948] sm:$0xff]  ;;  %v573_v22 = vld [vmem:[%s6983_s27 + $0xb90] sm:$0xff]  ;;  %v932_v2 = vld [vmem:[%s10269_s1 + $0x1a0] sm:$0xff] }
  0x97   : > { %6000 = vmatpush3.bf16.msra.mxu0 %v782_v35  ;;  %2118 = vmatmul.mubr.bf16.vlgmr.msra.gmra.mrb[24].mxu1 %v1010_v36  ;;  %v518_v35 = vld [vmem:[%s6983_s27 + $0x9d8] sm:$0xff]  ;;  %v786_v36 = vpack.c.bf16 %v468_v28, %v467_v27  ;;  %v802_v37 = vpack.c.bf16 %v500_v31, %v499_v29  ;;  %v556_v18 = vld [vmem:[%s6983_s27 + $0xb08] sm:$0xff]  ;;  %v525_v29 = vld [vmem:[%s6983_s27 + $0xa10] sm:$0xff] }
  0x98   : > { %6028 = vmatpush3.bf16.msra.mxu1 %v798_v40  ;;  %6001 = vmatprep.subr.bf16.mxu0 %v791_v41  ;;  %v470_v40 = vld [vmem:[%s6983_s27 + $0x858] sm:$0xff]  ;;  %v501_v41 = vld [vmem:[%s6983_s27 + $0x950] sm:$0xff]  ;;  %v811_v42 = vpack.c.bf16 %v518_v35, %v517_v34  ;;  %v830_v32 = vpack.c.bf16 %v556_v18, %v555_v17  ;;  %v901_v61 = vld [vmem:[%s10269_s1 + $0xa8] sm:$0xff] }
  0x99   : > { %6029 = vmatprep.subr.bf16.mxu1 %v807_v45  ;;  %2076 = vmatprep.mubr.bf16.mxu0 %v1038_v46  ;;  %v488_v45 = vld [vmem:[%s6983_s27 + $0x8e8] sm:$0xff]  ;;  %v519_v46 = vld [vmem:[%s6983_s27 + $0x9e0] sm:$0xff]  ;;  %v787_v48 = vpack.c.bf16 %v470_v40, %v469_v39  ;;  %v803_v49 = vpack.c.bf16 %v502_v43, %v501_v41  ;;  %v986_v31 = vld [vmem:[%s10269_s1 + $0x350] sm:$0xff] }
  0x9a   : > { %2125 = vmatprep.mubr.bf16.mxu1 %v1040_v51  ;;  %v796_v50 = vpack.c.bf16 %v488_v45, %v487_v44  ;;  %v471_v51 = vld [vmem:[%s6983_s27 + $0x860] sm:$0xff]  ;;  %v526_v34 = vld [vmem:[%s6983_s27 + $0xa18] sm:$0xff]  ;;  %v557_v35 = vld [vmem:[%s6983_s27 + $0xb10] sm:$0xff] }
  0x9b   : > { %6002 = vmatpush3.bf16.msra.mxu0 %v783_v54  ;;  %v812_v54 = vpack.c.bf16 %v520_v47, %v519_v46  ;;  %v788_v60 = vpack.c.bf16 %v472_v52, %v471_v51  ;;  %v954_v39 = vld [vmem:[%s10269_s1 + $0x250] sm:$0xff]  ;;  %v543_v40 = vld [vmem:[%s6983_s27 + $0xaa0] sm:$0xff]  ;;  %v544_v41 = vld [vmem:[%s6983_s27 + $0xaa8] sm:$0xff]  ;;  %v815_v46 = vpack.c.bf16 %v526_v34, %v525_v29 }
  0x9c   : > { %6030 = vmatpush3.bf16.msra.mxu1 %v799_v58  ;;  %6003 = vmatprep.subr.bf16.mxu0 %v792_v59  ;;  %v521_v58 = vld [vmem:[%s6983_s27 + $0x9f0] sm:$0xff]  ;;  %v522_v59 = vld [vmem:[%s6983_s27 + $0x9f8] sm:$0xff]  ;;  %v575_v44 = vld [vmem:[%s6983_s27 + $0xba0] sm:$0xff]  ;;  %v824_v51 = vpack.c.bf16 %v544_v41, %v543_v40 }
  0x9d   : > { %6031 = vmatprep.subr.bf16.mxu1 %v808_v63  ;;  %v797_v63 = vpack.c.bf16 %v490_v57, %v489_v56  ;;  %v576_v45 = vld [vmem:[%s6983_s27 + $0xba8] sm:$0xff]  ;;  %v527_v47 = vld [vmem:[%s6983_s27 + $0xa20] sm:$0xff]  ;;  %v545_v56 = vld [vmem:[%s6983_s27 + $0xab0] sm:$0xff] }
  0x9e   : > { %2077 = vmatmul.mubr.bf16.gmra.mrb[28].mxu0 %v1037_v3  ;;  %v813_v3 = vpack.c.bf16 %v522_v59, %v521_v58  ;;  %v985_v52 = vld [vmem:[%s10269_s1 + $0x348] sm:$0xff]  ;;  %v840_v55 = vpack.c.bf16 %v576_v45, %v575_v44  ;;  %v546_v57 = vld [vmem:[%s6983_s27 + $0xab8] sm:$0xff]  ;;  %v577_v58 = vld [vmem:[%s6983_s27 + $0xbb0] sm:$0xff] }
  0x9f   : > { %6004 = vmatpush3.bf16.msra.mxu0 %v784_v7  ;;  %2126 = vmatmul.mubr.bf16.gmra.mrb[28].mxu1 %v1039_v8  ;;  %v925_v7 = vld [vmem:[%s10269_s1 + $0x168] sm:$0xff]  ;;  %v571_v8 = vld [vmem:[%s6983_s27 + $0xb80] sm:$0xff] }
  0xa0   : > { %6032 = vmatpush3.bf16.msra.mxu1 %v800_v11  ;;  %6005 = vmatprep.subr.bf16.mxu0 %v793_v12  ;;  %v523_v11 = vld [vmem:[%s6983_s27 + $0xa00] sm:$0xff]  ;;  %v524_v12 = vld [vmem:[%s6983_s27 + $0xa08] sm:$0xff]  ;;  %v838_v19 = vpack.c.bf16 %v572_v9, %v571_v8  ;;  %v562_v9 = vld [vmem:[%s6983_s27 + $0xb38] sm:$0xff] }
  0xa1   : > { %6033 = vmatprep.subr.bf16.mxu1 %v809_v16  ;;  %2166 = vmatprep.mubr.bf16.mxu0 %v1013_v20  ;;  %v927_v16 = vld [vmem:[%s10269_s1 + $0x178] sm:$0xff]  ;;  %v541_v20 = vld [vmem:[%s6983_s27 + $0xa90] sm:$0xff]  ;;  %v814_v27 = vpack.c.bf16 %v524_v12, %v523_v11  ;;  %v548_v11 = vld [vmem:[%s6983_s27 + $0xac8] sm:$0xff] }
  0xa2   : > { %2215 = vmatprep.mubr.bf16.mxu1 %v1015_v23  ;;  %v1012_v23 = vpack.c.bf16 %v925_v7, %v896_v4  ;;  %v1014_v28 = vpack.c.bf16 %v927_v16, %v898_v13  ;;  %v823_v33 = vpack.c.bf16 %v542_v21, %v541_v20  ;;  %v825_v4 = vpack.c.bf16 %v546_v57, %v545_v56  ;;  %v561_v7 = vld [vmem:[%s6983_s27 + $0xb30] sm:$0xff]  ;;  %v579_v13 = vld [vmem:[%s6983_s27 + $0xbc0] sm:$0xff]  ;;  %v532_v20 = vld [vmem:[%s6983_s27 + $0xa48] sm:$0xff] }
  0xa3   : > { %6006 = vmatpush3.bf16.msra.mxu0 %v785_v24  ;;  %v574_v24 = vld [vmem:[%s6983_s27 + $0xb98] sm:$0xff]  ;;  %v817_v16 = vpack.c.bf16 %v530_v6, %v529_v5  ;;  %v833_v17 = vpack.c.bf16 %v562_v9, %v561_v7  ;;  %v563_v21 = vld [vmem:[%s6983_s27 + $0xb40] sm:$0xff]  ;;  %v536_v44 = vld [vmem:[%s6983_s27 + $0xa68] sm:$0xff] }
  0xa4   : > { %6034 = vmatpush3.bf16.msra.mxu1 %v801_v25  ;;  %6007 = vmatprep.subr.bf16.mxu0 %v794_v26  ;;  %v955_v25 = vld [vmem:[%s10269_s1 + $0x258] sm:$0xff]  ;;  %v984_v26 = vld [vmem:[%s10269_s1 + $0x340] sm:$0xff]  ;;  %v569_v57 = vld [vmem:[%s6983_s27 + $0xb70] sm:$0xff] }
  0xa5   : > { %6035 = vmatprep.subr.bf16.mxu1 %v810_v30  ;;  %v957_v30 = vld [vmem:[%s10269_s1 + $0x268] sm:$0xff]  ;;  %v567_v45 = vld [vmem:[%s6983_s27 + $0xb60] sm:$0xff]  ;;  %v538_v56 = vld [vmem:[%s6983_s27 + $0xa78] sm:$0xff] }
  0xa6   : > { %v1044_v43 = vpack.c.bf16 %v986_v31, %v957_v30  ;;  %v533_v31 = vld [vmem:[%s6983_s27 + $0xa50] sm:$0xff]  ;;  %v619_v9 = vld [vmem:[%s6983_s27 + $0xd00] sm:$0xff] }
  0xa7   : > { %6008 = vmatpush3.bf16.msra.mxu0 %v786_v36  ;;  %v558_v36 = vld [vmem:[%s6983_s27 + $0xb18] sm:$0xff]  ;;  %v902_v5 = vld [vmem:[%s10269_s1 + $0xb0] sm:$0xff] }
  0xa8   : > { %6036 = vmatpush3.bf16.msra.mxu1 %v802_v37  ;;  %6009 = vmatprep.subr.bf16.mxu0 %v795_v38  ;;  %v839_v37 = vpack.c.bf16 %v574_v24, %v573_v22  ;;  %v1042_v38 = vpack.c.bf16 %v984_v26, %v955_v25  ;;  %v549_v24 = vld [vmem:[%s6983_s27 + $0xad0] sm:$0xff]  ;;  %v550_v25 = vld [vmem:[%s6983_s27 + $0xad8] sm:$0xff] }
  0xa9   : > { %6037 = vmatprep.subr.bf16.mxu1 %v811_v42  ;;  %v983_v42 = vld [vmem:[%s10269_s1 + $0x338] sm:$0xff]  ;;  %v581_v26 = vld [vmem:[%s6983_s27 + $0xbd0] sm:$0xff]  ;;  %v827_v30 = vpack.c.bf16 %v550_v25, %v549_v24 }
  0xaa   : > { %v1041_v59 = vpack.c.bf16 %v983_v42, %v954_v39  ;;  %v584_v39 = vld [vmem:[%s6983_s27 + $0xbe8] sm:$0xff] }
  0xab   : > { %6010 = vmatpush3.bf16.msra.mxu0 %v787_v48  ;;  %v528_v48 = vld [vmem:[%s6983_s27 + $0xa28] sm:$0xff] }
  0xac   : > { %6038 = vmatpush3.bf16.msra.mxu1 %v803_v49  ;;  %6011 = vmatprep.subr.bf16.mxu0 %v796_v50  ;;  %v956_v49 = vld [vmem:[%s10269_s1 + $0x260] sm:$0xff]  ;;  %v831_v50 = vpack.c.bf16 %v558_v36, %v557_v35  ;;  %v566_v35 = vld [vmem:[%s6983_s27 + $0xb58] sm:$0xff] }
  0xad   : > { %6039 = vmatprep.subr.bf16.mxu1 %v812_v54  ;;  %v560_v54 = vld [vmem:[%s6983_s27 + $0xb28] sm:$0xff]  ;;  %v1043_v0 = vpack.c.bf16 %v985_v52, %v956_v49  ;;  %v551_v36 = vld [vmem:[%s6983_s27 + $0xae0] sm:$0xff]  ;;  %v554_v49 = vld [vmem:[%s6983_s27 + $0xaf8] sm:$0xff] }
  0xaf   : > { %6012 = vmatpush3.bf16.msra.mxu0 %v788_v60  ;;  %v578_v60 = vld [vmem:[%s6983_s27 + $0xbb8] sm:$0xff] }
  0xb0   : > { %6040 = vmatpush3.bf16.msra.mxu1 %v804_v62  ;;  %6013 = vmatprep.subr.bf16.mxu0 %v797_v63  ;;  %v930_v62 = vld [vmem:[%s10269_s1 + $0x190] sm:$0xff]  ;;  %v816_v63 = vpack.c.bf16 %v528_v48, %v527_v47  ;;  %v841_v8 = vpack.c.bf16 %v578_v60, %v577_v58  ;;  %v568_v47 = vld [vmem:[%s6983_s27 + $0xb68] sm:$0xff]  ;;  %v570_v58 = vld [vmem:[%s6983_s27 + $0xb78] sm:$0xff] }
  0xb1   : > { %6041 = vmatprep.subr.bf16.mxu1 %v813_v3  ;;  %v832_v3 = vpack.c.bf16 %v560_v54, %v559_v53  ;;  %v1017_v12 = vpack.c.bf16 %v930_v62, %v901_v61  ;;  %v553_v48 = vld [vmem:[%s6983_s27 + $0xaf0] sm:$0xff]  ;;  %v836_v54 = vpack.c.bf16 %v568_v47, %v567_v45  ;;  %v900_v60 = vld [vmem:[%s10269_s1 + $0xa0] sm:$0xff]  ;;  %v604_v62 = vld [vmem:[%s6983_s27 + $0xc88] sm:$0xff]  ;;  %v837_v6 = vpack.c.bf16 %v570_v58, %v569_v57 }
  0xb2   : > { %v537_v53 = vld [vmem:[%s6983_s27 + $0xa70] sm:$0xff]  ;;  %v603_v61 = vld [vmem:[%s6983_s27 + $0xc80] sm:$0xff]  ;;  %v907_v57 = vld [vmem:[%s10269_s1 + $0xd8] sm:$0xff] }
  0xb3   : > { %6014 = vmatpush3.bf16.msra.mxu0 %v789_v10  ;;  %v547_v10 = vld [vmem:[%s6983_s27 + $0xac0] sm:$0xff]  ;;  %v854_v7 = vpack.c.bf16 %v604_v62, %v603_v61  ;;  %v593_v61 = vld [vmem:[%s6983_s27 + $0xc30] sm:$0xff]  ;;  %v594_v62 = vld [vmem:[%s6983_s27 + $0xc38] sm:$0xff] }
  0xb4   : > { %6042 = vmatpush3.bf16.msra.mxu1 %v805_v14  ;;  %6055 = vmatprep.subr.bf16.mxu0 %v822_v15  ;;  %v580_v14 = vld [vmem:[%s6983_s27 + $0xbc8] sm:$0xff]  ;;  %v1019_v15 = vpack.c.bf16 %v932_v2, %v903_v1  ;;  %v826_v18 = vpack.c.bf16 %v548_v11, %v547_v10  ;;  %v821_v2 = vpack.c.bf16 %v538_v56, %v537_v53  ;;  %v623_v45 = vld [vmem:[%s6983_s27 + $0xd20] sm:$0xff] }
  0xb5   : > { %6083 = vmatprep.subr.bf16.mxu1 %v838_v19  ;;  %v531_v19 = vld [vmem:[%s6983_s27 + $0xa40] sm:$0xff]  ;;  %v842_v22 = vpack.c.bf16 %v580_v14, %v579_v13  ;;  %v636_v1 = vld [vmem:[%s6983_s27 + $0xd88] sm:$0xff]  ;;  %v606_v13 = vld [vmem:[%s6983_s27 + $0xc98] sm:$0xff] }
  0xb6   : > { %2167 = vmatmul.mubr.bf16.vlgmr.msra.gmra.mrb[32].mxu0 %v1012_v23  ;;  %v564_v23 = vld [vmem:[%s6983_s27 + $0xb48] sm:$0xff]  ;;  %v637_v14 = vld [vmem:[%s6983_s27 + $0xd90] sm:$0xff]  ;;  %v936_v58 = vld [vmem:[%s10269_s1 + $0x1c0] sm:$0xff] }
  0xb7   : > { %6056 = vmatpush3.bf16.msra.mxu0 %v814_v27  ;;  %2216 = vmatmul.mubr.bf16.vlgmr.msra.gmra.mrb[32].mxu1 %v1014_v28  ;;  %v582_v27 = vld [vmem:[%s6983_s27 + $0xbd8] sm:$0xff]  ;;  %v818_v28 = vpack.c.bf16 %v532_v20, %v531_v19  ;;  %v834_v29 = vpack.c.bf16 %v564_v23, %v563_v21  ;;  %v620_v10 = vld [vmem:[%s6983_s27 + $0xd08] sm:$0xff]  ;;  %v589_v21 = vld [vmem:[%s6983_s27 + $0xc10] sm:$0xff] }
  0xb8   : > { %6084 = vmatpush3.bf16.msra.mxu1 %v830_v32  ;;  %6057 = vmatprep.subr.bf16.mxu0 %v823_v33  ;;  %v534_v32 = vld [vmem:[%s6983_s27 + $0xa58] sm:$0xff]  ;;  %v565_v33 = vld [vmem:[%s6983_s27 + $0xb50] sm:$0xff]  ;;  %v843_v34 = vpack.c.bf16 %v582_v27, %v581_v26  ;;  %v862_v24 = vpack.c.bf16 %v620_v10, %v619_v9  ;;  %v905_v53 = vld [vmem:[%s10269_s1 + $0xc8] sm:$0xff] }
  0xb9   : > { %6085 = vmatprep.subr.bf16.mxu1 %v839_v37  ;;  %2174 = vmatprep.mubr.bf16.mxu0 %v1042_v38  ;;  %v552_v37 = vld [vmem:[%s6983_s27 + $0xae8] sm:$0xff]  ;;  %v583_v38 = vld [vmem:[%s6983_s27 + $0xbe0] sm:$0xff]  ;;  %v819_v40 = vpack.c.bf16 %v534_v32, %v533_v31  ;;  %v835_v41 = vpack.c.bf16 %v566_v35, %v565_v33  ;;  %v990_v23 = vld [vmem:[%s10269_s1 + $0x370] sm:$0xff] }
  0xba   : > { %2223 = vmatprep.mubr.bf16.mxu1 %v1044_v43  ;;  %v828_v42 = vpack.c.bf16 %v552_v37, %v551_v36  ;;  %v535_v43 = vld [vmem:[%s6983_s27 + $0xa60] sm:$0xff]  ;;  %v590_v26 = vld [vmem:[%s6983_s27 + $0xc18] sm:$0xff]  ;;  %v621_v27 = vld [vmem:[%s6983_s27 + $0xd10] sm:$0xff] }
  0xbb   : > { %6058 = vmatpush3.bf16.msra.mxu0 %v815_v46  ;;  %v844_v46 = vpack.c.bf16 %v584_v39, %v583_v38  ;;  %v820_v52 = vpack.c.bf16 %v536_v44, %v535_v43  ;;  %v958_v31 = vld [vmem:[%s10269_s1 + $0x270] sm:$0xff]  ;;  %v607_v32 = vld [vmem:[%s6983_s27 + $0xca0] sm:$0xff]  ;;  %v608_v33 = vld [vmem:[%s6983_s27 + $0xca8] sm:$0xff]  ;;  %v847_v38 = vpack.c.bf16 %v590_v26, %v589_v21 }
  0xbc   : > { %6086 = vmatpush3.bf16.msra.mxu1 %v831_v50  ;;  %6059 = vmatprep.subr.bf16.mxu0 %v824_v51  ;;  %v585_v50 = vld [vmem:[%s6983_s27 + $0xbf0] sm:$0xff]  ;;  %v586_v51 = vld [vmem:[%s6983_s27 + $0xbf8] sm:$0xff]  ;;  %v639_v36 = vld [vmem:[%s6983_s27 + $0xda0] sm:$0xff]  ;;  %v856_v43 = vpack.c.bf16 %v608_v33, %v607_v32 }
  0xbd   : > { %6087 = vmatprep.subr.bf16.mxu1 %v840_v55  ;;  %v829_v55 = vpack.c.bf16 %v554_v49, %v553_v48  ;;  %v640_v37 = vld [vmem:[%s6983_s27 + $0xda8] sm:$0xff]  ;;  %v591_v39 = vld [vmem:[%s6983_s27 + $0xc20] sm:$0xff]  ;;  %v609_v48 = vld [vmem:[%s6983_s27 + $0xcb0] sm:$0xff] }
  0xbe   : > { %2175 = vmatmul.mubr.bf16.gmra.mrb[36].mxu0 %v1041_v59  ;;  %v845_v59 = vpack.c.bf16 %v586_v51, %v585_v50  ;;  %v989_v44 = vld [vmem:[%s10269_s1 + $0x368] sm:$0xff]  ;;  %v872_v47 = vpack.c.bf16 %v640_v37, %v639_v36  ;;  %v610_v49 = vld [vmem:[%s6983_s27 + $0xcb8] sm:$0xff]  ;;  %v641_v50 = vld [vmem:[%s6983_s27 + $0xdb0] sm:$0xff] }
  0xbf   : > { %6060 = vmatpush3.bf16.msra.mxu0 %v816_v63  ;;  %2224 = vmatmul.mubr.bf16.gmra.mrb[36].mxu1 %v1043_v0  ;;  %v929_v63 = vld [vmem:[%s10269_s1 + $0x188] sm:$0xff]  ;;  %v635_v0 = vld [vmem:[%s6983_s27 + $0xd80] sm:$0xff] }
  0xc0   : > { %6088 = vmatpush3.bf16.msra.mxu1 %v832_v3  ;;  %6061 = vmatprep.subr.bf16.mxu0 %v825_v4  ;;  %v587_v3 = vld [vmem:[%s6983_s27 + $0xc00] sm:$0xff]  ;;  %v588_v4 = vld [vmem:[%s6983_s27 + $0xc08] sm:$0xff]  ;;  %v870_v11 = vpack.c.bf16 %v636_v1, %v635_v0  ;;  %v626_v1 = vld [vmem:[%s6983_s27 + $0xd38] sm:$0xff] }
  0xc1   : > { %6089 = vmatprep.subr.bf16.mxu1 %v841_v8  ;;  %2264 = vmatprep.mubr.bf16.mxu0 %v1017_v12  ;;  %v931_v8 = vld [vmem:[%s10269_s1 + $0x198] sm:$0xff]  ;;  %v605_v12 = vld [vmem:[%s6983_s27 + $0xc90] sm:$0xff]  ;;  %v846_v19 = vpack.c.bf16 %v588_v4, %v587_v3  ;;  %v612_v3 = vld [vmem:[%s6983_s27 + $0xcc8] sm:$0xff] }
  0xc2   : > { %2313 = vmatprep.mubr.bf16.mxu1 %v1019_v15  ;;  %v1016_v15 = vpack.c.bf16 %v929_v63, %v900_v60  ;;  %v1018_v20 = vpack.c.bf16 %v931_v8, %v902_v5  ;;  %v855_v25 = vpack.c.bf16 %v606_v13, %v605_v12  ;;  %v857_v60 = vpack.c.bf16 %v610_v49, %v609_v48  ;;  %v625_v63 = vld [vmem:[%s6983_s27 + $0xd30] sm:$0xff]  ;;  %v643_v5 = vld [vmem:[%s6983_s27 + $0xdc0] sm:$0xff]  ;;  %v596_v12 = vld [vmem:[%s6983_s27 + $0xc48] sm:$0xff] }
  0xc3   : > { %6062 = vmatpush3.bf16.msra.mxu0 %v817_v16  ;;  %v638_v16 = vld [vmem:[%s6983_s27 + $0xd98] sm:$0xff]  ;;  %v849_v8 = vpack.c.bf16 %v594_v62, %v593_v61  ;;  %v865_v9 = vpack.c.bf16 %v626_v1, %v625_v63  ;;  %v627_v13 = vld [vmem:[%s6983_s27 + $0xd40] sm:$0xff]  ;;  %v600_v36 = vld [vmem:[%s6983_s27 + $0xc68] sm:$0xff] }
  0xc4   : > { %6090 = vmatpush3.bf16.msra.mxu1 %v833_v17  ;;  %6063 = vmatprep.subr.bf16.mxu0 %v826_v18  ;;  %v959_v17 = vld [vmem:[%s10269_s1 + $0x278] sm:$0xff]  ;;  %v988_v18 = vld [vmem:[%s10269_s1 + $0x360] sm:$0xff]  ;;  %v633_v49 = vld [vmem:[%s6983_s27 + $0xd70] sm:$0xff] }
  0xc5   : > { %6091 = vmatprep.subr.bf16.mxu1 %v842_v22  ;;  %v961_v22 = vld [vmem:[%s10269_s1 + $0x288] sm:$0xff]  ;;  %v631_v37 = vld [vmem:[%s6983_s27 + $0xd60] sm:$0xff]  ;;  %v602_v48 = vld [vmem:[%s6983_s27 + $0xc78] sm:$0xff] }
  0xc6   : > { %v1048_v35 = vpack.c.bf16 %v990_v23, %v961_v22  ;;  %v597_v23 = vld [vmem:[%s6983_s27 + $0xc50] sm:$0xff]  ;;  %v992_v61 = vld [vmem:[%s10269_s1 + $0x380] sm:$0xff]  ;;  %v965_v63 = vld [vmem:[%s10269_s1 + $0x2a8] sm:$0xff] }
  0xc7   : > { %6064 = vmatpush3.bf16.msra.mxu0 %v818_v28  ;;  %v622_v28 = vld [vmem:[%s6983_s27 + $0xd18] sm:$0xff] }
  0xc8   : > { %6092 = vmatpush3.bf16.msra.mxu1 %v834_v29  ;;  %6065 = vmatprep.subr.bf16.mxu0 %v827_v30  ;;  %v871_v29 = vpack.c.bf16 %v638_v16, %v637_v14  ;;  %v1046_v30 = vpack.c.bf16 %v988_v18, %v959_v17  ;;  %v613_v16 = vld [vmem:[%s6983_s27 + $0xcd0] sm:$0xff]  ;;  %v614_v17 = vld [vmem:[%s6983_s27 + $0xcd8] sm:$0xff] }
  0xc9   : > { %6093 = vmatprep.subr.bf16.mxu1 %v843_v34  ;;  %v987_v34 = vld [vmem:[%s10269_s1 + $0x358] sm:$0xff]  ;;  %v645_v18 = vld [vmem:[%s6983_s27 + $0xdd0] sm:$0xff]  ;;  %v859_v22 = vpack.c.bf16 %v614_v17, %v613_v16 }
  0xca   : > { %v1045_v51 = vpack.c.bf16 %v987_v34, %v958_v31  ;;  %v648_v31 = vld [vmem:[%s6983_s27 + $0xde8] sm:$0xff]  ;;  %v966_v17 = vld [vmem:[%s10269_s1 + $0x2b0] sm:$0xff] }
  0xcb   : > { %6066 = vmatpush3.bf16.msra.mxu0 %v819_v40  ;;  %v592_v40 = vld [vmem:[%s6983_s27 + $0xc28] sm:$0xff] }
  0xcc   : > { %6094 = vmatpush3.bf16.msra.mxu1 %v835_v41  ;;  %6067 = vmatprep.subr.bf16.mxu0 %v828_v42  ;;  %v960_v41 = vld [vmem:[%s10269_s1 + $0x280] sm:$0xff]  ;;  %v863_v42 = vpack.c.bf16 %v622_v28, %v621_v27  ;;  %v630_v27 = vld [vmem:[%s6983_s27 + $0xd58] sm:$0xff] }
  0xcd   : > { %6095 = vmatprep.subr.bf16.mxu1 %v844_v46  ;;  %v624_v46 = vld [vmem:[%s6983_s27 + $0xd28] sm:$0xff]  ;;  %v1047_v56 = vpack.c.bf16 %v989_v44, %v960_v41  ;;  %v615_v28 = vld [vmem:[%s6983_s27 + $0xce0] sm:$0xff]  ;;  %v618_v41 = vld [vmem:[%s6983_s27 + $0xcf8] sm:$0xff] }
  0xcf   : > { %6068 = vmatpush3.bf16.msra.mxu0 %v820_v52  ;;  %v642_v52 = vld [vmem:[%s6983_s27 + $0xdb8] sm:$0xff] }
  0xd0   : > { %6096 = vmatpush3.bf16.msra.mxu1 %v836_v54  ;;  %6069 = vmatprep.subr.bf16.mxu0 %v829_v55  ;;  %v934_v54 = vld [vmem:[%s10269_s1 + $0x1b0] sm:$0xff]  ;;  %v848_v55 = vpack.c.bf16 %v592_v40, %v591_v39  ;;  %v873_v0 = vpack.c.bf16 %v642_v52, %v641_v50  ;;  %v632_v39 = vld [vmem:[%s6983_s27 + $0xd68] sm:$0xff]  ;;  %v651_v52 = vld [vmem:[%s6983_s27 + $0xe00] sm:$0xff] }
  0xd1   : > { %6097 = vmatprep.subr.bf16.mxu1 %v845_v59  ;;  %v864_v59 = vpack.c.bf16 %v624_v46, %v623_v45  ;;  %v1021_v4 = vpack.c.bf16 %v934_v54, %v905_v53  ;;  %v617_v40 = vld [vmem:[%s6983_s27 + $0xcf0] sm:$0xff]  ;;  %v868_v45 = vpack.c.bf16 %v632_v39, %v631_v37  ;;  %v652_v53 = vld [vmem:[%s6983_s27 + $0xe08] sm:$0xff] }
  0xd2   : > { %v861_v46 = vpack.c.bf16 %v618_v41, %v617_v40  ;;  %v878_v62 = vpack.c.bf16 %v652_v53, %v651_v52 }
  0xd3   : > { %6070 = vmatpush3.bf16.msra.mxu0 %v821_v2  ;;  %v611_v2 = vld [vmem:[%s6983_s27 + $0xcc0] sm:$0xff] }
  0xd4   : > { %6098 = vmatpush3.bf16.msra.mxu1 %v837_v6  ;;  %6111 = vmatprep.subr.bf16.mxu0 %v854_v7  ;;  %v644_v6 = vld [vmem:[%s6983_s27 + $0xdc8] sm:$0xff]  ;;  %v1023_v7 = vpack.c.bf16 %v936_v58, %v907_v57  ;;  %v858_v10 = vpack.c.bf16 %v612_v3, %v611_v2  ;;  %v906_v57 = vld [vmem:[%s10269_s1 + $0xd0] sm:$0xff] }
  0xd5   : > { %6139 = vmatprep.subr.bf16.mxu1 %v870_v11  ;;  %v595_v11 = vld [vmem:[%s6983_s27 + $0xc40] sm:$0xff]  ;;  %v874_v14 = vpack.c.bf16 %v644_v6, %v643_v5  ;;  %v653_v2 = vld [vmem:[%s6983_s27 + $0xe10] sm:$0x3f] }
  0xd6   : > { %2265 = vmatmul.mubr.bf16.vlgmr.msra.gmra.mrb[40].mxu0 %v1016_v15  ;;  %v628_v15 = vld [vmem:[%s6983_s27 + $0xd48] sm:$0xff]  ;;  %v879_v6 = vpack.c.bf16 %v653_v2, %v653_v2 }
  0xd7   : > { %6112 = vmatpush3.bf16.msra.mxu0 %v846_v19  ;;  %2314 = vmatmul.mubr.bf16.vlgmr.msra.gmra.mrb[40].mxu1 %v1018_v20  ;;  %v646_v19 = vld [vmem:[%s6983_s27 + $0xdd8] sm:$0xff]  ;;  %v850_v20 = vpack.c.bf16 %v596_v12, %v595_v11  ;;  %v866_v21 = vpack.c.bf16 %v628_v15, %v627_v13  ;;  %v908_v11 = vld [vmem:[%s10269_s1 + $0xe0] sm:$0xff]  ;;  %v937_v12 = vld [vmem:[%s10269_s1 + $0x1c8] sm:$0xff] }
  0xd8   : > { %6140 = vmatpush3.bf16.msra.mxu1 %v862_v24  ;;  %6113 = vmatprep.subr.bf16.mxu0 %v855_v25  ;;  %v598_v24 = vld [vmem:[%s6983_s27 + $0xc58] sm:$0xff]  ;;  %v629_v25 = vld [vmem:[%s6983_s27 + $0xd50] sm:$0xff]  ;;  %v875_v26 = vpack.c.bf16 %v646_v19, %v645_v18  ;;  %v1740_v13 = vsel %vm1738_vm0, %v879_v6, 0  ;;  %v1024_v16 = vpack.c.bf16 %v937_v12, %v908_v11 }
  0xd9   : > { %6141 = vmatprep.subr.bf16.mxu1 %v871_v29  ;;  %2272 = vmatprep.mubr.bf16.mxu0 %v1046_v30  ;;  %v616_v29 = vld [vmem:[%s6983_s27 + $0xce8] sm:$0xff]  ;;  %v647_v30 = vld [vmem:[%s6983_s27 + $0xde0] sm:$0xff]  ;;  %v851_v32 = vpack.c.bf16 %v598_v24, %v597_v23  ;;  %v867_v33 = vpack.c.bf16 %v630_v27, %v629_v25  ;;  %v995_v18 = vld [vmem:[%s10269_s1 + $0x398] sm:$0xff] }
  0xda   : > { %2321 = vmatprep.mubr.bf16.mxu1 %v1048_v35  ;;  %v860_v34 = vpack.c.bf16 %v616_v29, %v615_v28  ;;  %v599_v35 = vld [vmem:[%s6983_s27 + $0xc60] sm:$0xff]  ;;  %v1053_v19 = vpack.c.bf16 %v995_v18, %v966_v17 }
  0xdb   : > { %6114 = vmatpush3.bf16.msra.mxu0 %v847_v38  ;;  %v876_v38 = vpack.c.bf16 %v648_v31, %v647_v30  ;;  %v852_v44 = vpack.c.bf16 %v600_v36, %v599_v35 }
  0xdc   : > { %6142 = vmatpush3.bf16.msra.mxu1 %v863_v42  ;;  %6115 = vmatprep.subr.bf16.mxu0 %v856_v43  ;;  %v649_v42 = vld [vmem:[%s6983_s27 + $0xdf0] sm:$0xff]  ;;  %v650_v43 = vld [vmem:[%s6983_s27 + $0xdf8] sm:$0xff] }
  0xdd   : > { %6143 = vmatprep.subr.bf16.mxu1 %v872_v47  ;;  %v601_v47 = vld [vmem:[%s6983_s27 + $0xc70] sm:$0xff]  ;;  %v877_v50 = vpack.c.bf16 %v650_v43, %v649_v42 }
  0xde   : > { %2273 = vmatmul.mubr.bf16.gmra.mrb[44].mxu0 %v1045_v51  ;;  %v634_v51 = vld [vmem:[%s6983_s27 + $0xd78] sm:$0xff]  ;;  %v853_v54 = vpack.c.bf16 %v602_v48, %v601_v47 }
  0xdf   : > { %6116 = vmatpush3.bf16.msra.mxu0 %v848_v55  ;;  %2322 = vmatmul.mubr.bf16.gmra.mrb[44].mxu1 %v1047_v56  ;;  %v904_v55 = vld [vmem:[%s10269_s1 + $0xc0] sm:$0xff]  ;;  %v933_v56 = vld [vmem:[%s10269_s1 + $0x1a8] sm:$0xff]  ;;  %v869_v58 = vpack.c.bf16 %v634_v51, %v633_v49 }
  0xe0   : > { %6144 = vmatpush3.bf16.msra.mxu1 %v864_v59  ;;  %6117 = vmatprep.subr.bf16.mxu0 %v857_v60  ;;  %v935_v59 = vld [vmem:[%s10269_s1 + $0x1b8] sm:$0xff]  ;;  %v1020_v1 = vpack.c.bf16 %v933_v56, %v904_v55 }
  0xe1   : > { %6145 = vmatprep.subr.bf16.mxu1 %v873_v0  ;;  %2362 = vmatprep.mubr.bf16.mxu0 %v1021_v4  ;;  %v963_v60 = vld [vmem:[%s10269_s1 + $0x298] sm:$0xff]  ;;  %v994_v0 = vld [vmem:[%s10269_s1 + $0x390] sm:$0xff]  ;;  %v1022_v3 = vpack.c.bf16 %v935_v59, %v906_v57 }
  0xe2   : > { %2411 = vmatprep.mubr.bf16.mxu1 %v1023_v7  ;;  %v1050_v4 = vpack.c.bf16 %v992_v61, %v963_v60  ;;  %v1052_v5 = vpack.c.bf16 %v994_v0, %v965_v63  ;;  %v962_v7 = vld [vmem:[%s10269_s1 + $0x290] sm:$0xff] }
  0xe3   : > { %6118 = vmatpush3.bf16.msra.mxu0 %v849_v8  ;;  %v991_v8 = vld [vmem:[%s10269_s1 + $0x378] sm:$0xff] }
  0xe4   : > { %6146 = vmatpush3.bf16.msra.mxu1 %v865_v9  ;;  %6119 = vmatprep.subr.bf16.mxu0 %v858_v10  ;;  %v964_v9 = vld [vmem:[%s10269_s1 + $0x2a0] sm:$0xff]  ;;  %v993_v10 = vld [vmem:[%s10269_s1 + $0x388] sm:$0xff] }
  0xe5   : > { %6147 = vmatprep.subr.bf16.mxu1 %v874_v14  ;;  %v1049_v14 = vpack.c.bf16 %v991_v8, %v962_v7  ;;  %v1051_v15 = vpack.c.bf16 %v993_v10, %v964_v9 }
  0xe7   : > { %6120 = vmatpush3.bf16.msra.mxu0 %v850_v20 }
  0xe8   : > { %6148 = vmatpush3.bf16.msra.mxu1 %v866_v21  ;;  %6121 = vmatprep.subr.bf16.mxu0 %v859_v22 }
  0xe9   : > { %6149 = vmatprep.subr.bf16.mxu1 %v875_v26 }
  0xeb   : > { %6122 = vmatpush3.bf16.msra.mxu0 %v851_v32 }
  0xec   : > { %6150 = vmatpush3.bf16.msra.mxu1 %v867_v33  ;;  %6123 = vmatprep.subr.bf16.mxu0 %v860_v34 }
  0xed   : > { %6151 = vmatprep.subr.bf16.mxu1 %v876_v38 }
  0xef   : > { %6124 = vmatpush3.bf16.msra.mxu0 %v852_v44 }
  0xf0   : > { %6152 = vmatpush3.bf16.msra.mxu1 %v868_v45  ;;  %6125 = vmatprep.subr.bf16.mxu0 %v861_v46 }
  0xf1   : > { %6153 = vmatprep.subr.bf16.mxu1 %v877_v50 }
  0xf3   : > { %6126 = vmatpush3.bf16.msra.mxu0 %v853_v54 }
  0xf4   : > { %6154 = vmatpush3.bf16.msra.mxu1 %v869_v58  ;;  %6399 = vmatprep.subr.bf16.mxu0 %v878_v62 }
  0xf6   : > { %2363 = vmatmul.mubr.bf16.vlgmr.msra.gmra.mrb[48].mxu0 %v1020_v1 }
  0xf7   : > { %2412 = vmatmul.mubr.bf16.vlgmr.msra.gmra.mrb[48].mxu1 %v1022_v3  ;;  %2370 = vmatprep.mubr.bf16.mxu0 %v1050_v4 }
  0xf8   : > { %2419 = vmatprep.mubr.bf16.mxu1 %v1052_v5  ;;  %6400 = vmatpush3.bf16.msra.mxu0 %v878_v62 }
  0xf9   : > { %6867 = vmatprep.subr.msk.bf16.mxu0 %vm1738_vm0, %v879_v6 }
  0xfc   : > { %6402 = vmatpush3.bf16.msra.mxu0 %v1740_v13 }
  0xfe   : > { %2371 = vmatmul.mubr.bf16.gmra.mrb[52].mxu0 %v1049_v14 }
  0xff   : > { %2420 = vmatmul.mubr.bf16.gmra.mrb[52].mxu1 %v1051_v15  ;;  %6403 = vmatprep.mubr.msk.bf16.mxu0 %vm1731_vm1, %v1024_v16 }
 0x106   : > { %6404 = vmatmul.mubr.msk.bf16.vlgmr.msra.gmra.mrb[56].mxu0 %vm1731_vm1, %v1053_v19 }
 0x109   : > { %v5791_v20 = vpop.f32.mrb[0].mxu0 }
 0x10a   : > { %v5819_v21 = vpop.f32.mrb[0].mxu1  ;;  %v5792_v22 = vpop.f32.mrb[1].mxu0 }
 0x10b   : > { %v5793_v23 = vadd.f32 %v5792_v22, %v5791_v20  ;;  %v5820_v24 = vpop.f32.mrb[1].mxu1  ;;  %v5794_v25 = vpop.f32.mrb[2].mxu0 }
 0x10c   : > { %v5821_v26 = vadd.f32 %v5820_v24, %v5819_v21  ;;  %v5822_v27 = vpop.f32.mrb[2].mxu1  ;;  %v5795_v28 = vpop.f32.mrb[3].mxu0 }
 0x10d   : > { %v5796_v29 = vadd.f32 %v5795_v28, %v5794_v25  ;;  %v5823_v30 = vpop.f32.mrb[3].mxu1 }
 0x10e   : > { %v1826_v31 = vadd.f32 %v5821_v26, %v5793_v23  ;;  %v5824_v32 = vadd.f32 %v5823_v30, %v5822_v27 }
 0x110   : > { %v1829_v33 = vadd.f32 %v5824_v32, %v5796_v29 }
 0x111   : > { %v5797_v34 = vpop.f32.mrb[4].mxu0 }
 0x112   : > { %v5825_v35 = vpop.f32.mrb[4].mxu1  ;;  %v5798_v36 = vpop.f32.mrb[5].mxu0 }
 0x113   : > { %v5799_v37 = vadd.f32 %v5798_v36, %v5797_v34  ;;  %v5826_v38 = vpop.f32.mrb[5].mxu1  ;;  %v5800_v39 = vpop.f32.mrb[6].mxu0 }
 0x114   : > { %v5827_v40 = vadd.f32 %v5826_v38, %v5825_v35  ;;  %v5828_v41 = vpop.f32.mrb[6].mxu1  ;;  %v5801_v42 = vpop.f32.mrb[7].mxu0 }
 0x115   : > { %v5802_v43 = vadd.f32 %v5801_v42, %v5800_v39  ;;  %v5829_v44 = vpop.f32.mrb[7].mxu1 }
 0x116   : > { %v1834_v45 = vadd.f32 %v5827_v40, %v5799_v37  ;;  %v5830_v46 = vadd.f32 %v5829_v44, %v5828_v41 }
 0x118   : > { %v1837_v47 = vadd.f32 %v5830_v46, %v5802_v43 }
 0x129   : > { %v5847_v48 = vpop.f32.mrb[8].mxu0 }
 0x12a   : > { %v5848_v49 = vpop.f32.mrb[9].mxu0  ;;  %v5875_v50 = vpop.f32.mrb[8].mxu1 }
 0x12b   : > { %v5849_v51 = vadd.f32 %v5848_v49, %v5847_v48  ;;  %v5850_v52 = vpop.f32.mrb[10].mxu0  ;;  %v5876_v53 = vpop.f32.mrb[9].mxu1 }
 0x12c   : > { %v5851_v54 = vpop.f32.mrb[11].mxu0  ;;  %v5877_v55 = vadd.f32 %v5876_v53, %v5875_v50  ;;  %v5878_v56 = vpop.f32.mrb[10].mxu1 }
 0x12d   : > { %v1875_v57 = vadd.f32 %v5849_v51, %v1826_v31  ;;  %v5852_v58 = vadd.f32 %v5851_v54, %v5850_v52  ;;  %v5879_v59 = vpop.f32.mrb[11].mxu1 }
 0x12e   : > { %v5880_v60 = vadd.f32 %v5879_v59, %v5878_v56 }
 0x12f   : > { %v1878_v61 = vadd.f32 %v5852_v58, %v1829_v33  ;;  %v1924_v62 = vadd.f32 %v5877_v55, %v1875_v57 }
 0x131   : > { %v1927_v63 = vadd.f32 %v5880_v60, %v1878_v61  ;;  %v5853_v0 = vpop.f32.mrb[12].mxu0 }
 0x132   : > { %v5854_v1 = vpop.f32.mrb[13].mxu0  ;;  %v5881_v2 = vpop.f32.mrb[12].mxu1 }
 0x133   : > { %v5855_v3 = vadd.f32 %v5854_v1, %v5853_v0  ;;  %v5856_v4 = vpop.f32.mrb[14].mxu0  ;;  %v5882_v5 = vpop.f32.mrb[13].mxu1  ;;  %v1278_v1 = vld [vmem:[%s10270_s2 + $0x700] sm:$0xff] }
 0x134   : > { %v5857_v6 = vpop.f32.mrb[15].mxu0  ;;  %v5883_v7 = vadd.f32 %v5882_v5, %v5881_v2  ;;  %v5884_v8 = vpop.f32.mrb[14].mxu1  ;;  %v1279_v2 = vld [vmem:[%s10270_s2 + $0x708] sm:$0xff] }
 0x135   : > { %v1883_v9 = vadd.f32 %v5855_v3, %v1834_v45  ;;  %v5858_v10 = vadd.f32 %v5857_v6, %v5856_v4  ;;  %v5885_v11 = vpop.f32.mrb[15].mxu1  ;;  %v1617_v5 = vpack.c.bf16 %v1279_v2, %v1278_v1 }
 0x136   : > { %v5886_v12 = vadd.f32 %v5885_v11, %v5884_v8 }
 0x137   : > { %v1886_v13 = vadd.f32 %v5858_v10, %v1837_v47  ;;  %v1932_v14 = vadd.f32 %v5883_v7, %v1883_v9  ;;  %6635 = vmatprep.mubr.msk.bf16.mxu1 %vm2483_vm2, %v1617_v5 }
 0x139   : > { %v1935_v15 = vadd.f32 %v5886_v12, %v1886_v13  ;;  %v1054_v12 = vld [vmem:[%s10270_s2] sm:$0xff]  ;;  %v1055_v13 = vld [vmem:[%s10270_s2 + $0x8] sm:$0xff] }
 0x149   : > { %v5903_v16 = vpop.f32.mrb[16].mxu0 }
 0x14a   : > { %v5904_v17 = vpop.f32.mrb[17].mxu0  ;;  %v5931_v18 = vpop.f32.mrb[16].mxu1 }
 0x14b   : > { %v5905_v19 = vadd.f32 %v5904_v17, %v5903_v16  ;;  %v5906_v20 = vpop.f32.mrb[18].mxu0  ;;  %v5932_v21 = vpop.f32.mrb[17].mxu1  ;;  %v1505_v17 = vpack.c.bf16 %v1055_v13, %v1054_v12 }
 0x14c   : > { %v5907_v22 = vpop.f32.mrb[19].mxu0  ;;  %v5933_v23 = vadd.f32 %v5932_v21, %v5931_v18  ;;  %v5934_v24 = vpop.f32.mrb[18].mxu1 }
 0x14d   : > { %v1973_v25 = vadd.f32 %v5905_v19, %v1924_v62  ;;  %v5908_v26 = vadd.f32 %v5907_v22, %v5906_v20  ;;  %v5935_v27 = vpop.f32.mrb[19].mxu1  ;;  %6411 = vmatprep.mubr.msk.bf16.mxu0 %vm2483_vm2, %v1505_v17 }
 0x14e   : > { %v5936_v28 = vadd.f32 %v5935_v27, %v5934_v24 }
 0x14f   : > { %v1976_v29 = vadd.f32 %v5908_v26, %v1927_v63  ;;  %v2022_v30 = vadd.f32 %v5933_v23, %v1973_v25 }
 0x151   : > { %v2025_v31 = vadd.f32 %v5936_v28, %v1976_v29  ;;  %v5909_v32 = vpop.f32.mrb[20].mxu0 }
 0x152   : > { %v5910_v33 = vpop.f32.mrb[21].mxu0  ;;  %v5937_v34 = vpop.f32.mrb[20].mxu1 }
 0x153   : > { %v5911_v35 = vadd.f32 %v5910_v33, %v5909_v32  ;;  %v5912_v36 = vpop.f32.mrb[22].mxu0  ;;  %v5938_v37 = vpop.f32.mrb[21].mxu1 }
 0x154   : > { %v5913_v38 = vpop.f32.mrb[23].mxu0  ;;  %v5939_v39 = vadd.f32 %v5938_v37, %v5937_v34  ;;  %v5940_v40 = vpop.f32.mrb[22].mxu1 }
 0x155   : > { %v1981_v41 = vadd.f32 %v5911_v35, %v1932_v14  ;;  %v5914_v42 = vadd.f32 %v5913_v38, %v5912_v36  ;;  %v5941_v43 = vpop.f32.mrb[23].mxu1 }
 0x156   : > { %v5942_v44 = vadd.f32 %v5941_v43, %v5940_v40 }
 0x157   : > { %v1984_v45 = vadd.f32 %v5914_v42, %v1935_v15  ;;  %v2030_v46 = vadd.f32 %v5939_v39, %v1981_v41 }
 0x159   : > { %v2033_v47 = vadd.f32 %v5942_v44, %v1984_v45 }
 0x169   : > { %v5959_v48 = vpop.f32.mrb[24].mxu0 }
 0x16a   : > { %v5960_v49 = vpop.f32.mrb[25].mxu0  ;;  %v5987_v50 = vpop.f32.mrb[24].mxu1 }
 0x16b   : > { %v5961_v51 = vadd.f32 %v5960_v49, %v5959_v48  ;;  %v5962_v52 = vpop.f32.mrb[26].mxu0  ;;  %v5988_v53 = vpop.f32.mrb[25].mxu1 }
 0x16c   : > { %v5963_v54 = vpop.f32.mrb[27].mxu0  ;;  %v5989_v55 = vadd.f32 %v5988_v53, %v5987_v50  ;;  %v5990_v56 = vpop.f32.mrb[26].mxu1 }
 0x16d   : > { %v2071_v57 = vadd.f32 %v5961_v51, %v2022_v30  ;;  %v5964_v58 = vadd.f32 %v5963_v54, %v5962_v52  ;;  %v5991_v59 = vpop.f32.mrb[27].mxu1 }
 0x16e   : > { %v5992_v60 = vadd.f32 %v5991_v59, %v5990_v56 }
 0x16f   : > { %v2074_v61 = vadd.f32 %v5964_v58, %v2025_v31  ;;  %v2120_v62 = vadd.f32 %v5989_v55, %v2071_v57 }
 0x171   : > { %v5965_v63 = vpop.f32.mrb[28].mxu0  ;;  %v2123_v0 = vadd.f32 %v5992_v60, %v2074_v61 }
 0x172   : > { %v5966_v3 = vpop.f32.mrb[29].mxu0  ;;  %v5993_v4 = vpop.f32.mrb[28].mxu1 }
 0x173   : > { %v5967_v6 = vadd.f32 %v5966_v3, %v5965_v63  ;;  %v5968_v7 = vpop.f32.mrb[30].mxu0  ;;  %v5994_v8 = vpop.f32.mrb[29].mxu1 }
 0x174   : > { %v5969_v9 = vpop.f32.mrb[31].mxu0  ;;  %v5995_v10 = vadd.f32 %v5994_v8, %v5993_v4  ;;  %v5996_v11 = vpop.f32.mrb[30].mxu1 }
 0x175   : > { %v2079_v14 = vadd.f32 %v5967_v6, %v2030_v46  ;;  %v5970_v15 = vadd.f32 %v5969_v9, %v5968_v7  ;;  %v5997_v16 = vpop.f32.mrb[31].mxu1 }
 0x176   : > { %v5998_v18 = vadd.f32 %v5997_v16, %v5996_v11 }
 0x177   : > { %v2082_v19 = vadd.f32 %v5970_v15, %v2033_v47  ;;  %v2128_v20 = vadd.f32 %v5995_v10, %v2079_v14 }
 0x179   : > { %v2131_v21 = vadd.f32 %v5998_v18, %v2082_v19 }
 0x189   : > { %v6015_v22 = vpop.f32.mrb[32].mxu0 }
 0x18a   : > { %v6016_v23 = vpop.f32.mrb[33].mxu0  ;;  %v6043_v24 = vpop.f32.mrb[32].mxu1 }
 0x18b   : > { %v6017_v25 = vadd.f32 %v6016_v23, %v6015_v22  ;;  %v6018_v26 = vpop.f32.mrb[34].mxu0  ;;  %v6044_v27 = vpop.f32.mrb[33].mxu1 }
 0x18c   : > { %v6019_v28 = vpop.f32.mrb[35].mxu0  ;;  %v6045_v29 = vadd.f32 %v6044_v27, %v6043_v24  ;;  %v6046_v30 = vpop.f32.mrb[34].mxu1 }
 0x18d   : > { %v2169_v31 = vadd.f32 %v6017_v25, %v2120_v62  ;;  %v6020_v32 = vadd.f32 %v6019_v28, %v6018_v26  ;;  %v6047_v33 = vpop.f32.mrb[35].mxu1 }
 0x18e   : > { %v6048_v34 = vadd.f32 %v6047_v33, %v6046_v30 }
 0x18f   : > { %v2172_v35 = vadd.f32 %v6020_v32, %v2123_v0  ;;  %v2218_v36 = vadd.f32 %v6045_v29, %v2169_v31 }
 0x191   : > { %v2221_v37 = vadd.f32 %v6048_v34, %v2172_v35  ;;  %v6021_v38 = vpop.f32.mrb[36].mxu0 }
 0x192   : > { %v6022_v39 = vpop.f32.mrb[37].mxu0  ;;  %v6049_v40 = vpop.f32.mrb[36].mxu1 }
 0x193   : > { %v6023_v41 = vadd.f32 %v6022_v39, %v6021_v38  ;;  %v6024_v42 = vpop.f32.mrb[38].mxu0  ;;  %v6050_v43 = vpop.f32.mrb[37].mxu1 }
 0x194   : > { %v6025_v44 = vpop.f32.mrb[39].mxu0  ;;  %v6051_v45 = vadd.f32 %v6050_v43, %v6049_v40  ;;  %v6052_v46 = vpop.f32.mrb[38].mxu1 }
 0x195   : > { %v2177_v47 = vadd.f32 %v6023_v41, %v2128_v20  ;;  %v6026_v48 = vadd.f32 %v6025_v44, %v6024_v42  ;;  %v6053_v49 = vpop.f32.mrb[39].mxu1 }
 0x196   : > { %v6054_v50 = vadd.f32 %v6053_v49, %v6052_v46 }
 0x197   : > { %v2180_v51 = vadd.f32 %v6026_v48, %v2131_v21  ;;  %v2226_v52 = vadd.f32 %v6051_v45, %v2177_v47 }
 0x199   : > { %v2229_v53 = vadd.f32 %v6054_v50, %v2180_v51 }
 0x1a9   : > { %v6071_v54 = vpop.f32.mrb[40].mxu0 }
 0x1aa   : > { %v6072_v55 = vpop.f32.mrb[41].mxu0  ;;  %v6099_v56 = vpop.f32.mrb[40].mxu1 }
 0x1ab   : > { %v6073_v57 = vadd.f32 %v6072_v55, %v6071_v54  ;;  %v6074_v58 = vpop.f32.mrb[42].mxu0  ;;  %v6100_v59 = vpop.f32.mrb[41].mxu1 }
 0x1ac   : > { %v6075_v60 = vpop.f32.mrb[43].mxu0  ;;  %v6101_v61 = vadd.f32 %v6100_v59, %v6099_v56  ;;  %v6102_v62 = vpop.f32.mrb[42].mxu1 }
 0x1ad   : > { %v2267_v63 = vadd.f32 %v6073_v57, %v2218_v36  ;;  %v6076_v0 = vadd.f32 %v6075_v60, %v6074_v58  ;;  %v6103_v1 = vpop.f32.mrb[43].mxu1 }
 0x1ae   : > { %v6104_v2 = vadd.f32 %v6103_v1, %v6102_v62 }
 0x1af   : > { %v2270_v3 = vadd.f32 %v6076_v0, %v2221_v37  ;;  %v2316_v4 = vadd.f32 %v6101_v61, %v2267_v63 }
 0x1b1   : > { %v2319_v5 = vadd.f32 %v6104_v2, %v2270_v3  ;;  %v6077_v6 = vpop.f32.mrb[44].mxu0 }
 0x1b2   : > { %v6078_v7 = vpop.f32.mrb[45].mxu0  ;;  %v6105_v8 = vpop.f32.mrb[44].mxu1 }
 0x1b3   : > { %v6079_v9 = vadd.f32 %v6078_v7, %v6077_v6  ;;  %v6080_v10 = vpop.f32.mrb[46].mxu0  ;;  %v6106_v11 = vpop.f32.mrb[45].mxu1  ;;  %v1282_v6 = vld [vmem:[%s10270_s2 + $0x720] sm:$0xff]  ;;  %v1056_v7 = vld [vmem:[%s10270_s2 + $0x10] sm:$0xff] }
 0x1b4   : > { %v6081_v12 = vpop.f32.mrb[47].mxu0  ;;  %v6107_v13 = vadd.f32 %v6106_v11, %v6105_v8  ;;  %v6108_v14 = vpop.f32.mrb[46].mxu1  ;;  %v1057_v8 = vld [vmem:[%s10270_s2 + $0x18] sm:$0xff]  ;;  %v1059_v11 = vld [vmem:[%s10270_s2 + $0x28] sm:$0xff] }
 0x1b5   : > { %v2275_v15 = vadd.f32 %v6079_v9, %v2226_v52  ;;  %v6082_v16 = vadd.f32 %v6081_v12, %v6080_v10  ;;  %v6109_v17 = vpop.f32.mrb[47].mxu1  ;;  %v1283_v9 = vld [vmem:[%s10270_s2 + $0x728] sm:$0xff]  ;;  %v1058_v10 = vld [vmem:[%s10270_s2 + $0x20] sm:$0xff] }
 0x1b6   : > { %v6110_v18 = vadd.f32 %v6109_v17, %v6108_v14  ;;  %v1619_v14 = vpack.c.bf16 %v1283_v9, %v1282_v6  ;;  %v1285_v17 = vld [vmem:[%s10270_s2 + $0x738] sm:$0xff]  ;;  %v1078_v6 = vld [vmem:[%s10270_s2 + $0xc0] sm:$0xff] }
 0x1b7   : > { %v2278_v19 = vadd.f32 %v6082_v16, %v2229_v53  ;;  %v2324_v20 = vadd.f32 %v6107_v13, %v2275_v15  ;;  %v1506_v13 = vpack.c.bf16 %v1057_v8, %v1056_v7  ;;  %v1507_v15 = vpack.c.bf16 %v1059_v11, %v1058_v10  ;;  %v1284_v16 = vld [vmem:[%s10270_s2 + $0x730] sm:$0xff]  ;;  %v1079_v7 = vld [vmem:[%s10270_s2 + $0xc8] sm:$0xff] }
 0x1b8   : > { %v1517_v11 = vpack.c.bf16 %v1079_v7, %v1078_v6 }
 0x1b9   : > { %v2327_v21 = vadd.f32 %v6110_v18, %v2278_v19  ;;  %v1286_v18 = vld [vmem:[%s10270_s2 + $0x740] sm:$0xff]  ;;  %v1060_v19 = vld [vmem:[%s10270_s2 + $0x30] sm:$0xff] }
 0x1c9   : > { %v6127_v22 = vpop.f32.mrb[48].mxu0 }
 0x1ca   : > { %v6128_v23 = vpop.f32.mrb[49].mxu0  ;;  %v6155_v24 = vpop.f32.mrb[48].mxu1 }
 0x1cb   : > { %v6129_v25 = vadd.f32 %v6128_v23, %v6127_v22  ;;  %v6130_v26 = vpop.f32.mrb[50].mxu0  ;;  %v6156_v27 = vpop.f32.mrb[49].mxu1  ;;  %v1062_v22 = vld [vmem:[%s10270_s2 + $0x40] sm:$0xff]  ;;  %v1063_v23 = vld [vmem:[%s10270_s2 + $0x48] sm:$0xff] }
 0x1cc   : > { %v6131_v28 = vpop.f32.mrb[51].mxu0  ;;  %v6157_v29 = vadd.f32 %v6156_v27, %v6155_v24  ;;  %v6158_v30 = vpop.f32.mrb[50].mxu1  ;;  %v1620_v24 = vpack.c.bf16 %v1285_v17, %v1284_v16  ;;  %v1509_v27 = vpack.c.bf16 %v1063_v23, %v1062_v22  ;;  %v1081_v16 = vld [vmem:[%s10270_s2 + $0xd8] sm:$0xff]  ;;  %v1307_v17 = vld [vmem:[%s10270_s2 + $0x7e8] sm:$0xff] }
 0x1cd   : > { %v2365_v31 = vadd.f32 %v6129_v25, %v2316_v4  ;;  %v6132_v32 = vadd.f32 %v6131_v28, %v6130_v26  ;;  %v6159_v33 = vpop.f32.mrb[51].mxu1  ;;  %v1280_v4 = vld [vmem:[%s10270_s2 + $0x710] sm:$0xff] }
 0x1ce   : > { %v6160_v34 = vadd.f32 %v6159_v33, %v6158_v30  ;;  %v1288_v28 = vld [vmem:[%s10270_s2 + $0x750] sm:$0xff]  ;;  %v1290_v30 = vld [vmem:[%s10270_s2 + $0x760] sm:$0xff]  ;;  %v1291_v33 = vld [vmem:[%s10270_s2 + $0x768] sm:$0xff] }
 0x1cf   : > { %v2368_v35 = vadd.f32 %v6132_v32, %v2319_v5  ;;  %v2414_v36 = vadd.f32 %v6157_v29, %v2365_v31  ;;  %v1281_v5 = vld [vmem:[%s10270_s2 + $0x718] sm:$0xff]  ;;  %v1064_v31 = vld [vmem:[%s10270_s2 + $0x50] sm:$0xff] }
 0x1d0   : > { %v1618_v12 = vpack.c.bf16 %v1281_v5, %v1280_v4  ;;  %v1289_v29 = vld [vmem:[%s10270_s2 + $0x758] sm:$0xff]  ;;  %v1303_v5 = vld [vmem:[%s10270_s2 + $0x7c8] sm:$0xff] }
 0x1d1   : > { %v6133_v37 = vpop.f32.mrb[52].mxu0  ;;  %v2417_v38 = vadd.f32 %v6160_v34, %v2368_v35  ;;  %v1065_v32 = vld [vmem:[%s10270_s2 + $0x58] sm:$0xff]  ;;  %v1066_v34 = vld [vmem:[%s10270_s2 + $0x60] sm:$0xff]  ;;  %v1067_v35 = vld [vmem:[%s10270_s2 + $0x68] sm:$0xff] }
 0x1d2   : > { %v6134_v39 = vpop.f32.mrb[53].mxu0  ;;  %v6161_v40 = vpop.f32.mrb[52].mxu1  ;;  %v1077_v4 = vld [vmem:[%s10270_s2 + $0xb8] sm:$0xff] }
 0x1d3   : > { %v6135_v41 = vadd.f32 %v6134_v39, %v6133_v37  ;;  %v6136_v42 = vpop.f32.mrb[54].mxu0  ;;  %v6162_v43 = vpop.f32.mrb[53].mxu1  ;;  %v1510_v37 = vpack.c.bf16 %v1065_v32, %v1064_v31  ;;  %v1511_v39 = vpack.c.bf16 %v1067_v35, %v1066_v34  ;;  %v1087_v31 = vld [vmem:[%s10270_s2 + $0x108] sm:$0xff] }
 0x1d4   : > { %v6137_v44 = vpop.f32.mrb[55].mxu0  ;;  %v6163_v45 = vadd.f32 %v6162_v43, %v6161_v40  ;;  %v6164_v46 = vpop.f32.mrb[54].mxu1  ;;  %v1292_v40 = vld [vmem:[%s10270_s2 + $0x770] sm:$0xff] }
 0x1d5   : > { %v2373_v47 = vadd.f32 %v6135_v41, %v2324_v20  ;;  %v6138_v48 = vadd.f32 %v6137_v44, %v6136_v42  ;;  %v6165_v49 = vpop.f32.mrb[55].mxu1  ;;  %v1061_v20 = vld [vmem:[%s10270_s2 + $0x38] sm:$0xff]  ;;  %v1294_v42 = vld [vmem:[%s10270_s2 + $0x780] sm:$0xff]  ;;  %v1068_v43 = vld [vmem:[%s10270_s2 + $0x70] sm:$0xff] }
 0x1d6   : > { %v6166_v50 = vadd.f32 %v6165_v49, %v6164_v46  ;;  %v1508_v25 = vpack.c.bf16 %v1061_v20, %v1060_v19  ;;  %v1293_v41 = vld [vmem:[%s10270_s2 + $0x778] sm:$0xff]  ;;  %v1070_v46 = vld [vmem:[%s10270_s2 + $0x80] sm:$0xff]  ;;  %v1083_v19 = vld [vmem:[%s10270_s2 + $0xe8] sm:$0xff] }
 0x1d7   : > { %v2376_v51 = vadd.f32 %v6138_v48, %v2327_v21  ;;  %v2422_v52 = vadd.f32 %v6163_v45, %v2373_v47  ;;  %v1287_v21 = vld [vmem:[%s10270_s2 + $0x748] sm:$0xff]  ;;  %v1069_v44 = vld [vmem:[%s10270_s2 + $0x78] sm:$0xff]  ;;  %v1624_v48 = vpack.c.bf16 %v1293_v41, %v1292_v40 }
 0x1d8   : > { %v1621_v26 = vpack.c.bf16 %v1287_v21, %v1286_v18  ;;  %v1295_v45 = vld [vmem:[%s10270_s2 + $0x788] sm:$0xff]  ;;  %v1512_v49 = vpack.c.bf16 %v1069_v44, %v1068_v43  ;;  %v1082_v18 = vld [vmem:[%s10270_s2 + $0xe0] sm:$0xff]  ;;  %v1089_v40 = vld [vmem:[%s10270_s2 + $0x118] sm:$0xff] }
 0x1d9   : > { %v6405_v53 = vpop.f32.mrb[56].mxu0  ;;  %v2425_v54 = vadd.f32 %v6166_v50, %v2376_v51  ;;  %v1071_v47 = vld [vmem:[%s10270_s2 + $0x88] sm:$0xff]  ;;  %v1625_v50 = vpack.c.bf16 %v1295_v45, %v1294_v42  ;;  %v1519_v23 = vpack.c.bf16 %v1083_v19, %v1082_v18  ;;  %v1090_v42 = vld [vmem:[%s10270_s2 + $0x120] sm:$0xff] }
 0x1da   : > { %v2471_v55 = vadd.f32 %v6405_v53, %v2422_v52  ;;  %v2462_v56 = vpop.f32.mrb[57].mxu0  ;;  %v1513_v51 = vpack.c.bf16 %v1071_v47, %v1070_v46  ;;  %v1296_v52 = vld [vmem:[%s10270_s2 + $0x790] sm:$0xff]  ;;  %v1297_v53 = vld [vmem:[%s10270_s2 + $0x798] sm:$0xff]  ;;  %v1315_v41 = vld [vmem:[%s10270_s2 + $0x828] sm:$0xff] }
 0x1db   : > { %v2463_v57 = vadd.f32 %v2462_v56, %v2414_v36  ;;  %v6406_v58 = vpop.f32.mrb[58].mxu0  ;;  %v1622_v36 = vpack.c.bf16 %v1289_v29, %v1288_v28  ;;  %v1073_v56 = vld [vmem:[%s10270_s2 + $0x98] sm:$0xff]  ;;  %v1311_v29 = vld [vmem:[%s10270_s2 + $0x808] sm:$0xff] }
 0x1dc   : > { %6893 = vtanh.f32 %v2471_v55  ;;  %v2474_v59 = vadd.f32 %v6406_v58, %v2425_v54  ;;  %v2465_v60 = vpop.f32.mrb[59].mxu0  ;;  %v1298_v54 = vld [vmem:[%s10270_s2 + $0x7a0] sm:$0xff]  ;;  %v1072_v55 = vld [vmem:[%s10270_s2 + $0x90] sm:$0xff]  ;;  %v1085_v28 = vld [vmem:[%s10270_s2 + $0xf8] sm:$0xff] }
 0x1dd   : > { %6895 = vtanh.f32 %v2463_v57  ;;  %v2466_v61 = vadd.f32 %v2465_v60, %v2417_v38  ;;  %v1623_v38 = vpack.c.bf16 %v1291_v33, %v1290_v30  ;;  %v1299_v57 = vld [vmem:[%s10270_s2 + $0x7a8] sm:$0xff]  ;;  %v1074_v58 = vld [vmem:[%s10270_s2 + $0xa0] sm:$0xff]  ;;  %v1626_v60 = vpack.c.bf16 %v1297_v53, %v1296_v52  ;;  %v1093_v52 = vld [vmem:[%s10270_s2 + $0x138] sm:$0xff] }
 0x1de   : > { %6897 = vtanh.f32 %v2474_v59  ;;  %v1075_v59 = vld [vmem:[%s10270_s2 + $0xa8] sm:$0xff]  ;;  %v1086_v30 = vld [vmem:[%s10270_s2 + $0x100] sm:$0xff] }
 0x1df   : > { %6899 = vtanh.f32 %v2466_v61  ;;  %v1514_v61 = vpack.c.bf16 %v1073_v56, %v1072_v55  ;;  %v1521_v35 = vpack.c.bf16 %v1087_v31, %v1086_v30  ;;  %v1091_v43 = vld [vmem:[%s10270_s2 + $0x128] sm:$0xff] }
 0x1e0   : > { %v1523_v47 = vpack.c.bf16 %v1091_v43, %v1090_v42  ;;  %v1319_v53 = vld [vmem:[%s10270_s2 + $0x848] sm:$0xff] }
 0x1e1   : > { %v1095_v55 = vld [vmem:[%s10270_s2 + $0x148] sm:$0xff] }
 0x1e6   : > { %v6894_v62 = vpop.eup %6893 }
 0x1e7   : > { %v6896_v63 = vpop.eup %6895 }
 0x1e8   : > { %v6898_v0 = vpop.eup %6897 }
 0x1e9   : > { %v6900_v1 = vpop.eup %6899  ;;  %v2482_v2 = vpack.c.bf16 %v6898_v0, %v6894_v62  ;;  %v1627_v62 = vpack.c.bf16 %v1299_v57, %v1298_v54  ;;  %v1300_v0 = vld [vmem:[%s10270_s2 + $0x7b0] sm:$0xff]  ;;  %v1094_v54 = vld [vmem:[%s10270_s2 + $0x140] sm:$0xff] }
 0x1ea   : > { %v2481_v3 = vpack.c.bf16 %v6900_v1, %v6896_v63  ;;  %v1515_v63 = vpack.c.bf16 %v1075_v59, %v1074_v58  ;;  %v1301_v1 = vld [vmem:[%s10270_s2 + $0x7b8] sm:$0xff]  ;;  %v1525_v59 = vpack.c.bf16 %v1095_v55, %v1094_v54 }
 0x1eb   : > { %v1628_v8 = vpack.c.bf16 %v1301_v1, %v1300_v0  ;;  %v1097_v0 = vld [vmem:[%s10270_s2 + $0x158] sm:$0xff]  ;;  %v1323_v1 = vld [vmem:[%s10270_s2 + $0x868] sm:$0xff] }
 0x1ec   : > { %6407 = vmatprep.subr.bf16.mxu0 %v2481_v3  ;;  %6863 = vmatprep.subr.bf16.mxu1 %v2481_v3 }
 0x1ed   : > { %6408 = vmatpush3.bf16.msra.mxu0 %v2481_v3  ;;  %6865 = vmatpush3.bf16.msra.mxu1 %v2481_v3  ;;  %v1076_v3 = vld [vmem:[%s10270_s2 + $0xb0] sm:$0xff] }
 0x1ee   : > { %6409 = vmatprep.subr.bf16.mxu0 %v2482_v2  ;;  %6864 = vmatprep.subr.bf16.mxu1 %v2482_v2  ;;  %v1516_v9 = vpack.c.bf16 %v1077_v4, %v1076_v3  ;;  %v1099_v3 = vld [vmem:[%s10270_s2 + $0x168] sm:$0xff] }
 0x1f1   : > { %6410 = vmatpush3.bf16.msra.mxu0 %v2482_v2  ;;  %6866 = vmatpush3.bf16.msra.mxu1 %v2482_v2  ;;  %v1302_v2 = vld [vmem:[%s10270_s2 + $0x7c0] sm:$0xff] }
 0x1f2   : > { %v1629_v10 = vpack.c.bf16 %v1303_v5, %v1302_v2  ;;  %v1098_v2 = vld [vmem:[%s10270_s2 + $0x160] sm:$0xff] }
 0x1f3   : > { %v1527_v7 = vpack.c.bf16 %v1099_v3, %v1098_v2 }
 0x1f4   : > { %6636 = vmatmul.mubr.msk.bf16.vlgmr.msra.gmra.mrb[56].mxu1 %vm2483_vm2, %v1618_v12  ;;  %6412 = vmatmul.mubr.msk.bf16.vlgmr.msra.gmra.mrb[60].mxu0 %vm2483_vm2, %v1506_v13  ;;  %v1304_v12 = vld [vmem:[%s10270_s2 + $0x7d0] sm:$0xff]  ;;  %v1305_v13 = vld [vmem:[%s10270_s2 + $0x7d8] sm:$0xff] }
 0x1f5   : > { %6639 = vmatprep.mubr.msk.bf16.mxu1 %vm2483_vm2, %v1619_v14  ;;  %6415 = vmatprep.mubr.msk.bf16.mxu0 %vm2483_vm2, %v1507_v15  ;;  %v1306_v14 = vld [vmem:[%s10270_s2 + $0x7e0] sm:$0xff]  ;;  %v1080_v15 = vld [vmem:[%s10270_s2 + $0xd0] sm:$0xff]  ;;  %v1630_v20 = vpack.c.bf16 %v1305_v13, %v1304_v12  ;;  %v1101_v12 = vld [vmem:[%s10270_s2 + $0x178] sm:$0xff] }
 0x1f6   : > { %v1518_v21 = vpack.c.bf16 %v1081_v16, %v1080_v15  ;;  %v1631_v22 = vpack.c.bf16 %v1307_v17, %v1306_v14  ;;  %v1327_v13 = vld [vmem:[%s10270_s2 + $0x888] sm:$0xff]  ;;  %v1102_v14 = vld [vmem:[%s10270_s2 + $0x180] sm:$0xff] }
 0x1f7   : > { %v1103_v15 = vld [vmem:[%s10270_s2 + $0x188] sm:$0xff] }
 0x1f8   : > { %v1529_v19 = vpack.c.bf16 %v1103_v15, %v1102_v14 }
 0x1fc   : > { %6640 = vmatmul.mubr.msk.bf16.gmra.mrb[60].mxu1 %vm2483_vm2, %v1620_v24  ;;  %6416 = vmatmul.mubr.msk.bf16.gmra.mrb[64].mxu0 %vm2483_vm2, %v1508_v25  ;;  %v1308_v24 = vld [vmem:[%s10270_s2 + $0x7f0] sm:$0xff]  ;;  %v1309_v25 = vld [vmem:[%s10270_s2 + $0x7f8] sm:$0xff] }
 0x1fd   : > { %6643 = vmatprep.mubr.msk.bf16.mxu1 %vm2483_vm2, %v1621_v26  ;;  %6419 = vmatprep.mubr.msk.bf16.mxu0 %vm2483_vm2, %v1509_v27  ;;  %v1310_v26 = vld [vmem:[%s10270_s2 + $0x800] sm:$0xff]  ;;  %v1084_v27 = vld [vmem:[%s10270_s2 + $0xf0] sm:$0xff]  ;;  %v1632_v32 = vpack.c.bf16 %v1309_v25, %v1308_v24  ;;  %v1105_v24 = vld [vmem:[%s10270_s2 + $0x198] sm:$0xff] }
 0x1fe   : > { %v1520_v33 = vpack.c.bf16 %v1085_v28, %v1084_v27  ;;  %v1633_v34 = vpack.c.bf16 %v1311_v29, %v1310_v26  ;;  %v1331_v25 = vld [vmem:[%s10270_s2 + $0x8a8] sm:$0xff]  ;;  %v1106_v26 = vld [vmem:[%s10270_s2 + $0x1a0] sm:$0xff] }
 0x1ff   : > { %v1107_v27 = vld [vmem:[%s10270_s2 + $0x1a8] sm:$0xff] }
 0x200   : > { %v1531_v31 = vpack.c.bf16 %v1107_v27, %v1106_v26 }
 0x204   : > { %6644 = vmatmul.mubr.msk.bf16.gmra.mrb[64].mxu1 %vm2483_vm2, %v1622_v36  ;;  %6420 = vmatmul.mubr.msk.bf16.gmra.mrb[68].mxu0 %vm2483_vm2, %v1510_v37  ;;  %v1312_v36 = vld [vmem:[%s10270_s2 + $0x810] sm:$0xff]  ;;  %v1313_v37 = vld [vmem:[%s10270_s2 + $0x818] sm:$0xff] }
 0x205   : > { %6647 = vmatprep.mubr.msk.bf16.mxu1 %vm2483_vm2, %v1623_v38  ;;  %6423 = vmatprep.mubr.msk.bf16.mxu0 %vm2483_vm2, %v1511_v39  ;;  %v1314_v38 = vld [vmem:[%s10270_s2 + $0x820] sm:$0xff]  ;;  %v1088_v39 = vld [vmem:[%s10270_s2 + $0x110] sm:$0xff]  ;;  %v1634_v44 = vpack.c.bf16 %v1313_v37, %v1312_v36  ;;  %v1109_v36 = vld [vmem:[%s10270_s2 + $0x1b8] sm:$0xff] }
 0x206   : > { %v1522_v45 = vpack.c.bf16 %v1089_v40, %v1088_v39  ;;  %v1635_v46 = vpack.c.bf16 %v1315_v41, %v1314_v38  ;;  %v1335_v37 = vld [vmem:[%s10270_s2 + $0x8c8] sm:$0xff]  ;;  %v1110_v38 = vld [vmem:[%s10270_s2 + $0x1c0] sm:$0xff] }
 0x207   : > { %v1111_v39 = vld [vmem:[%s10270_s2 + $0x1c8] sm:$0xff] }
 0x208   : > { %v1533_v43 = vpack.c.bf16 %v1111_v39, %v1110_v38 }
 0x20c   : > { %6648 = vmatmul.mubr.msk.bf16.gmra.mrb[68].mxu1 %vm2483_vm2, %v1624_v48  ;;  %6424 = vmatmul.mubr.msk.bf16.gmra.mrb[72].mxu0 %vm2483_vm2, %v1512_v49  ;;  %v1316_v48 = vld [vmem:[%s10270_s2 + $0x830] sm:$0xff]  ;;  %v1317_v49 = vld [vmem:[%s10270_s2 + $0x838] sm:$0xff] }
 0x20d   : > { %6651 = vmatprep.mubr.msk.bf16.mxu1 %vm2483_vm2, %v1625_v50  ;;  %6427 = vmatprep.mubr.msk.bf16.mxu0 %vm2483_vm2, %v1513_v51  ;;  %v1318_v50 = vld [vmem:[%s10270_s2 + $0x840] sm:$0xff]  ;;  %v1092_v51 = vld [vmem:[%s10270_s2 + $0x130] sm:$0xff]  ;;  %v1636_v56 = vpack.c.bf16 %v1317_v49, %v1316_v48  ;;  %v1113_v48 = vld [vmem:[%s10270_s2 + $0x1d8] sm:$0xff] }
 0x20e   : > { %v1524_v57 = vpack.c.bf16 %v1093_v52, %v1092_v51  ;;  %v1637_v58 = vpack.c.bf16 %v1319_v53, %v1318_v50  ;;  %v1339_v49 = vld [vmem:[%s10270_s2 + $0x8e8] sm:$0xff]  ;;  %v1114_v50 = vld [vmem:[%s10270_s2 + $0x1e0] sm:$0xff] }
 0x20f   : > { %v1115_v51 = vld [vmem:[%s10270_s2 + $0x1e8] sm:$0xff] }
 0x210   : > { %v1535_v55 = vpack.c.bf16 %v1115_v51, %v1114_v50 }
 0x214   : > { %6652 = vmatmul.mubr.msk.bf16.gmra.mrb[72].mxu1 %vm2483_vm2, %v1626_v60  ;;  %6428 = vmatmul.mubr.msk.bf16.gmra.mrb[76].mxu0 %vm2483_vm2, %v1514_v61  ;;  %v1320_v60 = vld [vmem:[%s10270_s2 + $0x850] sm:$0xff]  ;;  %v1321_v61 = vld [vmem:[%s10270_s2 + $0x858] sm:$0xff] }
 0x215   : > { %6655 = vmatprep.mubr.msk.bf16.mxu1 %vm2483_vm2, %v1627_v62  ;;  %6431 = vmatprep.mubr.msk.bf16.mxu0 %vm2483_vm2, %v1515_v63  ;;  %v1322_v62 = vld [vmem:[%s10270_s2 + $0x860] sm:$0xff]  ;;  %v1096_v63 = vld [vmem:[%s10270_s2 + $0x150] sm:$0xff]  ;;  %v1638_v4 = vpack.c.bf16 %v1321_v61, %v1320_v60  ;;  %v1117_v60 = vld [vmem:[%s10270_s2 + $0x1f8] sm:$0xff] }
 0x216   : > { %v1526_v5 = vpack.c.bf16 %v1097_v0, %v1096_v63  ;;  %v1639_v6 = vpack.c.bf16 %v1323_v1, %v1322_v62  ;;  %v1343_v61 = vld [vmem:[%s10270_s2 + $0x908] sm:$0xff]  ;;  %v1118_v62 = vld [vmem:[%s10270_s2 + $0x200] sm:$0xff] }
 0x217   : > { %v1119_v63 = vld [vmem:[%s10270_s2 + $0x208] sm:$0xff] }
 0x218   : > { %v1537_v3 = vpack.c.bf16 %v1119_v63, %v1118_v62 }
 0x21c   : > { %6656 = vmatmul.mubr.msk.bf16.gmra.mrb[76].mxu1 %vm2483_vm2, %v1628_v8  ;;  %6432 = vmatmul.mubr.msk.bf16.gmra.mrb[80].mxu0 %vm2483_vm2, %v1516_v9  ;;  %v1324_v8 = vld [vmem:[%s10270_s2 + $0x870] sm:$0xff]  ;;  %v1325_v9 = vld [vmem:[%s10270_s2 + $0x878] sm:$0xff] }
 0x21d   : > { %6659 = vmatprep.mubr.msk.bf16.mxu1 %vm2483_vm2, %v1629_v10  ;;  %6435 = vmatprep.mubr.msk.bf16.mxu0 %vm2483_vm2, %v1517_v11  ;;  %v1326_v10 = vld [vmem:[%s10270_s2 + $0x880] sm:$0xff]  ;;  %v1100_v11 = vld [vmem:[%s10270_s2 + $0x170] sm:$0xff]  ;;  %v1640_v16 = vpack.c.bf16 %v1325_v9, %v1324_v8  ;;  %v1121_v8 = vld [vmem:[%s10270_s2 + $0x218] sm:$0xff] }
 0x21e   : > { %v1528_v17 = vpack.c.bf16 %v1101_v12, %v1100_v11  ;;  %v1641_v18 = vpack.c.bf16 %v1327_v13, %v1326_v10  ;;  %v1347_v9 = vld [vmem:[%s10270_s2 + $0x928] sm:$0xff]  ;;  %v1122_v10 = vld [vmem:[%s10270_s2 + $0x220] sm:$0xff] }
 0x21f   : > { %v1123_v11 = vld [vmem:[%s10270_s2 + $0x228] sm:$0xff] }
 0x220   : > { %v1539_v15 = vpack.c.bf16 %v1123_v11, %v1122_v10 }
 0x224   : > { %6660 = vmatmul.mubr.msk.bf16.gmra.mrb[80].mxu1 %vm2483_vm2, %v1630_v20  ;;  %6436 = vmatmul.mubr.msk.bf16.gmra.mrb[84].mxu0 %vm2483_vm2, %v1518_v21  ;;  %v1328_v20 = vld [vmem:[%s10270_s2 + $0x890] sm:$0xff]  ;;  %v1329_v21 = vld [vmem:[%s10270_s2 + $0x898] sm:$0xff] }
 0x225   : > { %6663 = vmatprep.mubr.msk.bf16.mxu1 %vm2483_vm2, %v1631_v22  ;;  %6439 = vmatprep.mubr.msk.bf16.mxu0 %vm2483_vm2, %v1519_v23  ;;  %v1330_v22 = vld [vmem:[%s10270_s2 + $0x8a0] sm:$0xff]  ;;  %v1104_v23 = vld [vmem:[%s10270_s2 + $0x190] sm:$0xff]  ;;  %v1642_v28 = vpack.c.bf16 %v1329_v21, %v1328_v20  ;;  %v1125_v20 = vld [vmem:[%s10270_s2 + $0x238] sm:$0xff] }
 0x226   : > { %v1530_v29 = vpack.c.bf16 %v1105_v24, %v1104_v23  ;;  %v1643_v30 = vpack.c.bf16 %v1331_v25, %v1330_v22  ;;  %v1351_v21 = vld [vmem:[%s10270_s2 + $0x948] sm:$0xff]  ;;  %v1126_v22 = vld [vmem:[%s10270_s2 + $0x240] sm:$0xff] }
 0x227   : > { %v1127_v23 = vld [vmem:[%s10270_s2 + $0x248] sm:$0xff] }
 0x228   : > { %v1541_v27 = vpack.c.bf16 %v1127_v23, %v1126_v22 }
 0x22c   : > { %6664 = vmatmul.mubr.msk.bf16.gmra.mrb[84].mxu1 %vm2483_vm2, %v1632_v32  ;;  %6440 = vmatmul.mubr.msk.bf16.gmra.mrb[88].mxu0 %vm2483_vm2, %v1520_v33  ;;  %v1332_v32 = vld [vmem:[%s10270_s2 + $0x8b0] sm:$0xff]  ;;  %v1333_v33 = vld [vmem:[%s10270_s2 + $0x8b8] sm:$0xff] }
 0x22d   : > { %6667 = vmatprep.mubr.msk.bf16.mxu1 %vm2483_vm2, %v1633_v34  ;;  %6443 = vmatprep.mubr.msk.bf16.mxu0 %vm2483_vm2, %v1521_v35  ;;  %v1334_v34 = vld [vmem:[%s10270_s2 + $0x8c0] sm:$0xff]  ;;  %v1108_v35 = vld [vmem:[%s10270_s2 + $0x1b0] sm:$0xff]  ;;  %v1644_v40 = vpack.c.bf16 %v1333_v33, %v1332_v32  ;;  %v1129_v32 = vld [vmem:[%s10270_s2 + $0x258] sm:$0xff] }
 0x22e   : > { %v1532_v41 = vpack.c.bf16 %v1109_v36, %v1108_v35  ;;  %v1645_v42 = vpack.c.bf16 %v1335_v37, %v1334_v34  ;;  %v1355_v33 = vld [vmem:[%s10270_s2 + $0x968] sm:$0xff]  ;;  %v1130_v34 = vld [vmem:[%s10270_s2 + $0x260] sm:$0xff] }
 0x22f   : > { %v1131_v35 = vld [vmem:[%s10270_s2 + $0x268] sm:$0xff] }
 0x230   : > { %v1543_v39 = vpack.c.bf16 %v1131_v35, %v1130_v34 }
 0x234   : > { %6668 = vmatmul.mubr.msk.bf16.gmra.mrb[88].mxu1 %vm2483_vm2, %v1634_v44  ;;  %6444 = vmatmul.mubr.msk.bf16.gmra.mrb[92].mxu0 %vm2483_vm2, %v1522_v45  ;;  %v1336_v44 = vld [vmem:[%s10270_s2 + $0x8d0] sm:$0xff]  ;;  %v1337_v45 = vld [vmem:[%s10270_s2 + $0x8d8] sm:$0xff] }
 0x235   : > { %6671 = vmatprep.mubr.msk.bf16.mxu1 %vm2483_vm2, %v1635_v46  ;;  %6447 = vmatprep.mubr.msk.bf16.mxu0 %vm2483_vm2, %v1523_v47  ;;  %v1338_v46 = vld [vmem:[%s10270_s2 + $0x8e0] sm:$0xff]  ;;  %v1112_v47 = vld [vmem:[%s10270_s2 + $0x1d0] sm:$0xff]  ;;  %v1646_v52 = vpack.c.bf16 %v1337_v45, %v1336_v44  ;;  %v1133_v44 = vld [vmem:[%s10270_s2 + $0x278] sm:$0xff] }
 0x236   : > { %v1534_v53 = vpack.c.bf16 %v1113_v48, %v1112_v47  ;;  %v1647_v54 = vpack.c.bf16 %v1339_v49, %v1338_v46  ;;  %v1359_v45 = vld [vmem:[%s10270_s2 + $0x988] sm:$0xff]  ;;  %v1134_v46 = vld [vmem:[%s10270_s2 + $0x280] sm:$0xff] }
 0x237   : > { %v1135_v47 = vld [vmem:[%s10270_s2 + $0x288] sm:$0xff] }
 0x238   : > { %v1545_v51 = vpack.c.bf16 %v1135_v47, %v1134_v46 }
 0x23c   : > { %6672 = vmatmul.mubr.msk.bf16.gmra.mrb[92].mxu1 %vm2483_vm2, %v1636_v56  ;;  %6448 = vmatmul.mubr.msk.bf16.gmra.mrb[96].mxu0 %vm2483_vm2, %v1524_v57  ;;  %v1340_v56 = vld [vmem:[%s10270_s2 + $0x8f0] sm:$0xff]  ;;  %v1341_v57 = vld [vmem:[%s10270_s2 + $0x8f8] sm:$0xff] }
 0x23d   : > { %6675 = vmatprep.mubr.msk.bf16.mxu1 %vm2483_vm2, %v1637_v58  ;;  %6451 = vmatprep.mubr.msk.bf16.mxu0 %vm2483_vm2, %v1525_v59  ;;  %v1342_v58 = vld [vmem:[%s10270_s2 + $0x900] sm:$0xff]  ;;  %v1116_v59 = vld [vmem:[%s10270_s2 + $0x1f0] sm:$0xff]  ;;  %v1648_v0 = vpack.c.bf16 %v1341_v57, %v1340_v56  ;;  %v1137_v56 = vld [vmem:[%s10270_s2 + $0x298] sm:$0xff] }
 0x23e   : > { %v1536_v1 = vpack.c.bf16 %v1117_v60, %v1116_v59  ;;  %v1649_v2 = vpack.c.bf16 %v1343_v61, %v1342_v58  ;;  %v1363_v57 = vld [vmem:[%s10270_s2 + $0x9a8] sm:$0xff]  ;;  %v1138_v58 = vld [vmem:[%s10270_s2 + $0x2a0] sm:$0xff] }
 0x23f   : > { %v1139_v59 = vld [vmem:[%s10270_s2 + $0x2a8] sm:$0xff] }
 0x240   : > { %v1547_v63 = vpack.c.bf16 %v1139_v59, %v1138_v58 }
 0x244   : > { %6676 = vmatmul.mubr.msk.bf16.gmra.mrb[96].mxu1 %vm2483_vm2, %v1638_v4  ;;  %6452 = vmatmul.mubr.msk.bf16.gmra.mrb[100].mxu0 %vm2483_vm2, %v1526_v5  ;;  %v1344_v4 = vld [vmem:[%s10270_s2 + $0x910] sm:$0xff]  ;;  %v1345_v5 = vld [vmem:[%s10270_s2 + $0x918] sm:$0xff] }
 0x245   : > { %6679 = vmatprep.mubr.msk.bf16.mxu1 %vm2483_vm2, %v1639_v6  ;;  %6455 = vmatprep.mubr.msk.bf16.mxu0 %vm2483_vm2, %v1527_v7  ;;  %v1346_v6 = vld [vmem:[%s10270_s2 + $0x920] sm:$0xff]  ;;  %v1120_v7 = vld [vmem:[%s10270_s2 + $0x210] sm:$0xff]  ;;  %v1650_v12 = vpack.c.bf16 %v1345_v5, %v1344_v4  ;;  %v1141_v4 = vld [vmem:[%s10270_s2 + $0x2b8] sm:$0xff] }
 0x246   : > { %v1538_v13 = vpack.c.bf16 %v1121_v8, %v1120_v7  ;;  %v1651_v14 = vpack.c.bf16 %v1347_v9, %v1346_v6  ;;  %v1367_v5 = vld [vmem:[%s10270_s2 + $0x9c8] sm:$0xff]  ;;  %v1142_v6 = vld [vmem:[%s10270_s2 + $0x2c0] sm:$0xff] }
 0x247   : > { %v1143_v7 = vld [vmem:[%s10270_s2 + $0x2c8] sm:$0xff] }
 0x248   : > { %v1549_v11 = vpack.c.bf16 %v1143_v7, %v1142_v6 }
 0x24c   : > { %6680 = vmatmul.mubr.msk.bf16.gmra.mrb[100].mxu1 %vm2483_vm2, %v1640_v16  ;;  %6456 = vmatmul.mubr.msk.bf16.gmra.mrb[104].mxu0 %vm2483_vm2, %v1528_v17  ;;  %v1348_v16 = vld [vmem:[%s10270_s2 + $0x930] sm:$0xff]  ;;  %v1349_v17 = vld [vmem:[%s10270_s2 + $0x938] sm:$0xff] }
 0x24d   : > { %6683 = vmatprep.mubr.msk.bf16.mxu1 %vm2483_vm2, %v1641_v18  ;;  %6459 = vmatprep.mubr.msk.bf16.mxu0 %vm2483_vm2, %v1529_v19  ;;  %v1350_v18 = vld [vmem:[%s10270_s2 + $0x940] sm:$0xff]  ;;  %v1124_v19 = vld [vmem:[%s10270_s2 + $0x230] sm:$0xff]  ;;  %v1652_v24 = vpack.c.bf16 %v1349_v17, %v1348_v16  ;;  %v1145_v16 = vld [vmem:[%s10270_s2 + $0x2d8] sm:$0xff] }
 0x24e   : > { %v1540_v25 = vpack.c.bf16 %v1125_v20, %v1124_v19  ;;  %v1653_v26 = vpack.c.bf16 %v1351_v21, %v1350_v18  ;;  %v1371_v17 = vld [vmem:[%s10270_s2 + $0x9e8] sm:$0xff]  ;;  %v1146_v18 = vld [vmem:[%s10270_s2 + $0x2e0] sm:$0xff] }
 0x24f   : > { %v1147_v19 = vld [vmem:[%s10270_s2 + $0x2e8] sm:$0xff] }
 0x250   : > { %v1551_v23 = vpack.c.bf16 %v1147_v19, %v1146_v18 }
 0x254   : > { %6684 = vmatmul.mubr.msk.bf16.gmra.mrb[104].mxu1 %vm2483_vm2, %v1642_v28  ;;  %6460 = vmatmul.mubr.msk.bf16.gmra.mrb[108].mxu0 %vm2483_vm2, %v1530_v29  ;;  %v1352_v28 = vld [vmem:[%s10270_s2 + $0x950] sm:$0xff]  ;;  %v1353_v29 = vld [vmem:[%s10270_s2 + $0x958] sm:$0xff] }
 0x255   : > { %6687 = vmatprep.mubr.msk.bf16.mxu1 %vm2483_vm2, %v1643_v30  ;;  %6463 = vmatprep.mubr.msk.bf16.mxu0 %vm2483_vm2, %v1531_v31  ;;  %v1354_v30 = vld [vmem:[%s10270_s2 + $0x960] sm:$0xff]  ;;  %v1128_v31 = vld [vmem:[%s10270_s2 + $0x250] sm:$0xff]  ;;  %v1654_v36 = vpack.c.bf16 %v1353_v29, %v1352_v28  ;;  %v1149_v28 = vld [vmem:[%s10270_s2 + $0x2f8] sm:$0xff] }
 0x256   : > { %v1542_v37 = vpack.c.bf16 %v1129_v32, %v1128_v31  ;;  %v1655_v38 = vpack.c.bf16 %v1355_v33, %v1354_v30  ;;  %v1375_v29 = vld [vmem:[%s10270_s2 + $0xa08] sm:$0xff]  ;;  %v1150_v30 = vld [vmem:[%s10270_s2 + $0x300] sm:$0xff] }
 0x257   : > { %v1151_v31 = vld [vmem:[%s10270_s2 + $0x308] sm:$0xff] }
 0x258   : > { %v1553_v35 = vpack.c.bf16 %v1151_v31, %v1150_v30  ;;  %v1394_v30 = vld [vmem:[%s10270_s2 + $0xaa0] sm:$0xff]  ;;  %v1168_v31 = vld [vmem:[%s10270_s2 + $0x390] sm:$0xff] }
 0x25c   : > { %6688 = vmatmul.mubr.msk.bf16.gmra.mrb[108].mxu1 %vm2483_vm2, %v1644_v40  ;;  %6464 = vmatmul.mubr.msk.bf16.gmra.mrb[112].mxu0 %vm2483_vm2, %v1532_v41  ;;  %v1356_v40 = vld [vmem:[%s10270_s2 + $0x970] sm:$0xff]  ;;  %v1357_v41 = vld [vmem:[%s10270_s2 + $0x978] sm:$0xff] }
 0x25d   : > { %6691 = vmatprep.mubr.msk.bf16.mxu1 %vm2483_vm2, %v1645_v42  ;;  %6467 = vmatprep.mubr.msk.bf16.mxu0 %vm2483_vm2, %v1533_v43  ;;  %v1358_v42 = vld [vmem:[%s10270_s2 + $0x980] sm:$0xff]  ;;  %v1132_v43 = vld [vmem:[%s10270_s2 + $0x270] sm:$0xff]  ;;  %v1656_v48 = vpack.c.bf16 %v1357_v41, %v1356_v40  ;;  %v1153_v40 = vld [vmem:[%s10270_s2 + $0x318] sm:$0xff] }
 0x25e   : > { %v1544_v49 = vpack.c.bf16 %v1133_v44, %v1132_v43  ;;  %v1657_v50 = vpack.c.bf16 %v1359_v45, %v1358_v42  ;;  %v1379_v41 = vld [vmem:[%s10270_s2 + $0xa28] sm:$0xff]  ;;  %v1154_v42 = vld [vmem:[%s10270_s2 + $0x320] sm:$0xff] }
 0x25f   : > { %v1155_v43 = vld [vmem:[%s10270_s2 + $0x328] sm:$0xff] }
 0x260   : > { %v1555_v47 = vpack.c.bf16 %v1155_v43, %v1154_v42 }
 0x264   : > { %6692 = vmatmul.mubr.msk.bf16.gmra.mrb[112].mxu1 %vm2483_vm2, %v1646_v52  ;;  %6468 = vmatmul.mubr.msk.bf16.gmra.mrb[116].mxu0 %vm2483_vm2, %v1534_v53  ;;  %v1360_v52 = vld [vmem:[%s10270_s2 + $0x990] sm:$0xff]  ;;  %v1361_v53 = vld [vmem:[%s10270_s2 + $0x998] sm:$0xff] }
 0x265   : > { %6695 = vmatprep.mubr.msk.bf16.mxu1 %vm2483_vm2, %v1647_v54  ;;  %6471 = vmatprep.mubr.msk.bf16.mxu0 %vm2483_vm2, %v1535_v55  ;;  %v1362_v54 = vld [vmem:[%s10270_s2 + $0x9a0] sm:$0xff]  ;;  %v1136_v55 = vld [vmem:[%s10270_s2 + $0x290] sm:$0xff]  ;;  %v1658_v60 = vpack.c.bf16 %v1361_v53, %v1360_v52  ;;  %v1157_v52 = vld [vmem:[%s10270_s2 + $0x338] sm:$0xff] }
 0x266   : > { %v1546_v61 = vpack.c.bf16 %v1137_v56, %v1136_v55  ;;  %v1659_v62 = vpack.c.bf16 %v1363_v57, %v1362_v54  ;;  %v1383_v53 = vld [vmem:[%s10270_s2 + $0xa48] sm:$0xff]  ;;  %v1158_v54 = vld [vmem:[%s10270_s2 + $0x340] sm:$0xff] }
 0x267   : > { %v1159_v55 = vld [vmem:[%s10270_s2 + $0x348] sm:$0xff] }
 0x268   : > { %v1557_v59 = vpack.c.bf16 %v1159_v55, %v1158_v54  ;;  %v1174_v54 = vld [vmem:[%s10270_s2 + $0x3c0] sm:$0xff]  ;;  %v1175_v55 = vld [vmem:[%s10270_s2 + $0x3c8] sm:$0xff] }
 0x26c   : > { %6696 = vmatmul.mubr.msk.bf16.gmra.mrb[116].mxu1 %vm2483_vm2, %v1648_v0  ;;  %6472 = vmatmul.mubr.msk.bf16.gmra.mrb[120].mxu0 %vm2483_vm2, %v1536_v1  ;;  %v1364_v0 = vld [vmem:[%s10270_s2 + $0x9b0] sm:$0xff]  ;;  %v1365_v1 = vld [vmem:[%s10270_s2 + $0x9b8] sm:$0xff] }
 0x26d   : > { %6699 = vmatprep.mubr.msk.bf16.mxu1 %vm2483_vm2, %v1649_v2  ;;  %6475 = vmatprep.mubr.msk.bf16.mxu0 %vm2483_vm2, %v1537_v3  ;;  %v1366_v2 = vld [vmem:[%s10270_s2 + $0x9c0] sm:$0xff]  ;;  %v1140_v3 = vld [vmem:[%s10270_s2 + $0x2b0] sm:$0xff]  ;;  %v1660_v8 = vpack.c.bf16 %v1365_v1, %v1364_v0  ;;  %v1161_v0 = vld [vmem:[%s10270_s2 + $0x358] sm:$0xff] }
 0x26e   : > { %v1548_v9 = vpack.c.bf16 %v1141_v4, %v1140_v3  ;;  %v1661_v10 = vpack.c.bf16 %v1367_v5, %v1366_v2  ;;  %v1387_v1 = vld [vmem:[%s10270_s2 + $0xa68] sm:$0xff]  ;;  %v1162_v2 = vld [vmem:[%s10270_s2 + $0x360] sm:$0xff] }
 0x26f   : > { %v1163_v3 = vld [vmem:[%s10270_s2 + $0x368] sm:$0xff] }
 0x270   : > { %v1559_v7 = vpack.c.bf16 %v1163_v3, %v1162_v2 }
 0x274   : > { %6700 = vmatmul.mubr.msk.bf16.gmra.mrb[120].mxu1 %vm2483_vm2, %v1650_v12  ;;  %6476 = vmatmul.mubr.msk.bf16.gmra.mrb[124].mxu0 %vm2483_vm2, %v1538_v13  ;;  %v1368_v12 = vld [vmem:[%s10270_s2 + $0x9d0] sm:$0xff]  ;;  %v1369_v13 = vld [vmem:[%s10270_s2 + $0x9d8] sm:$0xff] }
 0x275   : > { %6703 = vmatprep.mubr.msk.bf16.mxu1 %vm2483_vm2, %v1651_v14  ;;  %6479 = vmatprep.mubr.msk.bf16.mxu0 %vm2483_vm2, %v1539_v15  ;;  %v1370_v14 = vld [vmem:[%s10270_s2 + $0x9e0] sm:$0xff]  ;;  %v1144_v15 = vld [vmem:[%s10270_s2 + $0x2d0] sm:$0xff]  ;;  %v1662_v20 = vpack.c.bf16 %v1369_v13, %v1368_v12  ;;  %v1165_v12 = vld [vmem:[%s10270_s2 + $0x378] sm:$0xff] }
 0x276   : > { %v1550_v21 = vpack.c.bf16 %v1145_v16, %v1144_v15  ;;  %v1663_v22 = vpack.c.bf16 %v1371_v17, %v1370_v14  ;;  %v1391_v13 = vld [vmem:[%s10270_s2 + $0xa88] sm:$0xff]  ;;  %v1166_v14 = vld [vmem:[%s10270_s2 + $0x380] sm:$0xff] }
 0x277   : > { %v1167_v15 = vld [vmem:[%s10270_s2 + $0x388] sm:$0xff] }
 0x27c   : > { %6704 = vmatmul.mubr.msk.bf16.gmra.mrb[124].mxu1 %vm2483_vm2, %v1652_v24  ;;  %6480 = vmatmul.mubr.msk.bf16.gmra.mrb[128].mxu0 %vm2483_vm2, %v1540_v25  ;;  %v1372_v24 = vld [vmem:[%s10270_s2 + $0x9f0] sm:$0xff]  ;;  %v1373_v25 = vld [vmem:[%s10270_s2 + $0x9f8] sm:$0xff] }
 0x27d   : > { %6707 = vmatprep.mubr.msk.bf16.mxu1 %vm2483_vm2, %v1653_v26  ;;  %6483 = vmatprep.mubr.msk.bf16.mxu0 %vm2483_vm2, %v1541_v27  ;;  %v1374_v26 = vld [vmem:[%s10270_s2 + $0xa00] sm:$0xff]  ;;  %v1148_v27 = vld [vmem:[%s10270_s2 + $0x2f0] sm:$0xff]  ;;  %v1664_v32 = vpack.c.bf16 %v1373_v25, %v1372_v24  ;;  %v1561_v25 = vpack.c.bf16 %v1167_v15, %v1166_v14 }
 0x27e   : > { %v1552_v33 = vpack.c.bf16 %v1149_v28, %v1148_v27  ;;  %v1665_v34 = vpack.c.bf16 %v1375_v29, %v1374_v26  ;;  %v1392_v28 = vld [vmem:[%s10270_s2 + $0xa90] sm:$0xff]  ;;  %v1393_v29 = vld [vmem:[%s10270_s2 + $0xa98] sm:$0xff] }
 0x284   : > { %6708 = vmatmul.mubr.msk.bf16.gmra.mrb[128].mxu1 %vm2483_vm2, %v1654_v36  ;;  %6484 = vmatmul.mubr.msk.bf16.gmra.mrb[132].mxu0 %vm2483_vm2, %v1542_v37  ;;  %v1376_v36 = vld [vmem:[%s10270_s2 + $0xa10] sm:$0xff]  ;;  %v1377_v37 = vld [vmem:[%s10270_s2 + $0xa18] sm:$0xff] }
 0x285   : > { %6711 = vmatprep.mubr.msk.bf16.mxu1 %vm2483_vm2, %v1655_v38  ;;  %6487 = vmatprep.mubr.msk.bf16.mxu0 %vm2483_vm2, %v1543_v39  ;;  %v1378_v38 = vld [vmem:[%s10270_s2 + $0xa20] sm:$0xff]  ;;  %v1152_v39 = vld [vmem:[%s10270_s2 + $0x310] sm:$0xff]  ;;  %v1666_v44 = vpack.c.bf16 %v1377_v37, %v1376_v36 }
 0x286   : > { %v1554_v45 = vpack.c.bf16 %v1153_v40, %v1152_v39  ;;  %v1667_v46 = vpack.c.bf16 %v1379_v41, %v1378_v38  ;;  %v1674_v39 = vpack.c.bf16 %v1393_v29, %v1392_v28  ;;  %v1181_v28 = vld [vmem:[%s10270_s2 + $0x3f8] sm:$0xff]  ;;  %v1407_v29 = vld [vmem:[%s10270_s2 + $0xb08] sm:$0xff] }
 0x28c   : > { %6712 = vmatmul.mubr.msk.bf16.gmra.mrb[132].mxu1 %vm2483_vm2, %v1656_v48  ;;  %6488 = vmatmul.mubr.msk.bf16.gmra.mrb[136].mxu0 %vm2483_vm2, %v1544_v49  ;;  %v1380_v48 = vld [vmem:[%s10270_s2 + $0xa30] sm:$0xff]  ;;  %v1381_v49 = vld [vmem:[%s10270_s2 + $0xa38] sm:$0xff] }
 0x28d   : > { %6715 = vmatprep.mubr.msk.bf16.mxu1 %vm2483_vm2, %v1657_v50  ;;  %6491 = vmatprep.mubr.msk.bf16.mxu0 %vm2483_vm2, %v1545_v51  ;;  %v1382_v50 = vld [vmem:[%s10270_s2 + $0xa40] sm:$0xff]  ;;  %v1156_v51 = vld [vmem:[%s10270_s2 + $0x330] sm:$0xff]  ;;  %v1668_v56 = vpack.c.bf16 %v1381_v49, %v1380_v48  ;;  %v1397_v49 = vld [vmem:[%s10270_s2 + $0xab8] sm:$0xff] }
 0x28e   : > { %v1556_v57 = vpack.c.bf16 %v1157_v52, %v1156_v51  ;;  %v1669_v58 = vpack.c.bf16 %v1383_v53, %v1382_v50  ;;  %v1396_v48 = vld [vmem:[%s10270_s2 + $0xab0] sm:$0xff]  ;;  %v1398_v50 = vld [vmem:[%s10270_s2 + $0xac0] sm:$0xff]  ;;  %v1173_v52 = vld [vmem:[%s10270_s2 + $0x3b8] sm:$0xff] }
 0x28f   : > { %v1172_v51 = vld [vmem:[%s10270_s2 + $0x3b0] sm:$0xff]  ;;  %v1399_v53 = vld [vmem:[%s10270_s2 + $0xac8] sm:$0xff] }
 0x294   : > { %6716 = vmatmul.mubr.msk.bf16.gmra.mrb[136].mxu1 %vm2483_vm2, %v1658_v60  ;;  %6492 = vmatmul.mubr.msk.bf16.gmra.mrb[140].mxu0 %vm2483_vm2, %v1546_v61  ;;  %v1384_v60 = vld [vmem:[%s10270_s2 + $0xa50] sm:$0xff]  ;;  %v1385_v61 = vld [vmem:[%s10270_s2 + $0xa58] sm:$0xff] }
 0x295   : > { %6719 = vmatprep.mubr.msk.bf16.mxu1 %vm2483_vm2, %v1659_v62  ;;  %6495 = vmatprep.mubr.msk.bf16.mxu0 %vm2483_vm2, %v1547_v63  ;;  %v1386_v62 = vld [vmem:[%s10270_s2 + $0xa60] sm:$0xff]  ;;  %v1160_v63 = vld [vmem:[%s10270_s2 + $0x350] sm:$0xff]  ;;  %v1670_v4 = vpack.c.bf16 %v1385_v61, %v1384_v60  ;;  %v1564_v61 = vpack.c.bf16 %v1173_v52, %v1172_v51  ;;  %v1187_v51 = vld [vmem:[%s10270_s2 + $0x428] sm:$0xff] }
 0x296   : > { %v1558_v5 = vpack.c.bf16 %v1161_v0, %v1160_v63  ;;  %v1671_v6 = vpack.c.bf16 %v1387_v1, %v1386_v62  ;;  %v1677_v0 = vpack.c.bf16 %v1399_v53, %v1398_v50  ;;  %v1565_v1 = vpack.c.bf16 %v1175_v55, %v1174_v54  ;;  %v1186_v50 = vld [vmem:[%s10270_s2 + $0x420] sm:$0xff] }
 0x29c   : > { %6720 = vmatmul.mubr.msk.bf16.gmra.mrb[140].mxu1 %vm2483_vm2, %v1660_v8  ;;  %6496 = vmatmul.mubr.msk.bf16.gmra.mrb[144].mxu0 %vm2483_vm2, %v1548_v9  ;;  %v1388_v8 = vld [vmem:[%s10270_s2 + $0xa70] sm:$0xff]  ;;  %v1389_v9 = vld [vmem:[%s10270_s2 + $0xa78] sm:$0xff] }
 0x29d   : > { %6723 = vmatprep.mubr.msk.bf16.mxu1 %vm2483_vm2, %v1661_v10  ;;  %6499 = vmatprep.mubr.msk.bf16.mxu0 %vm2483_vm2, %v1549_v11  ;;  %v1390_v10 = vld [vmem:[%s10270_s2 + $0xa80] sm:$0xff]  ;;  %v1164_v11 = vld [vmem:[%s10270_s2 + $0x370] sm:$0xff]  ;;  %v1672_v19 = vpack.c.bf16 %v1389_v9, %v1388_v8  ;;  %v1177_v8 = vld [vmem:[%s10270_s2 + $0x3d8] sm:$0xff] }
 0x29e   : > { %v1673_v24 = vpack.c.bf16 %v1391_v13, %v1390_v10  ;;  %v1403_v9 = vld [vmem:[%s10270_s2 + $0xae8] sm:$0xff]  ;;  %v1178_v10 = vld [vmem:[%s10270_s2 + $0x3e0] sm:$0xff] }
 0x2a4   : > { %6724 = vmatmul.mubr.msk.bf16.gmra.mrb[144].mxu1 %vm2483_vm2, %v1662_v20  ;;  %6500 = vmatmul.mubr.msk.bf16.gmra.mrb[148].mxu0 %vm2483_vm2, %v1550_v21  ;;  %v1560_v21 = vpack.c.bf16 %v1165_v12, %v1164_v11  ;;  %v1179_v11 = vld [vmem:[%s10270_s2 + $0x3e8] sm:$0xff] }
 0x2a5   : > { %6727 = vmatprep.mubr.msk.bf16.mxu1 %vm2483_vm2, %v1663_v22  ;;  %6503 = vmatprep.mubr.msk.bf16.mxu0 %vm2483_vm2, %v1551_v23 }
 0x2ac   : > { %6728 = vmatmul.mubr.msk.bf16.gmra.mrb[148].mxu1 %vm2483_vm2, %v1664_v32  ;;  %6504 = vmatmul.mubr.msk.bf16.gmra.mrb[152].mxu0 %vm2483_vm2, %v1552_v33  ;;  %v1169_v32 = vld [vmem:[%s10270_s2 + $0x398] sm:$0xff]  ;;  %v1395_v33 = vld [vmem:[%s10270_s2 + $0xaa8] sm:$0xff] }
 0x2ad   : > { %6731 = vmatprep.mubr.msk.bf16.mxu1 %vm2483_vm2, %v1665_v34  ;;  %6507 = vmatprep.mubr.msk.bf16.mxu0 %vm2483_vm2, %v1553_v35  ;;  %v1170_v34 = vld [vmem:[%s10270_s2 + $0x3a0] sm:$0xff]  ;;  %v1171_v35 = vld [vmem:[%s10270_s2 + $0x3a8] sm:$0xff]  ;;  %v1562_v41 = vpack.c.bf16 %v1169_v32, %v1168_v31 }
 0x2ae   : > { %v1183_v31 = vld [vmem:[%s10270_s2 + $0x408] sm:$0xff] }
 0x2b4   : > { %6732 = vmatmul.mubr.msk.bf16.gmra.mrb[152].mxu1 %vm2483_vm2, %v1666_v44  ;;  %6508 = vmatmul.mubr.msk.bf16.gmra.mrb[156].mxu0 %vm2483_vm2, %v1554_v45  ;;  %v1675_v44 = vpack.c.bf16 %v1395_v33, %v1394_v30  ;;  %v1563_v45 = vpack.c.bf16 %v1171_v35, %v1170_v34  ;;  %v1182_v30 = vld [vmem:[%s10270_s2 + $0x400] sm:$0xff] }
 0x2b5   : > { %6735 = vmatprep.mubr.msk.bf16.mxu1 %vm2483_vm2, %v1667_v46  ;;  %6511 = vmatprep.mubr.msk.bf16.mxu0 %vm2483_vm2, %v1555_v47 }
 0x2bc   : > { %6736 = vmatmul.mubr.msk.bf16.gmra.mrb[156].mxu1 %vm2483_vm2, %v1668_v56  ;;  %6512 = vmatmul.mubr.msk.bf16.gmra.mrb[160].mxu0 %vm2483_vm2, %v1556_v57 }
 0x2bd   : > { %6739 = vmatprep.mubr.msk.bf16.mxu1 %vm2483_vm2, %v1669_v58  ;;  %6515 = vmatprep.mubr.msk.bf16.mxu0 %vm2483_vm2, %v1557_v59  ;;  %v1676_v59 = vpack.c.bf16 %v1397_v49, %v1396_v48  ;;  %v1185_v48 = vld [vmem:[%s10270_s2 + $0x418] sm:$0xff]  ;;  %v1411_v49 = vld [vmem:[%s10270_s2 + $0xb28] sm:$0xff] }
 0x2c4   : > { %6740 = vmatmul.mubr.msk.bf16.gmra.mrb[160].mxu1 %vm2483_vm2, %v1670_v4  ;;  %6516 = vmatmul.mubr.msk.bf16.gmra.mrb[164].mxu0 %vm2483_vm2, %v1558_v5  ;;  %v1400_v4 = vld [vmem:[%s10270_s2 + $0xad0] sm:$0xff]  ;;  %v1401_v5 = vld [vmem:[%s10270_s2 + $0xad8] sm:$0xff] }
 0x2c5   : > { %6743 = vmatprep.mubr.msk.bf16.mxu1 %vm2483_vm2, %v1671_v6  ;;  %6519 = vmatprep.mubr.msk.bf16.mxu0 %vm2483_vm2, %v1559_v7  ;;  %v1402_v6 = vld [vmem:[%s10270_s2 + $0xae0] sm:$0xff]  ;;  %v1176_v7 = vld [vmem:[%s10270_s2 + $0x3d0] sm:$0xff]  ;;  %v1678_v15 = vpack.c.bf16 %v1401_v5, %v1400_v4  ;;  %v1189_v4 = vld [vmem:[%s10270_s2 + $0x438] sm:$0xff] }
 0x2c6   : > { %v1415_v5 = vld [vmem:[%s10270_s2 + $0xb48] sm:$0xff] }
 0x2c7   : > { %v6637_v16 = vpop.f32.mrb[56].mxu1  ;;  %v6413_v17 = vpop.f32.mrb[60].mxu0 }
 0x2c8   : > { %5229 = vst.msk [vmem:[%s8551_s25 + $0x710] sm:$0xff] %vm5002_vm3, %v6637_v16  ;;  %v4092_v18 = vpop.f32.mrb[57].mxu1  ;;  %5005 = vst.msk [vmem:[%s8551_s25 + $0x10] sm:$0xff] %vm5002_vm3, %v6413_v17  ;;  %v3196_v20 = vpop.f32.mrb[61].mxu0  ;;  %v1566_v17 = vpack.c.bf16 %v1177_v8, %v1176_v7  ;;  %v1191_v7 = vld [vmem:[%s10270_s2 + $0x448] sm:$0xff] }
 0x2c9   : > { %5227 = vst.msk [vmem:[%s8551_s25 + $0x700] sm:$0xff] %vm5002_vm3, %v4092_v18  ;;  %v6638_v22 = vpop.f32.mrb[58].mxu1  ;;  %5003 = vst.msk [vmem:[%s8551_s25] sm:$0xff] %vm5002_vm3, %v3196_v20  ;;  %v6414_v23 = vpop.f32.mrb[62].mxu0  ;;  %v1679_v20 = vpack.c.bf16 %v1403_v9, %v1402_v6  ;;  %v1190_v6 = vld [vmem:[%s10270_s2 + $0x440] sm:$0xff] }
 0x2ca   : > { %5230 = vst.msk [vmem:[%s8551_s25 + $0x718] sm:$0xff] %vm5002_vm3, %v6638_v22  ;;  %v4095_v26 = vpop.f32.mrb[59].mxu1  ;;  %5006 = vst.msk [vmem:[%s8551_s25 + $0x18] sm:$0xff] %vm5002_vm3, %v6414_v23  ;;  %v3199_v27 = vpop.f32.mrb[63].mxu0 }
 0x2cb   : > { %5228 = vst.msk [vmem:[%s8551_s25 + $0x708] sm:$0xff] %vm5002_vm3, %v4095_v26  ;;  %5004 = vst.msk [vmem:[%s8551_s25 + $0x8] sm:$0xff] %vm5002_vm3, %v3199_v27  ;;  %v1406_v26 = vld [vmem:[%s10270_s2 + $0xb00] sm:$0xff]  ;;  %v1180_v27 = vld [vmem:[%s10270_s2 + $0x3f0] sm:$0xff] }
 0x2cc   : > { %6744 = vmatmul.mubr.msk.bf16.gmra.mrb[164].mxu1 %vm2483_vm2, %v1672_v19  ;;  %6520 = vmatmul.mubr.msk.bf16.gmra.mrb[168].mxu0 %vm2483_vm2, %v1560_v21  ;;  %v1567_v21 = vpack.c.bf16 %v1179_v11, %v1178_v10 }
 0x2cd   : > { %6747 = vmatprep.mubr.msk.bf16.mxu1 %vm2483_vm2, %v1673_v24  ;;  %6523 = vmatprep.mubr.msk.bf16.mxu0 %vm2483_vm2, %v1561_v25  ;;  %v1404_v24 = vld [vmem:[%s10270_s2 + $0xaf0] sm:$0xff]  ;;  %v1405_v25 = vld [vmem:[%s10270_s2 + $0xaf8] sm:$0xff] }
 0x2ce   : > { %v1680_v35 = vpack.c.bf16 %v1405_v25, %v1404_v24  ;;  %v1193_v24 = vld [vmem:[%s10270_s2 + $0x458] sm:$0xff]  ;;  %v1419_v25 = vld [vmem:[%s10270_s2 + $0xb68] sm:$0xff] }
 0x2cf   : > { %v6641_v36 = vpop.f32.mrb[60].mxu1  ;;  %v6417_v37 = vpop.f32.mrb[64].mxu0 }
 0x2d0   : > { %5233 = vst.msk [vmem:[%s8551_s25 + $0x730] sm:$0xff] %vm5002_vm3, %v6641_v36  ;;  %v4108_v38 = vpop.f32.mrb[61].mxu1  ;;  %5009 = vst.msk [vmem:[%s8551_s25 + $0x30] sm:$0xff] %vm5002_vm3, %v6417_v37  ;;  %v3212_v40 = vpop.f32.mrb[65].mxu0  ;;  %v1568_v37 = vpack.c.bf16 %v1181_v28, %v1180_v27  ;;  %v1195_v27 = vld [vmem:[%s10270_s2 + $0x468] sm:$0xff] }
 0x2d1   : > { %5231 = vst.msk [vmem:[%s8551_s25 + $0x720] sm:$0xff] %vm5002_vm3, %v4108_v38  ;;  %v6642_v42 = vpop.f32.mrb[62].mxu1  ;;  %5007 = vst.msk [vmem:[%s8551_s25 + $0x20] sm:$0xff] %vm5002_vm3, %v3212_v40  ;;  %v6418_v43 = vpop.f32.mrb[66].mxu0  ;;  %v1681_v40 = vpack.c.bf16 %v1407_v29, %v1406_v26  ;;  %v1194_v26 = vld [vmem:[%s10270_s2 + $0x460] sm:$0xff] }
 0x2d2   : > { %5234 = vst.msk [vmem:[%s8551_s25 + $0x738] sm:$0xff] %vm5002_vm3, %v6642_v42  ;;  %v4111_v46 = vpop.f32.mrb[63].mxu1  ;;  %5010 = vst.msk [vmem:[%s8551_s25 + $0x38] sm:$0xff] %vm5002_vm3, %v6418_v43  ;;  %v3215_v47 = vpop.f32.mrb[67].mxu0 }
 0x2d3   : > { %5232 = vst.msk [vmem:[%s8551_s25 + $0x728] sm:$0xff] %vm5002_vm3, %v4111_v46  ;;  %5008 = vst.msk [vmem:[%s8551_s25 + $0x28] sm:$0xff] %vm5002_vm3, %v3215_v47  ;;  %v1410_v46 = vld [vmem:[%s10270_s2 + $0xb20] sm:$0xff]  ;;  %v1184_v47 = vld [vmem:[%s10270_s2 + $0x410] sm:$0xff] }
 0x2d4   : > { %6748 = vmatmul.mubr.msk.bf16.gmra.mrb[168].mxu1 %vm2483_vm2, %v1674_v39  ;;  %6524 = vmatmul.mubr.msk.bf16.gmra.mrb[172].mxu0 %vm2483_vm2, %v1562_v41  ;;  %v1569_v41 = vpack.c.bf16 %v1183_v31, %v1182_v30 }
 0x2d5   : > { %6751 = vmatprep.mubr.msk.bf16.mxu1 %vm2483_vm2, %v1675_v44  ;;  %6527 = vmatprep.mubr.msk.bf16.mxu0 %vm2483_vm2, %v1563_v45  ;;  %v1408_v44 = vld [vmem:[%s10270_s2 + $0xb10] sm:$0xff]  ;;  %v1409_v45 = vld [vmem:[%s10270_s2 + $0xb18] sm:$0xff] }
 0x2d6   : > { %v1682_v55 = vpack.c.bf16 %v1409_v45, %v1408_v44  ;;  %v1197_v44 = vld [vmem:[%s10270_s2 + $0x478] sm:$0xff]  ;;  %v1423_v45 = vld [vmem:[%s10270_s2 + $0xb88] sm:$0xff] }
 0x2d7   : > { %v6645_v56 = vpop.f32.mrb[64].mxu1  ;;  %v6421_v57 = vpop.f32.mrb[68].mxu0 }
 0x2d8   : > { %5237 = vst.msk [vmem:[%s8551_s25 + $0x750] sm:$0xff] %vm5002_vm3, %v6645_v56  ;;  %v4124_v58 = vpop.f32.mrb[65].mxu1  ;;  %5013 = vst.msk [vmem:[%s8551_s25 + $0x50] sm:$0xff] %vm5002_vm3, %v6421_v57  ;;  %v3228_v60 = vpop.f32.mrb[69].mxu0  ;;  %v1570_v57 = vpack.c.bf16 %v1185_v48, %v1184_v47  ;;  %v1199_v47 = vld [vmem:[%s10270_s2 + $0x488] sm:$0xff] }
 0x2d9   : > { %5235 = vst.msk [vmem:[%s8551_s25 + $0x740] sm:$0xff] %vm5002_vm3, %v4124_v58  ;;  %v6646_v62 = vpop.f32.mrb[66].mxu1  ;;  %5011 = vst.msk [vmem:[%s8551_s25 + $0x40] sm:$0xff] %vm5002_vm3, %v3228_v60  ;;  %v6422_v63 = vpop.f32.mrb[70].mxu0  ;;  %v1683_v60 = vpack.c.bf16 %v1411_v49, %v1410_v46  ;;  %v1198_v46 = vld [vmem:[%s10270_s2 + $0x480] sm:$0xff] }
 0x2da   : > { %5238 = vst.msk [vmem:[%s8551_s25 + $0x758] sm:$0xff] %vm5002_vm3, %v6646_v62  ;;  %v4127_v2 = vpop.f32.mrb[67].mxu1  ;;  %5014 = vst.msk [vmem:[%s8551_s25 + $0x58] sm:$0xff] %vm5002_vm3, %v6422_v63  ;;  %v3231_v3 = vpop.f32.mrb[71].mxu0 }
 0x2db   : > { %5236 = vst.msk [vmem:[%s8551_s25 + $0x748] sm:$0xff] %vm5002_vm3, %v4127_v2  ;;  %5012 = vst.msk [vmem:[%s8551_s25 + $0x48] sm:$0xff] %vm5002_vm3, %v3231_v3  ;;  %v1414_v2 = vld [vmem:[%s10270_s2 + $0xb40] sm:$0xff]  ;;  %v1188_v3 = vld [vmem:[%s10270_s2 + $0x430] sm:$0xff] }
 0x2dc   : > { %6752 = vmatmul.mubr.msk.bf16.gmra.mrb[172].mxu1 %vm2483_vm2, %v1676_v59  ;;  %6528 = vmatmul.mubr.msk.bf16.gmra.mrb[176].mxu0 %vm2483_vm2, %v1564_v61  ;;  %v1571_v61 = vpack.c.bf16 %v1187_v51, %v1186_v50 }
 0x2dd   : > { %6755 = vmatprep.mubr.msk.bf16.mxu1 %vm2483_vm2, %v1677_v0  ;;  %6531 = vmatprep.mubr.msk.bf16.mxu0 %vm2483_vm2, %v1565_v1  ;;  %v1412_v0 = vld [vmem:[%s10270_s2 + $0xb30] sm:$0xff]  ;;  %v1413_v1 = vld [vmem:[%s10270_s2 + $0xb38] sm:$0xff] }
 0x2de   : > { %v1684_v11 = vpack.c.bf16 %v1413_v1, %v1412_v0  ;;  %v1201_v0 = vld [vmem:[%s10270_s2 + $0x498] sm:$0xff]  ;;  %v1427_v1 = vld [vmem:[%s10270_s2 + $0xba8] sm:$0xff] }
 0x2df   : > { %v6649_v12 = vpop.f32.mrb[68].mxu1  ;;  %v6425_v13 = vpop.f32.mrb[72].mxu0 }
 0x2e0   : > { %5241 = vst.msk [vmem:[%s8551_s25 + $0x770] sm:$0xff] %vm5002_vm3, %v6649_v12  ;;  %v4140_v14 = vpop.f32.mrb[69].mxu1  ;;  %5017 = vst.msk [vmem:[%s8551_s25 + $0x70] sm:$0xff] %vm5002_vm3, %v6425_v13  ;;  %v3244_v16 = vpop.f32.mrb[73].mxu0  ;;  %v1572_v13 = vpack.c.bf16 %v1189_v4, %v1188_v3  ;;  %v1203_v3 = vld [vmem:[%s10270_s2 + $0x4a8] sm:$0xff] }
 0x2e1   : > { %5239 = vst.msk [vmem:[%s8551_s25 + $0x760] sm:$0xff] %vm5002_vm3, %v4140_v14  ;;  %v6650_v18 = vpop.f32.mrb[70].mxu1  ;;  %5015 = vst.msk [vmem:[%s8551_s25 + $0x60] sm:$0xff] %vm5002_vm3, %v3244_v16  ;;  %v6426_v19 = vpop.f32.mrb[74].mxu0  ;;  %v1685_v16 = vpack.c.bf16 %v1415_v5, %v1414_v2  ;;  %v1202_v2 = vld [vmem:[%s10270_s2 + $0x4a0] sm:$0xff] }
 0x2e2   : > { %5242 = vst.msk [vmem:[%s8551_s25 + $0x778] sm:$0xff] %vm5002_vm3, %v6650_v18  ;;  %v4143_v22 = vpop.f32.mrb[71].mxu1  ;;  %5018 = vst.msk [vmem:[%s8551_s25 + $0x78] sm:$0xff] %vm5002_vm3, %v6426_v19  ;;  %v3247_v23 = vpop.f32.mrb[75].mxu0 }
 0x2e3   : > { %5240 = vst.msk [vmem:[%s8551_s25 + $0x768] sm:$0xff] %vm5002_vm3, %v4143_v22  ;;  %5016 = vst.msk [vmem:[%s8551_s25 + $0x68] sm:$0xff] %vm5002_vm3, %v3247_v23  ;;  %v1418_v22 = vld [vmem:[%s10270_s2 + $0xb60] sm:$0xff]  ;;  %v1192_v23 = vld [vmem:[%s10270_s2 + $0x450] sm:$0xff] }
 0x2e4   : > { %6756 = vmatmul.mubr.msk.bf16.gmra.mrb[176].mxu1 %vm2483_vm2, %v1678_v15  ;;  %6532 = vmatmul.mubr.msk.bf16.gmra.mrb[180].mxu0 %vm2483_vm2, %v1566_v17  ;;  %v1573_v17 = vpack.c.bf16 %v1191_v7, %v1190_v6 }
 0x2e5   : > { %6759 = vmatprep.mubr.msk.bf16.mxu1 %vm2483_vm2, %v1679_v20  ;;  %6535 = vmatprep.mubr.msk.bf16.mxu0 %vm2483_vm2, %v1567_v21  ;;  %v1416_v20 = vld [vmem:[%s10270_s2 + $0xb50] sm:$0xff]  ;;  %v1417_v21 = vld [vmem:[%s10270_s2 + $0xb58] sm:$0xff] }
 0x2e6   : > { %v1686_v31 = vpack.c.bf16 %v1417_v21, %v1416_v20  ;;  %v1205_v20 = vld [vmem:[%s10270_s2 + $0x4b8] sm:$0xff]  ;;  %v1431_v21 = vld [vmem:[%s10270_s2 + $0xbc8] sm:$0xff] }
 0x2e7   : > { %v6653_v32 = vpop.f32.mrb[72].mxu1  ;;  %v6429_v33 = vpop.f32.mrb[76].mxu0 }
 0x2e8   : > { %5245 = vst.msk [vmem:[%s8551_s25 + $0x790] sm:$0xff] %vm5002_vm3, %v6653_v32  ;;  %v4156_v34 = vpop.f32.mrb[73].mxu1  ;;  %5021 = vst.msk [vmem:[%s8551_s25 + $0x90] sm:$0xff] %vm5002_vm3, %v6429_v33  ;;  %v3260_v36 = vpop.f32.mrb[77].mxu0  ;;  %v1574_v33 = vpack.c.bf16 %v1193_v24, %v1192_v23  ;;  %v1207_v23 = vld [vmem:[%s10270_s2 + $0x4c8] sm:$0xff] }
 0x2e9   : > { %5243 = vst.msk [vmem:[%s8551_s25 + $0x780] sm:$0xff] %vm5002_vm3, %v4156_v34  ;;  %v6654_v38 = vpop.f32.mrb[74].mxu1  ;;  %5019 = vst.msk [vmem:[%s8551_s25 + $0x80] sm:$0xff] %vm5002_vm3, %v3260_v36  ;;  %v6430_v39 = vpop.f32.mrb[78].mxu0  ;;  %v1687_v36 = vpack.c.bf16 %v1419_v25, %v1418_v22  ;;  %v1206_v22 = vld [vmem:[%s10270_s2 + $0x4c0] sm:$0xff] }
 0x2ea   : > { %5246 = vst.msk [vmem:[%s8551_s25 + $0x798] sm:$0xff] %vm5002_vm3, %v6654_v38  ;;  %v4159_v42 = vpop.f32.mrb[75].mxu1  ;;  %5022 = vst.msk [vmem:[%s8551_s25 + $0x98] sm:$0xff] %vm5002_vm3, %v6430_v39  ;;  %v3263_v43 = vpop.f32.mrb[79].mxu0 }
 0x2eb   : > { %5244 = vst.msk [vmem:[%s8551_s25 + $0x788] sm:$0xff] %vm5002_vm3, %v4159_v42  ;;  %5020 = vst.msk [vmem:[%s8551_s25 + $0x88] sm:$0xff] %vm5002_vm3, %v3263_v43  ;;  %v1422_v42 = vld [vmem:[%s10270_s2 + $0xb80] sm:$0xff]  ;;  %v1196_v43 = vld [vmem:[%s10270_s2 + $0x470] sm:$0xff] }
 0x2ec   : > { %6760 = vmatmul.mubr.msk.bf16.gmra.mrb[180].mxu1 %vm2483_vm2, %v1680_v35  ;;  %6536 = vmatmul.mubr.msk.bf16.gmra.mrb[184].mxu0 %vm2483_vm2, %v1568_v37  ;;  %v1575_v37 = vpack.c.bf16 %v1195_v27, %v1194_v26 }
 0x2ed   : > { %6763 = vmatprep.mubr.msk.bf16.mxu1 %vm2483_vm2, %v1681_v40  ;;  %6539 = vmatprep.mubr.msk.bf16.mxu0 %vm2483_vm2, %v1569_v41  ;;  %v1420_v40 = vld [vmem:[%s10270_s2 + $0xb70] sm:$0xff]  ;;  %v1421_v41 = vld [vmem:[%s10270_s2 + $0xb78] sm:$0xff] }
 0x2ee   : > { %v1688_v51 = vpack.c.bf16 %v1421_v41, %v1420_v40  ;;  %v1209_v40 = vld [vmem:[%s10270_s2 + $0x4d8] sm:$0xff]  ;;  %v1435_v41 = vld [vmem:[%s10270_s2 + $0xbe8] sm:$0xff] }
 0x2ef   : > { %v6657_v52 = vpop.f32.mrb[76].mxu1  ;;  %v6433_v53 = vpop.f32.mrb[80].mxu0 }
 0x2f0   : > { %5249 = vst.msk [vmem:[%s8551_s25 + $0x7b0] sm:$0xff] %vm5002_vm3, %v6657_v52  ;;  %v4172_v54 = vpop.f32.mrb[77].mxu1  ;;  %5025 = vst.msk [vmem:[%s8551_s25 + $0xb0] sm:$0xff] %vm5002_vm3, %v6433_v53  ;;  %v3276_v56 = vpop.f32.mrb[81].mxu0  ;;  %v1576_v53 = vpack.c.bf16 %v1197_v44, %v1196_v43  ;;  %v1211_v43 = vld [vmem:[%s10270_s2 + $0x4e8] sm:$0xff] }
 0x2f1   : > { %5247 = vst.msk [vmem:[%s8551_s25 + $0x7a0] sm:$0xff] %vm5002_vm3, %v4172_v54  ;;  %v6658_v58 = vpop.f32.mrb[78].mxu1  ;;  %5023 = vst.msk [vmem:[%s8551_s25 + $0xa0] sm:$0xff] %vm5002_vm3, %v3276_v56  ;;  %v6434_v59 = vpop.f32.mrb[82].mxu0  ;;  %v1689_v56 = vpack.c.bf16 %v1423_v45, %v1422_v42  ;;  %v1210_v42 = vld [vmem:[%s10270_s2 + $0x4e0] sm:$0xff] }
 0x2f2   : > { %5250 = vst.msk [vmem:[%s8551_s25 + $0x7b8] sm:$0xff] %vm5002_vm3, %v6658_v58  ;;  %v4175_v62 = vpop.f32.mrb[79].mxu1  ;;  %5026 = vst.msk [vmem:[%s8551_s25 + $0xb8] sm:$0xff] %vm5002_vm3, %v6434_v59  ;;  %v3279_v63 = vpop.f32.mrb[83].mxu0 }
 0x2f3   : > { %5248 = vst.msk [vmem:[%s8551_s25 + $0x7a8] sm:$0xff] %vm5002_vm3, %v4175_v62  ;;  %5024 = vst.msk [vmem:[%s8551_s25 + $0xa8] sm:$0xff] %vm5002_vm3, %v3279_v63  ;;  %v1426_v62 = vld [vmem:[%s10270_s2 + $0xba0] sm:$0xff]  ;;  %v1200_v63 = vld [vmem:[%s10270_s2 + $0x490] sm:$0xff] }
 0x2f4   : > { %6764 = vmatmul.mubr.msk.bf16.gmra.mrb[184].mxu1 %vm2483_vm2, %v1682_v55  ;;  %6540 = vmatmul.mubr.msk.bf16.gmra.mrb[188].mxu0 %vm2483_vm2, %v1570_v57  ;;  %v1577_v57 = vpack.c.bf16 %v1199_v47, %v1198_v46 }
 0x2f5   : > { %6767 = vmatprep.mubr.msk.bf16.mxu1 %vm2483_vm2, %v1683_v60  ;;  %6543 = vmatprep.mubr.msk.bf16.mxu0 %vm2483_vm2, %v1571_v61  ;;  %v1424_v60 = vld [vmem:[%s10270_s2 + $0xb90] sm:$0xff]  ;;  %v1425_v61 = vld [vmem:[%s10270_s2 + $0xb98] sm:$0xff] }
 0x2f6   : > { %v1690_v7 = vpack.c.bf16 %v1425_v61, %v1424_v60  ;;  %v1213_v60 = vld [vmem:[%s10270_s2 + $0x4f8] sm:$0xff]  ;;  %v1439_v61 = vld [vmem:[%s10270_s2 + $0xc08] sm:$0xff] }
 0x2f7   : > { %v6661_v8 = vpop.f32.mrb[80].mxu1  ;;  %v6437_v9 = vpop.f32.mrb[84].mxu0 }
 0x2f8   : > { %5253 = vst.msk [vmem:[%s8551_s25 + $0x7d0] sm:$0xff] %vm5002_vm3, %v6661_v8  ;;  %v4188_v10 = vpop.f32.mrb[81].mxu1  ;;  %5029 = vst.msk [vmem:[%s8551_s25 + $0xd0] sm:$0xff] %vm5002_vm3, %v6437_v9  ;;  %v3292_v12 = vpop.f32.mrb[85].mxu0  ;;  %v1578_v9 = vpack.c.bf16 %v1201_v0, %v1200_v63  ;;  %v1215_v63 = vld [vmem:[%s10270_s2 + $0x508] sm:$0xff] }
 0x2f9   : > { %5251 = vst.msk [vmem:[%s8551_s25 + $0x7c0] sm:$0xff] %vm5002_vm3, %v4188_v10  ;;  %v6662_v14 = vpop.f32.mrb[82].mxu1  ;;  %5027 = vst.msk [vmem:[%s8551_s25 + $0xc0] sm:$0xff] %vm5002_vm3, %v3292_v12  ;;  %v6438_v15 = vpop.f32.mrb[86].mxu0  ;;  %v1691_v12 = vpack.c.bf16 %v1427_v1, %v1426_v62  ;;  %v1214_v62 = vld [vmem:[%s10270_s2 + $0x500] sm:$0xff] }
 0x2fa   : > { %5254 = vst.msk [vmem:[%s8551_s25 + $0x7d8] sm:$0xff] %vm5002_vm3, %v6662_v14  ;;  %v4191_v18 = vpop.f32.mrb[83].mxu1  ;;  %5030 = vst.msk [vmem:[%s8551_s25 + $0xd8] sm:$0xff] %vm5002_vm3, %v6438_v15  ;;  %v3295_v19 = vpop.f32.mrb[87].mxu0 }
 0x2fb   : > { %5252 = vst.msk [vmem:[%s8551_s25 + $0x7c8] sm:$0xff] %vm5002_vm3, %v4191_v18  ;;  %5028 = vst.msk [vmem:[%s8551_s25 + $0xc8] sm:$0xff] %vm5002_vm3, %v3295_v19  ;;  %v1430_v18 = vld [vmem:[%s10270_s2 + $0xbc0] sm:$0xff]  ;;  %v1204_v19 = vld [vmem:[%s10270_s2 + $0x4b0] sm:$0xff] }
 0x2fc   : > { %6768 = vmatmul.mubr.msk.bf16.gmra.mrb[188].mxu1 %vm2483_vm2, %v1684_v11  ;;  %6544 = vmatmul.mubr.msk.bf16.gmra.mrb[192].mxu0 %vm2483_vm2, %v1572_v13  ;;  %v1579_v13 = vpack.c.bf16 %v1203_v3, %v1202_v2 }
 0x2fd   : > { %6771 = vmatprep.mubr.msk.bf16.mxu1 %vm2483_vm2, %v1685_v16  ;;  %6547 = vmatprep.mubr.msk.bf16.mxu0 %vm2483_vm2, %v1573_v17  ;;  %v1428_v16 = vld [vmem:[%s10270_s2 + $0xbb0] sm:$0xff]  ;;  %v1429_v17 = vld [vmem:[%s10270_s2 + $0xbb8] sm:$0xff] }
 0x2fe   : > { %v1692_v27 = vpack.c.bf16 %v1429_v17, %v1428_v16  ;;  %v1217_v16 = vld [vmem:[%s10270_s2 + $0x518] sm:$0xff]  ;;  %v1443_v17 = vld [vmem:[%s10270_s2 + $0xc28] sm:$0xff] }
 0x2ff   : > { %v6665_v28 = vpop.f32.mrb[84].mxu1  ;;  %v6441_v29 = vpop.f32.mrb[88].mxu0 }
 0x300   : > { %5257 = vst.msk [vmem:[%s8551_s25 + $0x7f0] sm:$0xff] %vm5002_vm3, %v6665_v28  ;;  %v4204_v30 = vpop.f32.mrb[85].mxu1  ;;  %5033 = vst.msk [vmem:[%s8551_s25 + $0xf0] sm:$0xff] %vm5002_vm3, %v6441_v29  ;;  %v3308_v32 = vpop.f32.mrb[89].mxu0  ;;  %v1580_v29 = vpack.c.bf16 %v1205_v20, %v1204_v19  ;;  %v1219_v19 = vld [vmem:[%s10270_s2 + $0x528] sm:$0xff] }
 0x301   : > { %5255 = vst.msk [vmem:[%s8551_s25 + $0x7e0] sm:$0xff] %vm5002_vm3, %v4204_v30  ;;  %v6666_v34 = vpop.f32.mrb[86].mxu1  ;;  %5031 = vst.msk [vmem:[%s8551_s25 + $0xe0] sm:$0xff] %vm5002_vm3, %v3308_v32  ;;  %v6442_v35 = vpop.f32.mrb[90].mxu0  ;;  %v1693_v32 = vpack.c.bf16 %v1431_v21, %v1430_v18  ;;  %v1218_v18 = vld [vmem:[%s10270_s2 + $0x520] sm:$0xff] }
 0x302   : > { %5258 = vst.msk [vmem:[%s8551_s25 + $0x7f8] sm:$0xff] %vm5002_vm3, %v6666_v34  ;;  %v4207_v38 = vpop.f32.mrb[87].mxu1  ;;  %5034 = vst.msk [vmem:[%s8551_s25 + $0xf8] sm:$0xff] %vm5002_vm3, %v6442_v35  ;;  %v3311_v39 = vpop.f32.mrb[91].mxu0 }
 0x303   : > { %5256 = vst.msk [vmem:[%s8551_s25 + $0x7e8] sm:$0xff] %vm5002_vm3, %v4207_v38  ;;  %5032 = vst.msk [vmem:[%s8551_s25 + $0xe8] sm:$0xff] %vm5002_vm3, %v3311_v39  ;;  %v1434_v38 = vld [vmem:[%s10270_s2 + $0xbe0] sm:$0xff]  ;;  %v1208_v39 = vld [vmem:[%s10270_s2 + $0x4d0] sm:$0xff] }
 0x304   : > { %6772 = vmatmul.mubr.msk.bf16.gmra.mrb[192].mxu1 %vm2483_vm2, %v1686_v31  ;;  %6548 = vmatmul.mubr.msk.bf16.gmra.mrb[196].mxu0 %vm2483_vm2, %v1574_v33  ;;  %v1581_v33 = vpack.c.bf16 %v1207_v23, %v1206_v22 }
 0x305   : > { %6775 = vmatprep.mubr.msk.bf16.mxu1 %vm2483_vm2, %v1687_v36  ;;  %6551 = vmatprep.mubr.msk.bf16.mxu0 %vm2483_vm2, %v1575_v37  ;;  %v1432_v36 = vld [vmem:[%s10270_s2 + $0xbd0] sm:$0xff]  ;;  %v1433_v37 = vld [vmem:[%s10270_s2 + $0xbd8] sm:$0xff] }
 0x306   : > { %v1694_v47 = vpack.c.bf16 %v1433_v37, %v1432_v36  ;;  %v1221_v36 = vld [vmem:[%s10270_s2 + $0x538] sm:$0xff]  ;;  %v1447_v37 = vld [vmem:[%s10270_s2 + $0xc48] sm:$0xff] }
 0x307   : > { %v6669_v48 = vpop.f32.mrb[88].mxu1  ;;  %v6445_v49 = vpop.f32.mrb[92].mxu0 }
 0x308   : > { %5261 = vst.msk [vmem:[%s8551_s25 + $0x810] sm:$0xff] %vm5002_vm3, %v6669_v48  ;;  %v4220_v50 = vpop.f32.mrb[89].mxu1  ;;  %5037 = vst.msk [vmem:[%s8551_s25 + $0x110] sm:$0xff] %vm5002_vm3, %v6445_v49  ;;  %v3324_v52 = vpop.f32.mrb[93].mxu0  ;;  %v1582_v49 = vpack.c.bf16 %v1209_v40, %v1208_v39  ;;  %v1223_v39 = vld [vmem:[%s10270_s2 + $0x548] sm:$0xff] }
 0x309   : > { %5259 = vst.msk [vmem:[%s8551_s25 + $0x800] sm:$0xff] %vm5002_vm3, %v4220_v50  ;;  %v6670_v54 = vpop.f32.mrb[90].mxu1  ;;  %5035 = vst.msk [vmem:[%s8551_s25 + $0x100] sm:$0xff] %vm5002_vm3, %v3324_v52  ;;  %v6446_v55 = vpop.f32.mrb[94].mxu0  ;;  %v1695_v52 = vpack.c.bf16 %v1435_v41, %v1434_v38  ;;  %v1222_v38 = vld [vmem:[%s10270_s2 + $0x540] sm:$0xff] }
 0x30a   : > { %5262 = vst.msk [vmem:[%s8551_s25 + $0x818] sm:$0xff] %vm5002_vm3, %v6670_v54  ;;  %v4223_v58 = vpop.f32.mrb[91].mxu1  ;;  %5038 = vst.msk [vmem:[%s8551_s25 + $0x118] sm:$0xff] %vm5002_vm3, %v6446_v55  ;;  %v3327_v59 = vpop.f32.mrb[95].mxu0 }
 0x30b   : > { %5260 = vst.msk [vmem:[%s8551_s25 + $0x808] sm:$0xff] %vm5002_vm3, %v4223_v58  ;;  %5036 = vst.msk [vmem:[%s8551_s25 + $0x108] sm:$0xff] %vm5002_vm3, %v3327_v59  ;;  %v1438_v58 = vld [vmem:[%s10270_s2 + $0xc00] sm:$0xff]  ;;  %v1212_v59 = vld [vmem:[%s10270_s2 + $0x4f0] sm:$0xff] }
 0x30c   : > { %6776 = vmatmul.mubr.msk.bf16.gmra.mrb[196].mxu1 %vm2483_vm2, %v1688_v51  ;;  %6552 = vmatmul.mubr.msk.bf16.gmra.mrb[200].mxu0 %vm2483_vm2, %v1576_v53  ;;  %v1583_v53 = vpack.c.bf16 %v1211_v43, %v1210_v42 }
 0x30d   : > { %6779 = vmatprep.mubr.msk.bf16.mxu1 %vm2483_vm2, %v1689_v56  ;;  %6555 = vmatprep.mubr.msk.bf16.mxu0 %vm2483_vm2, %v1577_v57  ;;  %v1436_v56 = vld [vmem:[%s10270_s2 + $0xbf0] sm:$0xff]  ;;  %v1437_v57 = vld [vmem:[%s10270_s2 + $0xbf8] sm:$0xff] }
 0x30e   : > { %v1696_v3 = vpack.c.bf16 %v1437_v57, %v1436_v56  ;;  %v1225_v56 = vld [vmem:[%s10270_s2 + $0x558] sm:$0xff]  ;;  %v1451_v57 = vld [vmem:[%s10270_s2 + $0xc68] sm:$0xff] }
 0x30f   : > { %v6673_v4 = vpop.f32.mrb[92].mxu1  ;;  %v6449_v5 = vpop.f32.mrb[96].mxu0 }
 0x310   : > { %5265 = vst.msk [vmem:[%s8551_s25 + $0x830] sm:$0xff] %vm5002_vm3, %v6673_v4  ;;  %v4236_v6 = vpop.f32.mrb[93].mxu1  ;;  %5041 = vst.msk [vmem:[%s8551_s25 + $0x130] sm:$0xff] %vm5002_vm3, %v6449_v5  ;;  %v3340_v8 = vpop.f32.mrb[97].mxu0  ;;  %v1584_v5 = vpack.c.bf16 %v1213_v60, %v1212_v59  ;;  %v1227_v59 = vld [vmem:[%s10270_s2 + $0x568] sm:$0xff] }
 0x311   : > { %5263 = vst.msk [vmem:[%s8551_s25 + $0x820] sm:$0xff] %vm5002_vm3, %v4236_v6  ;;  %v6674_v10 = vpop.f32.mrb[94].mxu1  ;;  %5039 = vst.msk [vmem:[%s8551_s25 + $0x120] sm:$0xff] %vm5002_vm3, %v3340_v8  ;;  %v6450_v11 = vpop.f32.mrb[98].mxu0  ;;  %v1697_v8 = vpack.c.bf16 %v1439_v61, %v1438_v58  ;;  %v1226_v58 = vld [vmem:[%s10270_s2 + $0x560] sm:$0xff] }
 0x312   : > { %5266 = vst.msk [vmem:[%s8551_s25 + $0x838] sm:$0xff] %vm5002_vm3, %v6674_v10  ;;  %v4239_v14 = vpop.f32.mrb[95].mxu1  ;;  %5042 = vst.msk [vmem:[%s8551_s25 + $0x138] sm:$0xff] %vm5002_vm3, %v6450_v11  ;;  %v3343_v15 = vpop.f32.mrb[99].mxu0 }
 0x313   : > { %5264 = vst.msk [vmem:[%s8551_s25 + $0x828] sm:$0xff] %vm5002_vm3, %v4239_v14  ;;  %5040 = vst.msk [vmem:[%s8551_s25 + $0x128] sm:$0xff] %vm5002_vm3, %v3343_v15  ;;  %v1442_v14 = vld [vmem:[%s10270_s2 + $0xc20] sm:$0xff]  ;;  %v1216_v15 = vld [vmem:[%s10270_s2 + $0x510] sm:$0xff] }
 0x314   : > { %6780 = vmatmul.mubr.msk.bf16.gmra.mrb[200].mxu1 %vm2483_vm2, %v1690_v7  ;;  %6556 = vmatmul.mubr.msk.bf16.gmra.mrb[204].mxu0 %vm2483_vm2, %v1578_v9  ;;  %v1585_v9 = vpack.c.bf16 %v1215_v63, %v1214_v62 }
 0x315   : > { %6783 = vmatprep.mubr.msk.bf16.mxu1 %vm2483_vm2, %v1691_v12  ;;  %6559 = vmatprep.mubr.msk.bf16.mxu0 %vm2483_vm2, %v1579_v13  ;;  %v1440_v12 = vld [vmem:[%s10270_s2 + $0xc10] sm:$0xff]  ;;  %v1441_v13 = vld [vmem:[%s10270_s2 + $0xc18] sm:$0xff] }
 0x316   : > { %v1698_v23 = vpack.c.bf16 %v1441_v13, %v1440_v12  ;;  %v1229_v12 = vld [vmem:[%s10270_s2 + $0x578] sm:$0xff]  ;;  %v1455_v13 = vld [vmem:[%s10270_s2 + $0xc88] sm:$0xff] }
 0x317   : > { %v6677_v24 = vpop.f32.mrb[96].mxu1  ;;  %v6453_v25 = vpop.f32.mrb[100].mxu0 }
 0x318   : > { %5269 = vst.msk [vmem:[%s8551_s25 + $0x850] sm:$0xff] %vm5002_vm3, %v6677_v24  ;;  %v4252_v26 = vpop.f32.mrb[97].mxu1  ;;  %5045 = vst.msk [vmem:[%s8551_s25 + $0x150] sm:$0xff] %vm5002_vm3, %v6453_v25  ;;  %v3356_v28 = vpop.f32.mrb[101].mxu0  ;;  %v1586_v25 = vpack.c.bf16 %v1217_v16, %v1216_v15  ;;  %v1231_v15 = vld [vmem:[%s10270_s2 + $0x588] sm:$0xff] }
 0x319   : > { %5267 = vst.msk [vmem:[%s8551_s25 + $0x840] sm:$0xff] %vm5002_vm3, %v4252_v26  ;;  %v6678_v30 = vpop.f32.mrb[98].mxu1  ;;  %5043 = vst.msk [vmem:[%s8551_s25 + $0x140] sm:$0xff] %vm5002_vm3, %v3356_v28  ;;  %v6454_v31 = vpop.f32.mrb[102].mxu0  ;;  %v1699_v28 = vpack.c.bf16 %v1443_v17, %v1442_v14  ;;  %v1230_v14 = vld [vmem:[%s10270_s2 + $0x580] sm:$0xff] }
 0x31a   : > { %5270 = vst.msk [vmem:[%s8551_s25 + $0x858] sm:$0xff] %vm5002_vm3, %v6678_v30  ;;  %v4255_v34 = vpop.f32.mrb[99].mxu1  ;;  %5046 = vst.msk [vmem:[%s8551_s25 + $0x158] sm:$0xff] %vm5002_vm3, %v6454_v31  ;;  %v3359_v35 = vpop.f32.mrb[103].mxu0 }
 0x31b   : > { %5268 = vst.msk [vmem:[%s8551_s25 + $0x848] sm:$0xff] %vm5002_vm3, %v4255_v34  ;;  %5044 = vst.msk [vmem:[%s8551_s25 + $0x148] sm:$0xff] %vm5002_vm3, %v3359_v35  ;;  %v1446_v34 = vld [vmem:[%s10270_s2 + $0xc40] sm:$0xff]  ;;  %v1220_v35 = vld [vmem:[%s10270_s2 + $0x530] sm:$0xff] }
 0x31c   : > { %6784 = vmatmul.mubr.msk.bf16.gmra.mrb[204].mxu1 %vm2483_vm2, %v1692_v27  ;;  %6560 = vmatmul.mubr.msk.bf16.gmra.mrb[208].mxu0 %vm2483_vm2, %v1580_v29  ;;  %v1587_v29 = vpack.c.bf16 %v1219_v19, %v1218_v18 }
 0x31d   : > { %6787 = vmatprep.mubr.msk.bf16.mxu1 %vm2483_vm2, %v1693_v32  ;;  %6563 = vmatprep.mubr.msk.bf16.mxu0 %vm2483_vm2, %v1581_v33  ;;  %v1444_v32 = vld [vmem:[%s10270_s2 + $0xc30] sm:$0xff]  ;;  %v1445_v33 = vld [vmem:[%s10270_s2 + $0xc38] sm:$0xff] }
 0x31e   : > { %v1700_v43 = vpack.c.bf16 %v1445_v33, %v1444_v32  ;;  %v1233_v32 = vld [vmem:[%s10270_s2 + $0x598] sm:$0xff]  ;;  %v1459_v33 = vld [vmem:[%s10270_s2 + $0xca8] sm:$0xff] }
 0x31f   : > { %v6681_v44 = vpop.f32.mrb[100].mxu1  ;;  %v6457_v45 = vpop.f32.mrb[104].mxu0 }
 0x320   : > { %5273 = vst.msk [vmem:[%s8551_s25 + $0x870] sm:$0xff] %vm5002_vm3, %v6681_v44  ;;  %v4268_v46 = vpop.f32.mrb[101].mxu1  ;;  %5049 = vst.msk [vmem:[%s8551_s25 + $0x170] sm:$0xff] %vm5002_vm3, %v6457_v45  ;;  %v3372_v48 = vpop.f32.mrb[105].mxu0  ;;  %v1588_v45 = vpack.c.bf16 %v1221_v36, %v1220_v35  ;;  %v1235_v35 = vld [vmem:[%s10270_s2 + $0x5a8] sm:$0xff] }
 0x321   : > { %5271 = vst.msk [vmem:[%s8551_s25 + $0x860] sm:$0xff] %vm5002_vm3, %v4268_v46  ;;  %v6682_v50 = vpop.f32.mrb[102].mxu1  ;;  %5047 = vst.msk [vmem:[%s8551_s25 + $0x160] sm:$0xff] %vm5002_vm3, %v3372_v48  ;;  %v6458_v51 = vpop.f32.mrb[106].mxu0  ;;  %v1701_v48 = vpack.c.bf16 %v1447_v37, %v1446_v34  ;;  %v1234_v34 = vld [vmem:[%s10270_s2 + $0x5a0] sm:$0xff] }
 0x322   : > { %5274 = vst.msk [vmem:[%s8551_s25 + $0x878] sm:$0xff] %vm5002_vm3, %v6682_v50  ;;  %v4271_v54 = vpop.f32.mrb[103].mxu1  ;;  %5050 = vst.msk [vmem:[%s8551_s25 + $0x178] sm:$0xff] %vm5002_vm3, %v6458_v51  ;;  %v3375_v55 = vpop.f32.mrb[107].mxu0 }
 0x323   : > { %5272 = vst.msk [vmem:[%s8551_s25 + $0x868] sm:$0xff] %vm5002_vm3, %v4271_v54  ;;  %5048 = vst.msk [vmem:[%s8551_s25 + $0x168] sm:$0xff] %vm5002_vm3, %v3375_v55  ;;  %v1450_v54 = vld [vmem:[%s10270_s2 + $0xc60] sm:$0xff]  ;;  %v1224_v55 = vld [vmem:[%s10270_s2 + $0x550] sm:$0xff] }
 0x324   : > { %6788 = vmatmul.mubr.msk.bf16.gmra.mrb[208].mxu1 %vm2483_vm2, %v1694_v47  ;;  %6564 = vmatmul.mubr.msk.bf16.gmra.mrb[212].mxu0 %vm2483_vm2, %v1582_v49  ;;  %v1589_v49 = vpack.c.bf16 %v1223_v39, %v1222_v38 }
 0x325   : > { %6791 = vmatprep.mubr.msk.bf16.mxu1 %vm2483_vm2, %v1695_v52  ;;  %6567 = vmatprep.mubr.msk.bf16.mxu0 %vm2483_vm2, %v1583_v53  ;;  %v1448_v52 = vld [vmem:[%s10270_s2 + $0xc50] sm:$0xff]  ;;  %v1449_v53 = vld [vmem:[%s10270_s2 + $0xc58] sm:$0xff] }
 0x326   : > { %v1702_v63 = vpack.c.bf16 %v1449_v53, %v1448_v52  ;;  %v1237_v52 = vld [vmem:[%s10270_s2 + $0x5b8] sm:$0xff]  ;;  %v1463_v53 = vld [vmem:[%s10270_s2 + $0xcc8] sm:$0xff] }
 0x327   : > { %v6685_v0 = vpop.f32.mrb[104].mxu1  ;;  %v6461_v1 = vpop.f32.mrb[108].mxu0 }
 0x328   : > { %5277 = vst.msk [vmem:[%s8551_s25 + $0x890] sm:$0xff] %vm5002_vm3, %v6685_v0  ;;  %v4284_v2 = vpop.f32.mrb[105].mxu1  ;;  %5053 = vst.msk [vmem:[%s8551_s25 + $0x190] sm:$0xff] %vm5002_vm3, %v6461_v1  ;;  %v3388_v4 = vpop.f32.mrb[109].mxu0  ;;  %v1590_v1 = vpack.c.bf16 %v1225_v56, %v1224_v55  ;;  %v1239_v55 = vld [vmem:[%s10270_s2 + $0x5c8] sm:$0xff] }
 0x329   : > { %5275 = vst.msk [vmem:[%s8551_s25 + $0x880] sm:$0xff] %vm5002_vm3, %v4284_v2  ;;  %v6686_v6 = vpop.f32.mrb[106].mxu1  ;;  %5051 = vst.msk [vmem:[%s8551_s25 + $0x180] sm:$0xff] %vm5002_vm3, %v3388_v4  ;;  %v6462_v7 = vpop.f32.mrb[110].mxu0  ;;  %v1703_v4 = vpack.c.bf16 %v1451_v57, %v1450_v54  ;;  %v1238_v54 = vld [vmem:[%s10270_s2 + $0x5c0] sm:$0xff] }
 0x32a   : > { %5278 = vst.msk [vmem:[%s8551_s25 + $0x898] sm:$0xff] %vm5002_vm3, %v6686_v6  ;;  %v4287_v10 = vpop.f32.mrb[107].mxu1  ;;  %5054 = vst.msk [vmem:[%s8551_s25 + $0x198] sm:$0xff] %vm5002_vm3, %v6462_v7  ;;  %v3391_v11 = vpop.f32.mrb[111].mxu0 }
 0x32b   : > { %5276 = vst.msk [vmem:[%s8551_s25 + $0x888] sm:$0xff] %vm5002_vm3, %v4287_v10  ;;  %5052 = vst.msk [vmem:[%s8551_s25 + $0x188] sm:$0xff] %vm5002_vm3, %v3391_v11  ;;  %v1454_v10 = vld [vmem:[%s10270_s2 + $0xc80] sm:$0xff]  ;;  %v1228_v11 = vld [vmem:[%s10270_s2 + $0x570] sm:$0xff] }
 0x32c   : > { %6792 = vmatmul.mubr.msk.bf16.gmra.mrb[212].mxu1 %vm2483_vm2, %v1696_v3  ;;  %6568 = vmatmul.mubr.msk.bf16.gmra.mrb[216].mxu0 %vm2483_vm2, %v1584_v5  ;;  %v1591_v5 = vpack.c.bf16 %v1227_v59, %v1226_v58 }
 0x32d   : > { %6795 = vmatprep.mubr.msk.bf16.mxu1 %vm2483_vm2, %v1697_v8  ;;  %6571 = vmatprep.mubr.msk.bf16.mxu0 %vm2483_vm2, %v1585_v9  ;;  %v1452_v8 = vld [vmem:[%s10270_s2 + $0xc70] sm:$0xff]  ;;  %v1453_v9 = vld [vmem:[%s10270_s2 + $0xc78] sm:$0xff] }
 0x32e   : > { %v1704_v19 = vpack.c.bf16 %v1453_v9, %v1452_v8  ;;  %v1241_v8 = vld [vmem:[%s10270_s2 + $0x5d8] sm:$0xff]  ;;  %v1467_v9 = vld [vmem:[%s10270_s2 + $0xce8] sm:$0xff] }
 0x32f   : > { %v6689_v20 = vpop.f32.mrb[108].mxu1  ;;  %v6465_v21 = vpop.f32.mrb[112].mxu0 }
 0x330   : > { %5281 = vst.msk [vmem:[%s8551_s25 + $0x8b0] sm:$0xff] %vm5002_vm3, %v6689_v20  ;;  %v4300_v22 = vpop.f32.mrb[109].mxu1  ;;  %5057 = vst.msk [vmem:[%s8551_s25 + $0x1b0] sm:$0xff] %vm5002_vm3, %v6465_v21  ;;  %v3404_v24 = vpop.f32.mrb[113].mxu0  ;;  %v1592_v21 = vpack.c.bf16 %v1229_v12, %v1228_v11  ;;  %v1243_v11 = vld [vmem:[%s10270_s2 + $0x5e8] sm:$0xff] }
 0x331   : > { %5279 = vst.msk [vmem:[%s8551_s25 + $0x8a0] sm:$0xff] %vm5002_vm3, %v4300_v22  ;;  %v6690_v26 = vpop.f32.mrb[110].mxu1  ;;  %5055 = vst.msk [vmem:[%s8551_s25 + $0x1a0] sm:$0xff] %vm5002_vm3, %v3404_v24  ;;  %v6466_v27 = vpop.f32.mrb[114].mxu0  ;;  %v1705_v24 = vpack.c.bf16 %v1455_v13, %v1454_v10  ;;  %v1242_v10 = vld [vmem:[%s10270_s2 + $0x5e0] sm:$0xff] }
 0x332   : > { %5282 = vst.msk [vmem:[%s8551_s25 + $0x8b8] sm:$0xff] %vm5002_vm3, %v6690_v26  ;;  %v4303_v30 = vpop.f32.mrb[111].mxu1  ;;  %5058 = vst.msk [vmem:[%s8551_s25 + $0x1b8] sm:$0xff] %vm5002_vm3, %v6466_v27  ;;  %v3407_v31 = vpop.f32.mrb[115].mxu0 }
 0x333   : > { %5280 = vst.msk [vmem:[%s8551_s25 + $0x8a8] sm:$0xff] %vm5002_vm3, %v4303_v30  ;;  %5056 = vst.msk [vmem:[%s8551_s25 + $0x1a8] sm:$0xff] %vm5002_vm3, %v3407_v31  ;;  %v1458_v30 = vld [vmem:[%s10270_s2 + $0xca0] sm:$0xff]  ;;  %v1232_v31 = vld [vmem:[%s10270_s2 + $0x590] sm:$0xff] }
 0x334   : > { %6796 = vmatmul.mubr.msk.bf16.gmra.mrb[216].mxu1 %vm2483_vm2, %v1698_v23  ;;  %6572 = vmatmul.mubr.msk.bf16.gmra.mrb[220].mxu0 %vm2483_vm2, %v1586_v25  ;;  %v1593_v25 = vpack.c.bf16 %v1231_v15, %v1230_v14 }
 0x335   : > { %6799 = vmatprep.mubr.msk.bf16.mxu1 %vm2483_vm2, %v1699_v28  ;;  %6575 = vmatprep.mubr.msk.bf16.mxu0 %vm2483_vm2, %v1587_v29  ;;  %v1456_v28 = vld [vmem:[%s10270_s2 + $0xc90] sm:$0xff]  ;;  %v1457_v29 = vld [vmem:[%s10270_s2 + $0xc98] sm:$0xff] }
 0x336   : > { %v1706_v39 = vpack.c.bf16 %v1457_v29, %v1456_v28  ;;  %v1245_v28 = vld [vmem:[%s10270_s2 + $0x5f8] sm:$0xff]  ;;  %v1471_v29 = vld [vmem:[%s10270_s2 + $0xd08] sm:$0xff] }
 0x337   : > { %v6693_v40 = vpop.f32.mrb[112].mxu1  ;;  %v6469_v41 = vpop.f32.mrb[116].mxu0 }
 0x338   : > { %5285 = vst.msk [vmem:[%s8551_s25 + $0x8d0] sm:$0xff] %vm5002_vm3, %v6693_v40  ;;  %v4316_v42 = vpop.f32.mrb[113].mxu1  ;;  %5061 = vst.msk [vmem:[%s8551_s25 + $0x1d0] sm:$0xff] %vm5002_vm3, %v6469_v41  ;;  %v3420_v44 = vpop.f32.mrb[117].mxu0  ;;  %v1594_v41 = vpack.c.bf16 %v1233_v32, %v1232_v31  ;;  %v1247_v31 = vld [vmem:[%s10270_s2 + $0x608] sm:$0xff] }
 0x339   : > { %5283 = vst.msk [vmem:[%s8551_s25 + $0x8c0] sm:$0xff] %vm5002_vm3, %v4316_v42  ;;  %v6694_v46 = vpop.f32.mrb[114].mxu1  ;;  %5059 = vst.msk [vmem:[%s8551_s25 + $0x1c0] sm:$0xff] %vm5002_vm3, %v3420_v44  ;;  %v6470_v47 = vpop.f32.mrb[118].mxu0  ;;  %v1707_v44 = vpack.c.bf16 %v1459_v33, %v1458_v30  ;;  %v1246_v30 = vld [vmem:[%s10270_s2 + $0x600] sm:$0xff] }
 0x33a   : > { %5286 = vst.msk [vmem:[%s8551_s25 + $0x8d8] sm:$0xff] %vm5002_vm3, %v6694_v46  ;;  %v4319_v50 = vpop.f32.mrb[115].mxu1  ;;  %5062 = vst.msk [vmem:[%s8551_s25 + $0x1d8] sm:$0xff] %vm5002_vm3, %v6470_v47  ;;  %v3423_v51 = vpop.f32.mrb[119].mxu0 }
 0x33b   : > { %5284 = vst.msk [vmem:[%s8551_s25 + $0x8c8] sm:$0xff] %vm5002_vm3, %v4319_v50  ;;  %5060 = vst.msk [vmem:[%s8551_s25 + $0x1c8] sm:$0xff] %vm5002_vm3, %v3423_v51  ;;  %v1462_v50 = vld [vmem:[%s10270_s2 + $0xcc0] sm:$0xff]  ;;  %v1236_v51 = vld [vmem:[%s10270_s2 + $0x5b0] sm:$0xff] }
 0x33c   : > { %6800 = vmatmul.mubr.msk.bf16.gmra.mrb[220].mxu1 %vm2483_vm2, %v1700_v43  ;;  %6576 = vmatmul.mubr.msk.bf16.gmra.mrb[224].mxu0 %vm2483_vm2, %v1588_v45  ;;  %v1595_v45 = vpack.c.bf16 %v1235_v35, %v1234_v34 }
 0x33d   : > { %6803 = vmatprep.mubr.msk.bf16.mxu1 %vm2483_vm2, %v1701_v48  ;;  %6579 = vmatprep.mubr.msk.bf16.mxu0 %vm2483_vm2, %v1589_v49  ;;  %v1460_v48 = vld [vmem:[%s10270_s2 + $0xcb0] sm:$0xff]  ;;  %v1461_v49 = vld [vmem:[%s10270_s2 + $0xcb8] sm:$0xff] }
 0x33e   : > { %v1708_v59 = vpack.c.bf16 %v1461_v49, %v1460_v48  ;;  %v1249_v48 = vld [vmem:[%s10270_s2 + $0x618] sm:$0xff]  ;;  %v1475_v49 = vld [vmem:[%s10270_s2 + $0xd28] sm:$0xff] }
 0x33f   : > { %v6697_v60 = vpop.f32.mrb[116].mxu1  ;;  %v6473_v61 = vpop.f32.mrb[120].mxu0 }
 0x340   : > { %5289 = vst.msk [vmem:[%s8551_s25 + $0x8f0] sm:$0xff] %vm5002_vm3, %v6697_v60  ;;  %v4332_v62 = vpop.f32.mrb[117].mxu1  ;;  %5065 = vst.msk [vmem:[%s8551_s25 + $0x1f0] sm:$0xff] %vm5002_vm3, %v6473_v61  ;;  %v3436_v0 = vpop.f32.mrb[121].mxu0  ;;  %v1596_v61 = vpack.c.bf16 %v1237_v52, %v1236_v51  ;;  %v1251_v51 = vld [vmem:[%s10270_s2 + $0x628] sm:$0xff] }
 0x341   : > { %5287 = vst.msk [vmem:[%s8551_s25 + $0x8e0] sm:$0xff] %vm5002_vm3, %v4332_v62  ;;  %v6698_v2 = vpop.f32.mrb[118].mxu1  ;;  %5063 = vst.msk [vmem:[%s8551_s25 + $0x1e0] sm:$0xff] %vm5002_vm3, %v3436_v0  ;;  %v6474_v3 = vpop.f32.mrb[122].mxu0  ;;  %v1709_v0 = vpack.c.bf16 %v1463_v53, %v1462_v50  ;;  %v1250_v50 = vld [vmem:[%s10270_s2 + $0x620] sm:$0xff] }
 0x342   : > { %5290 = vst.msk [vmem:[%s8551_s25 + $0x8f8] sm:$0xff] %vm5002_vm3, %v6698_v2  ;;  %v4335_v6 = vpop.f32.mrb[119].mxu1  ;;  %5066 = vst.msk [vmem:[%s8551_s25 + $0x1f8] sm:$0xff] %vm5002_vm3, %v6474_v3  ;;  %v3439_v7 = vpop.f32.mrb[123].mxu0 }
 0x343   : > { %5288 = vst.msk [vmem:[%s8551_s25 + $0x8e8] sm:$0xff] %vm5002_vm3, %v4335_v6  ;;  %5064 = vst.msk [vmem:[%s8551_s25 + $0x1e8] sm:$0xff] %vm5002_vm3, %v3439_v7  ;;  %v1466_v6 = vld [vmem:[%s10270_s2 + $0xce0] sm:$0xff]  ;;  %v1240_v7 = vld [vmem:[%s10270_s2 + $0x5d0] sm:$0xff] }
 0x344   : > { %6804 = vmatmul.mubr.msk.bf16.gmra.mrb[224].mxu1 %vm2483_vm2, %v1702_v63  ;;  %6580 = vmatmul.mubr.msk.bf16.gmra.mrb[228].mxu0 %vm2483_vm2, %v1590_v1  ;;  %v1597_v1 = vpack.c.bf16 %v1239_v55, %v1238_v54 }
 0x345   : > { %6807 = vmatprep.mubr.msk.bf16.mxu1 %vm2483_vm2, %v1703_v4  ;;  %6583 = vmatprep.mubr.msk.bf16.mxu0 %vm2483_vm2, %v1591_v5  ;;  %v1464_v4 = vld [vmem:[%s10270_s2 + $0xcd0] sm:$0xff]  ;;  %v1465_v5 = vld [vmem:[%s10270_s2 + $0xcd8] sm:$0xff] }
 0x346   : > { %v1710_v15 = vpack.c.bf16 %v1465_v5, %v1464_v4  ;;  %v1253_v4 = vld [vmem:[%s10270_s2 + $0x638] sm:$0xff]  ;;  %v1479_v5 = vld [vmem:[%s10270_s2 + $0xd48] sm:$0xff] }
 0x347   : > { %v6701_v16 = vpop.f32.mrb[120].mxu1  ;;  %v6477_v17 = vpop.f32.mrb[124].mxu0 }
 0x348   : > { %5293 = vst.msk [vmem:[%s8551_s25 + $0x910] sm:$0xff] %vm5002_vm3, %v6701_v16  ;;  %v4348_v18 = vpop.f32.mrb[121].mxu1  ;;  %5069 = vst.msk [vmem:[%s8551_s25 + $0x210] sm:$0xff] %vm5002_vm3, %v6477_v17  ;;  %v3452_v20 = vpop.f32.mrb[125].mxu0  ;;  %v1598_v17 = vpack.c.bf16 %v1241_v8, %v1240_v7  ;;  %v1255_v7 = vld [vmem:[%s10270_s2 + $0x648] sm:$0xff] }
 0x349   : > { %5291 = vst.msk [vmem:[%s8551_s25 + $0x900] sm:$0xff] %vm5002_vm3, %v4348_v18  ;;  %v6702_v22 = vpop.f32.mrb[122].mxu1  ;;  %5067 = vst.msk [vmem:[%s8551_s25 + $0x200] sm:$0xff] %vm5002_vm3, %v3452_v20  ;;  %v6478_v23 = vpop.f32.mrb[126].mxu0  ;;  %v1711_v20 = vpack.c.bf16 %v1467_v9, %v1466_v6  ;;  %v1254_v6 = vld [vmem:[%s10270_s2 + $0x640] sm:$0xff] }
 0x34a   : > { %5294 = vst.msk [vmem:[%s8551_s25 + $0x918] sm:$0xff] %vm5002_vm3, %v6702_v22  ;;  %v4351_v26 = vpop.f32.mrb[123].mxu1  ;;  %5070 = vst.msk [vmem:[%s8551_s25 + $0x218] sm:$0xff] %vm5002_vm3, %v6478_v23  ;;  %v3455_v27 = vpop.f32.mrb[127].mxu0 }
 0x34b   : > { %5292 = vst.msk [vmem:[%s8551_s25 + $0x908] sm:$0xff] %vm5002_vm3, %v4351_v26  ;;  %5068 = vst.msk [vmem:[%s8551_s25 + $0x208] sm:$0xff] %vm5002_vm3, %v3455_v27  ;;  %v1470_v26 = vld [vmem:[%s10270_s2 + $0xd00] sm:$0xff]  ;;  %v1244_v27 = vld [vmem:[%s10270_s2 + $0x5f0] sm:$0xff] }
 0x34c   : > { %6808 = vmatmul.mubr.msk.bf16.gmra.mrb[228].mxu1 %vm2483_vm2, %v1704_v19  ;;  %6584 = vmatmul.mubr.msk.bf16.gmra.mrb[232].mxu0 %vm2483_vm2, %v1592_v21  ;;  %v1599_v21 = vpack.c.bf16 %v1243_v11, %v1242_v10 }
 0x34d   : > { %6811 = vmatprep.mubr.msk.bf16.mxu1 %vm2483_vm2, %v1705_v24  ;;  %6587 = vmatprep.mubr.msk.bf16.mxu0 %vm2483_vm2, %v1593_v25  ;;  %v1468_v24 = vld [vmem:[%s10270_s2 + $0xcf0] sm:$0xff]  ;;  %v1469_v25 = vld [vmem:[%s10270_s2 + $0xcf8] sm:$0xff] }
 0x34e   : > { %v1712_v35 = vpack.c.bf16 %v1469_v25, %v1468_v24  ;;  %v1257_v24 = vld [vmem:[%s10270_s2 + $0x658] sm:$0xff]  ;;  %v1483_v25 = vld [vmem:[%s10270_s2 + $0xd68] sm:$0xff] }
 0x34f   : > { %v6705_v36 = vpop.f32.mrb[124].mxu1  ;;  %v6481_v37 = vpop.f32.mrb[128].mxu0 }
 0x350   : > { %5297 = vst.msk [vmem:[%s8551_s25 + $0x930] sm:$0xff] %vm5002_vm3, %v6705_v36  ;;  %v4364_v38 = vpop.f32.mrb[125].mxu1  ;;  %5073 = vst.msk [vmem:[%s8551_s25 + $0x230] sm:$0xff] %vm5002_vm3, %v6481_v37  ;;  %v3468_v40 = vpop.f32.mrb[129].mxu0  ;;  %v1600_v37 = vpack.c.bf16 %v1245_v28, %v1244_v27  ;;  %v1259_v27 = vld [vmem:[%s10270_s2 + $0x668] sm:$0xff] }
 0x351   : > { %5295 = vst.msk [vmem:[%s8551_s25 + $0x920] sm:$0xff] %vm5002_vm3, %v4364_v38  ;;  %v6706_v42 = vpop.f32.mrb[126].mxu1  ;;  %5071 = vst.msk [vmem:[%s8551_s25 + $0x220] sm:$0xff] %vm5002_vm3, %v3468_v40  ;;  %v6482_v43 = vpop.f32.mrb[130].mxu0  ;;  %v1713_v40 = vpack.c.bf16 %v1471_v29, %v1470_v26  ;;  %v1258_v26 = vld [vmem:[%s10270_s2 + $0x660] sm:$0xff] }
 0x352   : > { %5298 = vst.msk [vmem:[%s8551_s25 + $0x938] sm:$0xff] %vm5002_vm3, %v6706_v42  ;;  %v4367_v46 = vpop.f32.mrb[127].mxu1  ;;  %5074 = vst.msk [vmem:[%s8551_s25 + $0x238] sm:$0xff] %vm5002_vm3, %v6482_v43  ;;  %v3471_v47 = vpop.f32.mrb[131].mxu0 }
 0x353   : > { %5296 = vst.msk [vmem:[%s8551_s25 + $0x928] sm:$0xff] %vm5002_vm3, %v4367_v46  ;;  %5072 = vst.msk [vmem:[%s8551_s25 + $0x228] sm:$0xff] %vm5002_vm3, %v3471_v47  ;;  %v1474_v46 = vld [vmem:[%s10270_s2 + $0xd20] sm:$0xff]  ;;  %v1248_v47 = vld [vmem:[%s10270_s2 + $0x610] sm:$0xff] }
 0x354   : > { %6812 = vmatmul.mubr.msk.bf16.gmra.mrb[232].mxu1 %vm2483_vm2, %v1706_v39  ;;  %6588 = vmatmul.mubr.msk.bf16.gmra.mrb[236].mxu0 %vm2483_vm2, %v1594_v41  ;;  %v1601_v41 = vpack.c.bf16 %v1247_v31, %v1246_v30 }
 0x355   : > { %6815 = vmatprep.mubr.msk.bf16.mxu1 %vm2483_vm2, %v1707_v44  ;;  %6591 = vmatprep.mubr.msk.bf16.mxu0 %vm2483_vm2, %v1595_v45  ;;  %v1472_v44 = vld [vmem:[%s10270_s2 + $0xd10] sm:$0xff]  ;;  %v1473_v45 = vld [vmem:[%s10270_s2 + $0xd18] sm:$0xff] }
 0x356   : > { %v1714_v55 = vpack.c.bf16 %v1473_v45, %v1472_v44  ;;  %v1261_v44 = vld [vmem:[%s10270_s2 + $0x678] sm:$0xff]  ;;  %v1487_v45 = vld [vmem:[%s10270_s2 + $0xd88] sm:$0xff] }
 0x357   : > { %v6709_v56 = vpop.f32.mrb[128].mxu1  ;;  %v6485_v57 = vpop.f32.mrb[132].mxu0 }
 0x358   : > { %5301 = vst.msk [vmem:[%s8551_s25 + $0x950] sm:$0xff] %vm5002_vm3, %v6709_v56  ;;  %v4380_v58 = vpop.f32.mrb[129].mxu1  ;;  %5077 = vst.msk [vmem:[%s8551_s25 + $0x250] sm:$0xff] %vm5002_vm3, %v6485_v57  ;;  %v3484_v60 = vpop.f32.mrb[133].mxu0  ;;  %v1602_v57 = vpack.c.bf16 %v1249_v48, %v1248_v47  ;;  %v1263_v47 = vld [vmem:[%s10270_s2 + $0x688] sm:$0xff] }
 0x359   : > { %5299 = vst.msk [vmem:[%s8551_s25 + $0x940] sm:$0xff] %vm5002_vm3, %v4380_v58  ;;  %v6710_v62 = vpop.f32.mrb[130].mxu1  ;;  %5075 = vst.msk [vmem:[%s8551_s25 + $0x240] sm:$0xff] %vm5002_vm3, %v3484_v60  ;;  %v6486_v63 = vpop.f32.mrb[134].mxu0  ;;  %v1715_v60 = vpack.c.bf16 %v1475_v49, %v1474_v46  ;;  %v1262_v46 = vld [vmem:[%s10270_s2 + $0x680] sm:$0xff] }
 0x35a   : > { %5302 = vst.msk [vmem:[%s8551_s25 + $0x958] sm:$0xff] %vm5002_vm3, %v6710_v62  ;;  %v4383_v2 = vpop.f32.mrb[131].mxu1  ;;  %5078 = vst.msk [vmem:[%s8551_s25 + $0x258] sm:$0xff] %vm5002_vm3, %v6486_v63  ;;  %v3487_v3 = vpop.f32.mrb[135].mxu0 }
 0x35b   : > { %5300 = vst.msk [vmem:[%s8551_s25 + $0x948] sm:$0xff] %vm5002_vm3, %v4383_v2  ;;  %5076 = vst.msk [vmem:[%s8551_s25 + $0x248] sm:$0xff] %vm5002_vm3, %v3487_v3  ;;  %v1478_v2 = vld [vmem:[%s10270_s2 + $0xd40] sm:$0xff]  ;;  %v1252_v3 = vld [vmem:[%s10270_s2 + $0x630] sm:$0xff] }
 0x35c   : > { %6816 = vmatmul.mubr.msk.bf16.gmra.mrb[236].mxu1 %vm2483_vm2, %v1708_v59  ;;  %6592 = vmatmul.mubr.msk.bf16.gmra.mrb[240].mxu0 %vm2483_vm2, %v1596_v61  ;;  %v1603_v61 = vpack.c.bf16 %v1251_v51, %v1250_v50 }
 0x35d   : > { %6819 = vmatprep.mubr.msk.bf16.mxu1 %vm2483_vm2, %v1709_v0  ;;  %6595 = vmatprep.mubr.msk.bf16.mxu0 %vm2483_vm2, %v1597_v1  ;;  %v1476_v0 = vld [vmem:[%s10270_s2 + $0xd30] sm:$0xff]  ;;  %v1477_v1 = vld [vmem:[%s10270_s2 + $0xd38] sm:$0xff] }
 0x35e   : > { %v1716_v11 = vpack.c.bf16 %v1477_v1, %v1476_v0  ;;  %v1265_v0 = vld [vmem:[%s10270_s2 + $0x698] sm:$0xff]  ;;  %v1491_v1 = vld [vmem:[%s10270_s2 + $0xda8] sm:$0xff] }
 0x35f   : > { %v6713_v12 = vpop.f32.mrb[132].mxu1  ;;  %v6489_v13 = vpop.f32.mrb[136].mxu0 }
 0x360   : > { %5305 = vst.msk [vmem:[%s8551_s25 + $0x970] sm:$0xff] %vm5002_vm3, %v6713_v12  ;;  %v4396_v14 = vpop.f32.mrb[133].mxu1  ;;  %5081 = vst.msk [vmem:[%s8551_s25 + $0x270] sm:$0xff] %vm5002_vm3, %v6489_v13  ;;  %v3500_v16 = vpop.f32.mrb[137].mxu0  ;;  %v1604_v13 = vpack.c.bf16 %v1253_v4, %v1252_v3  ;;  %v1267_v3 = vld [vmem:[%s10270_s2 + $0x6a8] sm:$0xff] }
 0x361   : > { %5303 = vst.msk [vmem:[%s8551_s25 + $0x960] sm:$0xff] %vm5002_vm3, %v4396_v14  ;;  %v6714_v18 = vpop.f32.mrb[134].mxu1  ;;  %5079 = vst.msk [vmem:[%s8551_s25 + $0x260] sm:$0xff] %vm5002_vm3, %v3500_v16  ;;  %v6490_v19 = vpop.f32.mrb[138].mxu0  ;;  %v1717_v16 = vpack.c.bf16 %v1479_v5, %v1478_v2  ;;  %v1266_v2 = vld [vmem:[%s10270_s2 + $0x6a0] sm:$0xff] }
 0x362   : > { %5306 = vst.msk [vmem:[%s8551_s25 + $0x978] sm:$0xff] %vm5002_vm3, %v6714_v18  ;;  %v4399_v22 = vpop.f32.mrb[135].mxu1  ;;  %5082 = vst.msk [vmem:[%s8551_s25 + $0x278] sm:$0xff] %vm5002_vm3, %v6490_v19  ;;  %v3503_v23 = vpop.f32.mrb[139].mxu0 }
 0x363   : > { %5304 = vst.msk [vmem:[%s8551_s25 + $0x968] sm:$0xff] %vm5002_vm3, %v4399_v22  ;;  %5080 = vst.msk [vmem:[%s8551_s25 + $0x268] sm:$0xff] %vm5002_vm3, %v3503_v23  ;;  %v1482_v22 = vld [vmem:[%s10270_s2 + $0xd60] sm:$0xff]  ;;  %v1256_v23 = vld [vmem:[%s10270_s2 + $0x650] sm:$0xff] }
 0x364   : > { %6820 = vmatmul.mubr.msk.bf16.gmra.mrb[240].mxu1 %vm2483_vm2, %v1710_v15  ;;  %6596 = vmatmul.mubr.msk.bf16.gmra.mrb[244].mxu0 %vm2483_vm2, %v1598_v17  ;;  %v1605_v17 = vpack.c.bf16 %v1255_v7, %v1254_v6 }
 0x365   : > { %6823 = vmatprep.mubr.msk.bf16.mxu1 %vm2483_vm2, %v1711_v20  ;;  %6599 = vmatprep.mubr.msk.bf16.mxu0 %vm2483_vm2, %v1599_v21  ;;  %v1480_v20 = vld [vmem:[%s10270_s2 + $0xd50] sm:$0xff]  ;;  %v1481_v21 = vld [vmem:[%s10270_s2 + $0xd58] sm:$0xff] }
 0x366   : > { %v1718_v31 = vpack.c.bf16 %v1481_v21, %v1480_v20  ;;  %v1269_v20 = vld [vmem:[%s10270_s2 + $0x6b8] sm:$0xff]  ;;  %v1495_v21 = vld [vmem:[%s10270_s2 + $0xdc8] sm:$0xff] }
 0x367   : > { %v6717_v32 = vpop.f32.mrb[136].mxu1  ;;  %v6493_v33 = vpop.f32.mrb[140].mxu0 }
 0x368   : > { %5309 = vst.msk [vmem:[%s8551_s25 + $0x990] sm:$0xff] %vm5002_vm3, %v6717_v32  ;;  %v4412_v34 = vpop.f32.mrb[137].mxu1  ;;  %5085 = vst.msk [vmem:[%s8551_s25 + $0x290] sm:$0xff] %vm5002_vm3, %v6493_v33  ;;  %v3516_v36 = vpop.f32.mrb[141].mxu0  ;;  %v1606_v33 = vpack.c.bf16 %v1257_v24, %v1256_v23  ;;  %v1271_v23 = vld [vmem:[%s10270_s2 + $0x6c8] sm:$0xff] }
 0x369   : > { %5307 = vst.msk [vmem:[%s8551_s25 + $0x980] sm:$0xff] %vm5002_vm3, %v4412_v34  ;;  %v6718_v38 = vpop.f32.mrb[138].mxu1  ;;  %5083 = vst.msk [vmem:[%s8551_s25 + $0x280] sm:$0xff] %vm5002_vm3, %v3516_v36  ;;  %v6494_v39 = vpop.f32.mrb[142].mxu0  ;;  %v1719_v36 = vpack.c.bf16 %v1483_v25, %v1482_v22  ;;  %v1270_v22 = vld [vmem:[%s10270_s2 + $0x6c0] sm:$0xff] }
 0x36a   : > { %5310 = vst.msk [vmem:[%s8551_s25 + $0x998] sm:$0xff] %vm5002_vm3, %v6718_v38  ;;  %v4415_v42 = vpop.f32.mrb[139].mxu1  ;;  %5086 = vst.msk [vmem:[%s8551_s25 + $0x298] sm:$0xff] %vm5002_vm3, %v6494_v39  ;;  %v3519_v43 = vpop.f32.mrb[143].mxu0 }
 0x36b   : > { %5308 = vst.msk [vmem:[%s8551_s25 + $0x988] sm:$0xff] %vm5002_vm3, %v4415_v42  ;;  %5084 = vst.msk [vmem:[%s8551_s25 + $0x288] sm:$0xff] %vm5002_vm3, %v3519_v43  ;;  %v1486_v42 = vld [vmem:[%s10270_s2 + $0xd80] sm:$0xff]  ;;  %v1260_v43 = vld [vmem:[%s10270_s2 + $0x670] sm:$0xff] }
 0x36c   : > { %6824 = vmatmul.mubr.msk.bf16.gmra.mrb[244].mxu1 %vm2483_vm2, %v1712_v35  ;;  %6600 = vmatmul.mubr.msk.bf16.gmra.mrb[248].mxu0 %vm2483_vm2, %v1600_v37  ;;  %v1607_v37 = vpack.c.bf16 %v1259_v27, %v1258_v26 }
 0x36d   : > { %6827 = vmatprep.mubr.msk.bf16.mxu1 %vm2483_vm2, %v1713_v40  ;;  %6603 = vmatprep.mubr.msk.bf16.mxu0 %vm2483_vm2, %v1601_v41  ;;  %v1484_v40 = vld [vmem:[%s10270_s2 + $0xd70] sm:$0xff]  ;;  %v1485_v41 = vld [vmem:[%s10270_s2 + $0xd78] sm:$0xff] }
 0x36e   : > { %v1720_v51 = vpack.c.bf16 %v1485_v41, %v1484_v40  ;;  %v1273_v40 = vld [vmem:[%s10270_s2 + $0x6d8] sm:$0xff]  ;;  %v1499_v41 = vld [vmem:[%s10270_s2 + $0xde8] sm:$0xff] }
 0x36f   : > { %v6721_v52 = vpop.f32.mrb[140].mxu1  ;;  %v6497_v53 = vpop.f32.mrb[144].mxu0 }
 0x370   : > { %5313 = vst.msk [vmem:[%s8551_s25 + $0x9b0] sm:$0xff] %vm5002_vm3, %v6721_v52  ;;  %v4428_v54 = vpop.f32.mrb[141].mxu1  ;;  %5089 = vst.msk [vmem:[%s8551_s25 + $0x2b0] sm:$0xff] %vm5002_vm3, %v6497_v53  ;;  %v3532_v56 = vpop.f32.mrb[145].mxu0  ;;  %v1608_v53 = vpack.c.bf16 %v1261_v44, %v1260_v43  ;;  %v1275_v43 = vld [vmem:[%s10270_s2 + $0x6e8] sm:$0xff] }
 0x371   : > { %5311 = vst.msk [vmem:[%s8551_s25 + $0x9a0] sm:$0xff] %vm5002_vm3, %v4428_v54  ;;  %v6722_v58 = vpop.f32.mrb[142].mxu1  ;;  %5087 = vst.msk [vmem:[%s8551_s25 + $0x2a0] sm:$0xff] %vm5002_vm3, %v3532_v56  ;;  %v6498_v59 = vpop.f32.mrb[146].mxu0  ;;  %v1721_v56 = vpack.c.bf16 %v1487_v45, %v1486_v42  ;;  %v1274_v42 = vld [vmem:[%s10270_s2 + $0x6e0] sm:$0xff] }
 0x372   : > { %5314 = vst.msk [vmem:[%s8551_s25 + $0x9b8] sm:$0xff] %vm5002_vm3, %v6722_v58  ;;  %v4431_v62 = vpop.f32.mrb[143].mxu1  ;;  %5090 = vst.msk [vmem:[%s8551_s25 + $0x2b8] sm:$0xff] %vm5002_vm3, %v6498_v59  ;;  %v3535_v63 = vpop.f32.mrb[147].mxu0 }
 0x373   : > { %5312 = vst.msk [vmem:[%s8551_s25 + $0x9a8] sm:$0xff] %vm5002_vm3, %v4431_v62  ;;  %5088 = vst.msk [vmem:[%s8551_s25 + $0x2a8] sm:$0xff] %vm5002_vm3, %v3535_v63  ;;  %v1490_v62 = vld [vmem:[%s10270_s2 + $0xda0] sm:$0xff]  ;;  %v1264_v63 = vld [vmem:[%s10270_s2 + $0x690] sm:$0xff] }
 0x374   : > { %6828 = vmatmul.mubr.msk.bf16.gmra.mrb[248].mxu1 %vm2483_vm2, %v1714_v55  ;;  %6604 = vmatmul.mubr.msk.bf16.gmra.mrb[252].mxu0 %vm2483_vm2, %v1602_v57  ;;  %v1609_v57 = vpack.c.bf16 %v1263_v47, %v1262_v46 }
 0x375   : > { %6831 = vmatprep.mubr.msk.bf16.mxu1 %vm2483_vm2, %v1715_v60  ;;  %6607 = vmatprep.mubr.msk.bf16.mxu0 %vm2483_vm2, %v1603_v61  ;;  %v1488_v60 = vld [vmem:[%s10270_s2 + $0xd90] sm:$0xff]  ;;  %v1489_v61 = vld [vmem:[%s10270_s2 + $0xd98] sm:$0xff] }
 0x376   : > { %v1722_v7 = vpack.c.bf16 %v1489_v61, %v1488_v60  ;;  %v1502_v60 = vld [vmem:[%s10270_s2 + $0xe00] sm:$0xff]  ;;  %v1503_v61 = vld [vmem:[%s10270_s2 + $0xe08] sm:$0xff] }
 0x377   : > { %v6725_v8 = vpop.f32.mrb[144].mxu1  ;;  %v6501_v9 = vpop.f32.mrb[148].mxu0 }
 0x378   : > { %5317 = vst.msk [vmem:[%s8551_s25 + $0x9d0] sm:$0xff] %vm5002_vm3, %v6725_v8  ;;  %v4444_v10 = vpop.f32.mrb[145].mxu1  ;;  %5093 = vst.msk [vmem:[%s8551_s25 + $0x2d0] sm:$0xff] %vm5002_vm3, %v6501_v9  ;;  %v3548_v12 = vpop.f32.mrb[149].mxu0  ;;  %v1610_v9 = vpack.c.bf16 %v1265_v0, %v1264_v63 }
 0x379   : > { %5315 = vst.msk [vmem:[%s8551_s25 + $0x9c0] sm:$0xff] %vm5002_vm3, %v4444_v10  ;;  %v6726_v14 = vpop.f32.mrb[146].mxu1  ;;  %5091 = vst.msk [vmem:[%s8551_s25 + $0x2c0] sm:$0xff] %vm5002_vm3, %v3548_v12  ;;  %v6502_v15 = vpop.f32.mrb[150].mxu0  ;;  %v1723_v12 = vpack.c.bf16 %v1491_v1, %v1490_v62 }
 0x37a   : > { %5318 = vst.msk [vmem:[%s8551_s25 + $0x9d8] sm:$0xff] %vm5002_vm3, %v6726_v14  ;;  %v4447_v18 = vpop.f32.mrb[147].mxu1  ;;  %5094 = vst.msk [vmem:[%s8551_s25 + $0x2d8] sm:$0xff] %vm5002_vm3, %v6502_v15  ;;  %v3551_v19 = vpop.f32.mrb[151].mxu0 }
 0x37b   : > { %5316 = vst.msk [vmem:[%s8551_s25 + $0x9c8] sm:$0xff] %vm5002_vm3, %v4447_v18  ;;  %5092 = vst.msk [vmem:[%s8551_s25 + $0x2c8] sm:$0xff] %vm5002_vm3, %v3551_v19  ;;  %v1494_v18 = vld [vmem:[%s10270_s2 + $0xdc0] sm:$0xff]  ;;  %v1268_v19 = vld [vmem:[%s10270_s2 + $0x6b0] sm:$0xff] }
 0x37c   : > { %6832 = vmatmul.mubr.msk.bf16.gmra.mrb[252].mxu1 %vm2483_vm2, %v1716_v11  ;;  %6608 = vmatmul.mubr.msk.bf16.gmra.mrb[0].mxu0 %vm2483_vm2, %v1604_v13  ;;  %v1611_v13 = vpack.c.bf16 %v1267_v3, %v1266_v2 }
 0x37d   : > { %6835 = vmatprep.mubr.msk.bf16.mxu1 %vm2483_vm2, %v1717_v16  ;;  %6611 = vmatprep.mubr.msk.bf16.mxu0 %vm2483_vm2, %v1605_v17  ;;  %v1492_v16 = vld [vmem:[%s10270_s2 + $0xdb0] sm:$0xff]  ;;  %v1493_v17 = vld [vmem:[%s10270_s2 + $0xdb8] sm:$0xff] }
 0x37e   : > { %v1724_v27 = vpack.c.bf16 %v1493_v17, %v1492_v16 }
 0x37f   : > { %v6729_v28 = vpop.f32.mrb[148].mxu1  ;;  %v6505_v29 = vpop.f32.mrb[152].mxu0 }
 0x380   : > { %5321 = vst.msk [vmem:[%s8551_s25 + $0x9f0] sm:$0xff] %vm5002_vm3, %v6729_v28  ;;  %v4460_v30 = vpop.f32.mrb[149].mxu1  ;;  %5097 = vst.msk [vmem:[%s8551_s25 + $0x2f0] sm:$0xff] %vm5002_vm3, %v6505_v29  ;;  %v3564_v32 = vpop.f32.mrb[153].mxu0  ;;  %v1612_v29 = vpack.c.bf16 %v1269_v20, %v1268_v19 }
 0x381   : > { %5319 = vst.msk [vmem:[%s8551_s25 + $0x9e0] sm:$0xff] %vm5002_vm3, %v4460_v30  ;;  %v6730_v34 = vpop.f32.mrb[150].mxu1  ;;  %5095 = vst.msk [vmem:[%s8551_s25 + $0x2e0] sm:$0xff] %vm5002_vm3, %v3564_v32  ;;  %v6506_v35 = vpop.f32.mrb[154].mxu0  ;;  %v1725_v32 = vpack.c.bf16 %v1495_v21, %v1494_v18 }
 0x382   : > { %5322 = vst.msk [vmem:[%s8551_s25 + $0x9f8] sm:$0xff] %vm5002_vm3, %v6730_v34  ;;  %v4463_v38 = vpop.f32.mrb[151].mxu1  ;;  %5098 = vst.msk [vmem:[%s8551_s25 + $0x2f8] sm:$0xff] %vm5002_vm3, %v6506_v35  ;;  %v3567_v39 = vpop.f32.mrb[155].mxu0 }
 0x383   : > { %5320 = vst.msk [vmem:[%s8551_s25 + $0x9e8] sm:$0xff] %vm5002_vm3, %v4463_v38  ;;  %5096 = vst.msk [vmem:[%s8551_s25 + $0x2e8] sm:$0xff] %vm5002_vm3, %v3567_v39  ;;  %v1498_v38 = vld [vmem:[%s10270_s2 + $0xde0] sm:$0xff]  ;;  %v1272_v39 = vld [vmem:[%s10270_s2 + $0x6d0] sm:$0xff] }
 0x384   : > { %6836 = vmatmul.mubr.msk.bf16.gmra.mrb[0].mxu1 %vm2483_vm2, %v1718_v31  ;;  %6612 = vmatmul.mubr.msk.bf16.gmra.mrb[4].mxu0 %vm2483_vm2, %v1606_v33  ;;  %v1613_v33 = vpack.c.bf16 %v1271_v23, %v1270_v22 }
 0x385   : > { %6839 = vmatprep.mubr.msk.bf16.mxu1 %vm2483_vm2, %v1719_v36  ;;  %6615 = vmatprep.mubr.msk.bf16.mxu0 %vm2483_vm2, %v1607_v37  ;;  %v1496_v36 = vld [vmem:[%s10270_s2 + $0xdd0] sm:$0xff]  ;;  %v1497_v37 = vld [vmem:[%s10270_s2 + $0xdd8] sm:$0xff] }
 0x386   : > { %v1726_v47 = vpack.c.bf16 %v1497_v37, %v1496_v36 }
 0x387   : > { %v6733_v48 = vpop.f32.mrb[152].mxu1  ;;  %v6509_v49 = vpop.f32.mrb[156].mxu0 }
 0x388   : > { %5325 = vst.msk [vmem:[%s8551_s25 + $0xa10] sm:$0xff] %vm5002_vm3, %v6733_v48  ;;  %v4476_v50 = vpop.f32.mrb[153].mxu1  ;;  %5101 = vst.msk [vmem:[%s8551_s25 + $0x310] sm:$0xff] %vm5002_vm3, %v6509_v49  ;;  %v3580_v52 = vpop.f32.mrb[157].mxu0  ;;  %v1614_v49 = vpack.c.bf16 %v1273_v40, %v1272_v39 }
 0x389   : > { %5323 = vst.msk [vmem:[%s8551_s25 + $0xa00] sm:$0xff] %vm5002_vm3, %v4476_v50  ;;  %v6734_v54 = vpop.f32.mrb[154].mxu1  ;;  %5099 = vst.msk [vmem:[%s8551_s25 + $0x300] sm:$0xff] %vm5002_vm3, %v3580_v52  ;;  %v6510_v55 = vpop.f32.mrb[158].mxu0  ;;  %v1727_v52 = vpack.c.bf16 %v1499_v41, %v1498_v38 }
 0x38a   : > { %5326 = vst.msk [vmem:[%s8551_s25 + $0xa18] sm:$0xff] %vm5002_vm3, %v6734_v54  ;;  %v4479_v58 = vpop.f32.mrb[155].mxu1  ;;  %5102 = vst.msk [vmem:[%s8551_s25 + $0x318] sm:$0xff] %vm5002_vm3, %v6510_v55  ;;  %v3583_v59 = vpop.f32.mrb[159].mxu0 }
 0x38b   : > { %5324 = vst.msk [vmem:[%s8551_s25 + $0xa08] sm:$0xff] %vm5002_vm3, %v4479_v58  ;;  %5100 = vst.msk [vmem:[%s8551_s25 + $0x308] sm:$0xff] %vm5002_vm3, %v3583_v59  ;;  %v1276_v58 = vld [vmem:[%s10270_s2 + $0x6f0] sm:$0xff]  ;;  %v1277_v59 = vld [vmem:[%s10270_s2 + $0x6f8] sm:$0xff] }
 0x38c   : > { %6840 = vmatmul.mubr.msk.bf16.gmra.mrb[4].mxu1 %vm2483_vm2, %v1720_v51  ;;  %6616 = vmatmul.mubr.msk.bf16.gmra.mrb[8].mxu0 %vm2483_vm2, %v1608_v53  ;;  %v1615_v53 = vpack.c.bf16 %v1275_v43, %v1274_v42  ;;  %v1616_v3 = vpack.c.bf16 %v1277_v59, %v1276_v58 }
 0x38d   : > { %6843 = vmatprep.mubr.msk.bf16.mxu1 %vm2483_vm2, %v1721_v56  ;;  %6619 = vmatprep.mubr.msk.bf16.mxu0 %vm2483_vm2, %v1609_v57  ;;  %v1500_v56 = vld [vmem:[%s10270_s2 + $0xdf0] sm:$0xff]  ;;  %v1501_v57 = vld [vmem:[%s10270_s2 + $0xdf8] sm:$0xff] }
 0x38e   : > { %v1728_v1 = vpack.c.bf16 %v1501_v57, %v1500_v56 }
 0x38f   : > { %v6737_v4 = vpop.f32.mrb[156].mxu1  ;;  %v6513_v5 = vpop.f32.mrb[160].mxu0 }
 0x390   : > { %5329 = vst.msk [vmem:[%s8551_s25 + $0xa30] sm:$0xff] %vm5002_vm3, %v6737_v4  ;;  %v4492_v6 = vpop.f32.mrb[157].mxu1  ;;  %5105 = vst.msk [vmem:[%s8551_s25 + $0x330] sm:$0xff] %vm5002_vm3, %v6513_v5  ;;  %v3596_v8 = vpop.f32.mrb[161].mxu0 }
 0x391   : > { %5327 = vst.msk [vmem:[%s8551_s25 + $0xa20] sm:$0xff] %vm5002_vm3, %v4492_v6  ;;  %v6738_v10 = vpop.f32.mrb[158].mxu1  ;;  %5103 = vst.msk [vmem:[%s8551_s25 + $0x320] sm:$0xff] %vm5002_vm3, %v3596_v8  ;;  %v6514_v11 = vpop.f32.mrb[162].mxu0  ;;  %v1729_v6 = vpack.c.bf16 %v1503_v61, %v1502_v60 }
 0x392   : > { %5330 = vst.msk [vmem:[%s8551_s25 + $0xa38] sm:$0xff] %vm5002_vm3, %v6738_v10  ;;  %v4495_v14 = vpop.f32.mrb[159].mxu1  ;;  %5106 = vst.msk [vmem:[%s8551_s25 + $0x338] sm:$0xff] %vm5002_vm3, %v6514_v11  ;;  %v3599_v15 = vpop.f32.mrb[163].mxu0 }
 0x393   : > { %5328 = vst.msk [vmem:[%s8551_s25 + $0xa28] sm:$0xff] %vm5002_vm3, %v4495_v14  ;;  %5104 = vst.msk [vmem:[%s8551_s25 + $0x328] sm:$0xff] %vm5002_vm3, %v3599_v15 }
 0x394   : > { %6844 = vmatmul.mubr.msk.bf16.gmra.mrb[8].mxu1 %vm2483_vm2, %v1722_v7  ;;  %6620 = vmatmul.mubr.msk.bf16.gmra.mrb[12].mxu0 %vm2483_vm2, %v1610_v9  ;;  %v1504_v9 = vld [vmem:[%s10270_s2 + $0xe10] sm:$0x3f] }
 0x395   : > { %6847 = vmatprep.mubr.msk.bf16.mxu1 %vm2483_vm2, %v1723_v12  ;;  %6623 = vmatprep.mubr.msk.bf16.mxu0 %vm2483_vm2, %v1611_v13  ;;  %v1730_v13 = vpack.c.bf16 %v1504_v9, %v1504_v9 }
 0x397   : > { %v6741_v24 = vpop.f32.mrb[160].mxu1  ;;  %v6517_v25 = vpop.f32.mrb[164].mxu0 }
 0x398   : > { %5333 = vst.msk [vmem:[%s8551_s25 + $0xa50] sm:$0xff] %vm5002_vm3, %v6741_v24  ;;  %v4508_v26 = vpop.f32.mrb[161].mxu1  ;;  %5109 = vst.msk [vmem:[%s8551_s25 + $0x350] sm:$0xff] %vm5002_vm3, %v6517_v25  ;;  %v3612_v28 = vpop.f32.mrb[165].mxu0 }
 0x399   : > { %5331 = vst.msk [vmem:[%s8551_s25 + $0xa40] sm:$0xff] %vm5002_vm3, %v4508_v26  ;;  %v6742_v30 = vpop.f32.mrb[162].mxu1  ;;  %5107 = vst.msk [vmem:[%s8551_s25 + $0x340] sm:$0xff] %vm5002_vm3, %v3612_v28  ;;  %v6518_v31 = vpop.f32.mrb[166].mxu0 }
 0x39a   : > { %5334 = vst.msk [vmem:[%s8551_s25 + $0xa58] sm:$0xff] %vm5002_vm3, %v6742_v30  ;;  %v4511_v34 = vpop.f32.mrb[163].mxu1  ;;  %5110 = vst.msk [vmem:[%s8551_s25 + $0x358] sm:$0xff] %vm5002_vm3, %v6518_v31  ;;  %v3615_v35 = vpop.f32.mrb[167].mxu0 }
 0x39b   : > { %5332 = vst.msk [vmem:[%s8551_s25 + $0xa48] sm:$0xff] %vm5002_vm3, %v4511_v34  ;;  %5108 = vst.msk [vmem:[%s8551_s25 + $0x348] sm:$0xff] %vm5002_vm3, %v3615_v35 }
 0x39c   : > { %6848 = vmatmul.mubr.msk.bf16.gmra.mrb[12].mxu1 %vm2483_vm2, %v1724_v27  ;;  %6624 = vmatmul.mubr.msk.bf16.gmra.mrb[16].mxu0 %vm2483_vm2, %v1612_v29 }
 0x39d   : > { %6851 = vmatprep.mubr.msk.bf16.mxu1 %vm2483_vm2, %v1725_v32  ;;  %6627 = vmatprep.mubr.msk.bf16.mxu0 %vm2483_vm2, %v1613_v33 }
 0x39f   : > { %v6745_v44 = vpop.f32.mrb[164].mxu1  ;;  %v6521_v45 = vpop.f32.mrb[168].mxu0 }
 0x3a0   : > { %5337 = vst.msk [vmem:[%s8551_s25 + $0xa70] sm:$0xff] %vm5002_vm3, %v6745_v44  ;;  %v4524_v46 = vpop.f32.mrb[165].mxu1  ;;  %5113 = vst.msk [vmem:[%s8551_s25 + $0x370] sm:$0xff] %vm5002_vm3, %v6521_v45  ;;  %v3628_v48 = vpop.f32.mrb[169].mxu0 }
 0x3a1   : > { %5335 = vst.msk [vmem:[%s8551_s25 + $0xa60] sm:$0xff] %vm5002_vm3, %v4524_v46  ;;  %v6746_v50 = vpop.f32.mrb[166].mxu1  ;;  %5111 = vst.msk [vmem:[%s8551_s25 + $0x360] sm:$0xff] %vm5002_vm3, %v3628_v48  ;;  %v6522_v51 = vpop.f32.mrb[170].mxu0 }
 0x3a2   : > { %5338 = vst.msk [vmem:[%s8551_s25 + $0xa78] sm:$0xff] %vm5002_vm3, %v6746_v50  ;;  %v4527_v54 = vpop.f32.mrb[167].mxu1  ;;  %5114 = vst.msk [vmem:[%s8551_s25 + $0x378] sm:$0xff] %vm5002_vm3, %v6522_v51  ;;  %v3631_v55 = vpop.f32.mrb[171].mxu0 }
 0x3a3   : > { %5336 = vst.msk [vmem:[%s8551_s25 + $0xa68] sm:$0xff] %vm5002_vm3, %v4527_v54  ;;  %5112 = vst.msk [vmem:[%s8551_s25 + $0x368] sm:$0xff] %vm5002_vm3, %v3631_v55 }
 0x3a4   : > { %6852 = vmatmul.mubr.msk.bf16.gmra.mrb[16].mxu1 %vm2483_vm2, %v1726_v47  ;;  %6628 = vmatmul.mubr.msk.bf16.gmra.mrb[20].mxu0 %vm2483_vm2, %v1614_v49 }
 0x3a5   : > { %6855 = vmatprep.mubr.msk.bf16.mxu1 %vm2483_vm2, %v1727_v52  ;;  %6631 = vmatprep.mubr.msk.bf16.mxu0 %vm2483_vm2, %v1615_v53 }
 0x3a7   : > { %v6749_v62 = vpop.f32.mrb[168].mxu1  ;;  %v6525_v63 = vpop.f32.mrb[172].mxu0 }
 0x3a8   : > { %5341 = vst.msk [vmem:[%s8551_s25 + $0xa90] sm:$0xff] %vm5002_vm3, %v6749_v62  ;;  %v4540_v0 = vpop.f32.mrb[169].mxu1  ;;  %5117 = vst.msk [vmem:[%s8551_s25 + $0x390] sm:$0xff] %vm5002_vm3, %v6525_v63  ;;  %v3644_v2 = vpop.f32.mrb[173].mxu0 }
 0x3a9   : > { %5339 = vst.msk [vmem:[%s8551_s25 + $0xa80] sm:$0xff] %vm5002_vm3, %v4540_v0  ;;  %v6750_v4 = vpop.f32.mrb[170].mxu1  ;;  %5115 = vst.msk [vmem:[%s8551_s25 + $0x380] sm:$0xff] %vm5002_vm3, %v3644_v2  ;;  %v6526_v5 = vpop.f32.mrb[174].mxu0 }
 0x3aa   : > { %5342 = vst.msk [vmem:[%s8551_s25 + $0xa98] sm:$0xff] %vm5002_vm3, %v6750_v4  ;;  %v4543_v7 = vpop.f32.mrb[171].mxu1  ;;  %5118 = vst.msk [vmem:[%s8551_s25 + $0x398] sm:$0xff] %vm5002_vm3, %v6526_v5  ;;  %v3647_v8 = vpop.f32.mrb[175].mxu0 }
 0x3ab   : > { %5340 = vst.msk [vmem:[%s8551_s25 + $0xa88] sm:$0xff] %vm5002_vm3, %v4543_v7  ;;  %5116 = vst.msk [vmem:[%s8551_s25 + $0x388] sm:$0xff] %vm5002_vm3, %v3647_v8 }
 0x3ac   : > { %6856 = vmatmul.mubr.msk.bf16.gmra.mrb[20].mxu1 %vm2483_vm2, %v1728_v1  ;;  %6632 = vmatmul.mubr.msk.bf16.gmra.mrb[24].mxu0 %vm2483_vm2, %v1616_v3 }
 0x3ad   : > { %6859 = vmatprep.mubr.msk.bf16.mxu1 %vm2483_vm2, %v1729_v6 }
 0x3af   : > { %v6753_v10 = vpop.f32.mrb[172].mxu1  ;;  %v6529_v11 = vpop.f32.mrb[176].mxu0 }
 0x3b0   : > { %5345 = vst.msk [vmem:[%s8551_s25 + $0xab0] sm:$0xff] %vm5002_vm3, %v6753_v10  ;;  %v4556_v12 = vpop.f32.mrb[173].mxu1  ;;  %5121 = vst.msk [vmem:[%s8551_s25 + $0x3b0] sm:$0xff] %vm5002_vm3, %v6529_v11  ;;  %v3660_v14 = vpop.f32.mrb[177].mxu0 }
 0x3b1   : > { %5343 = vst.msk [vmem:[%s8551_s25 + $0xaa0] sm:$0xff] %vm5002_vm3, %v4556_v12  ;;  %v6754_v15 = vpop.f32.mrb[174].mxu1  ;;  %5119 = vst.msk [vmem:[%s8551_s25 + $0x3a0] sm:$0xff] %vm5002_vm3, %v3660_v14  ;;  %v6530_v16 = vpop.f32.mrb[178].mxu0 }
 0x3b2   : > { %5346 = vst.msk [vmem:[%s8551_s25 + $0xab8] sm:$0xff] %vm5002_vm3, %v6754_v15  ;;  %v4559_v17 = vpop.f32.mrb[175].mxu1  ;;  %5122 = vst.msk [vmem:[%s8551_s25 + $0x3b8] sm:$0xff] %vm5002_vm3, %v6530_v16  ;;  %v3663_v18 = vpop.f32.mrb[179].mxu0 }
 0x3b3   : > { %5344 = vst.msk [vmem:[%s8551_s25 + $0xaa8] sm:$0xff] %vm5002_vm3, %v4559_v17  ;;  %5120 = vst.msk [vmem:[%s8551_s25 + $0x3a8] sm:$0xff] %vm5002_vm3, %v3663_v18 }
 0x3b4   : > { %6860 = vmatmul.mubr.msk.bf16.gmra.mrb[24].mxu1 %vm2483_vm2, %v1730_v13 }
 0x3b7   : > { %v6757_v19 = vpop.f32.mrb[176].mxu1  ;;  %v6533_v20 = vpop.f32.mrb[180].mxu0 }
 0x3b8   : > { %5349 = vst.msk [vmem:[%s8551_s25 + $0xad0] sm:$0xff] %vm5002_vm3, %v6757_v19  ;;  %v4572_v21 = vpop.f32.mrb[177].mxu1  ;;  %5125 = vst.msk [vmem:[%s8551_s25 + $0x3d0] sm:$0xff] %vm5002_vm3, %v6533_v20  ;;  %v3676_v22 = vpop.f32.mrb[181].mxu0 }
 0x3b9   : > { %5347 = vst.msk [vmem:[%s8551_s25 + $0xac0] sm:$0xff] %vm5002_vm3, %v4572_v21  ;;  %v6758_v23 = vpop.f32.mrb[178].mxu1  ;;  %5123 = vst.msk [vmem:[%s8551_s25 + $0x3c0] sm:$0xff] %vm5002_vm3, %v3676_v22  ;;  %v6534_v24 = vpop.f32.mrb[182].mxu0 }
 0x3ba   : > { %5350 = vst.msk [vmem:[%s8551_s25 + $0xad8] sm:$0xff] %vm5002_vm3, %v6758_v23  ;;  %v4575_v25 = vpop.f32.mrb[179].mxu1  ;;  %5126 = vst.msk [vmem:[%s8551_s25 + $0x3d8] sm:$0xff] %vm5002_vm3, %v6534_v24  ;;  %v3679_v26 = vpop.f32.mrb[183].mxu0 }
 0x3bb   : > { %5348 = vst.msk [vmem:[%s8551_s25 + $0xac8] sm:$0xff] %vm5002_vm3, %v4575_v25  ;;  %5124 = vst.msk [vmem:[%s8551_s25 + $0x3c8] sm:$0xff] %vm5002_vm3, %v3679_v26 }
 0x3bf   : > { %v6761_v27 = vpop.f32.mrb[180].mxu1  ;;  %v6537_v28 = vpop.f32.mrb[184].mxu0 }
 0x3c0   : > { %5353 = vst.msk [vmem:[%s8551_s25 + $0xaf0] sm:$0xff] %vm5002_vm3, %v6761_v27  ;;  %v4588_v29 = vpop.f32.mrb[181].mxu1  ;;  %5129 = vst.msk [vmem:[%s8551_s25 + $0x3f0] sm:$0xff] %vm5002_vm3, %v6537_v28  ;;  %v3692_v30 = vpop.f32.mrb[185].mxu0 }
 0x3c1   : > { %5351 = vst.msk [vmem:[%s8551_s25 + $0xae0] sm:$0xff] %vm5002_vm3, %v4588_v29  ;;  %v6762_v31 = vpop.f32.mrb[182].mxu1  ;;  %5127 = vst.msk [vmem:[%s8551_s25 + $0x3e0] sm:$0xff] %vm5002_vm3, %v3692_v30  ;;  %v6538_v32 = vpop.f32.mrb[186].mxu0 }
 0x3c2   : > { %5354 = vst.msk [vmem:[%s8551_s25 + $0xaf8] sm:$0xff] %vm5002_vm3, %v6762_v31  ;;  %v4591_v33 = vpop.f32.mrb[183].mxu1  ;;  %5130 = vst.msk [vmem:[%s8551_s25 + $0x3f8] sm:$0xff] %vm5002_vm3, %v6538_v32  ;;  %v3695_v34 = vpop.f32.mrb[187].mxu0 }
 0x3c3   : > { %5352 = vst.msk [vmem:[%s8551_s25 + $0xae8] sm:$0xff] %vm5002_vm3, %v4591_v33  ;;  %5128 = vst.msk [vmem:[%s8551_s25 + $0x3e8] sm:$0xff] %vm5002_vm3, %v3695_v34 }
 0x3c7   : > { %v6765_v35 = vpop.f32.mrb[184].mxu1  ;;  %v6541_v36 = vpop.f32.mrb[188].mxu0 }
 0x3c8   : > { %5357 = vst.msk [vmem:[%s8551_s25 + $0xb10] sm:$0xff] %vm5002_vm3, %v6765_v35  ;;  %v4604_v37 = vpop.f32.mrb[185].mxu1  ;;  %5133 = vst.msk [vmem:[%s8551_s25 + $0x410] sm:$0xff] %vm5002_vm3, %v6541_v36  ;;  %v3708_v38 = vpop.f32.mrb[189].mxu0 }
 0x3c9   : > { %5355 = vst.msk [vmem:[%s8551_s25 + $0xb00] sm:$0xff] %vm5002_vm3, %v4604_v37  ;;  %v6766_v39 = vpop.f32.mrb[186].mxu1  ;;  %5131 = vst.msk [vmem:[%s8551_s25 + $0x400] sm:$0xff] %vm5002_vm3, %v3708_v38  ;;  %v6542_v40 = vpop.f32.mrb[190].mxu0 }
 0x3ca   : > { %5358 = vst.msk [vmem:[%s8551_s25 + $0xb18] sm:$0xff] %vm5002_vm3, %v6766_v39  ;;  %v4607_v41 = vpop.f32.mrb[187].mxu1  ;;  %5134 = vst.msk [vmem:[%s8551_s25 + $0x418] sm:$0xff] %vm5002_vm3, %v6542_v40  ;;  %v3711_v42 = vpop.f32.mrb[191].mxu0 }
 0x3cb   : > { %5356 = vst.msk [vmem:[%s8551_s25 + $0xb08] sm:$0xff] %vm5002_vm3, %v4607_v41  ;;  %5132 = vst.msk [vmem:[%s8551_s25 + $0x408] sm:$0xff] %vm5002_vm3, %v3711_v42 }
 0x3cf   : > { %v6769_v43 = vpop.f32.mrb[188].mxu1  ;;  %v6545_v44 = vpop.f32.mrb[192].mxu0 }
 0x3d0   : > { %5361 = vst.msk [vmem:[%s8551_s25 + $0xb30] sm:$0xff] %vm5002_vm3, %v6769_v43  ;;  %v4620_v45 = vpop.f32.mrb[189].mxu1  ;;  %5137 = vst.msk [vmem:[%s8551_s25 + $0x430] sm:$0xff] %vm5002_vm3, %v6545_v44  ;;  %v3724_v46 = vpop.f32.mrb[193].mxu0 }
 0x3d1   : > { %5359 = vst.msk [vmem:[%s8551_s25 + $0xb20] sm:$0xff] %vm5002_vm3, %v4620_v45  ;;  %v6770_v47 = vpop.f32.mrb[190].mxu1  ;;  %5135 = vst.msk [vmem:[%s8551_s25 + $0x420] sm:$0xff] %vm5002_vm3, %v3724_v46  ;;  %v6546_v48 = vpop.f32.mrb[194].mxu0 }
 0x3d2   : > { %5362 = vst.msk [vmem:[%s8551_s25 + $0xb38] sm:$0xff] %vm5002_vm3, %v6770_v47  ;;  %v4623_v49 = vpop.f32.mrb[191].mxu1  ;;  %5138 = vst.msk [vmem:[%s8551_s25 + $0x438] sm:$0xff] %vm5002_vm3, %v6546_v48  ;;  %v3727_v50 = vpop.f32.mrb[195].mxu0 }
 0x3d3   : > { %5360 = vst.msk [vmem:[%s8551_s25 + $0xb28] sm:$0xff] %vm5002_vm3, %v4623_v49  ;;  %5136 = vst.msk [vmem:[%s8551_s25 + $0x428] sm:$0xff] %vm5002_vm3, %v3727_v50 }
 0x3d7   : > { %v6773_v51 = vpop.f32.mrb[192].mxu1  ;;  %v6549_v52 = vpop.f32.mrb[196].mxu0 }
 0x3d8   : > { %5365 = vst.msk [vmem:[%s8551_s25 + $0xb50] sm:$0xff] %vm5002_vm3, %v6773_v51  ;;  %v4636_v53 = vpop.f32.mrb[193].mxu1  ;;  %5141 = vst.msk [vmem:[%s8551_s25 + $0x450] sm:$0xff] %vm5002_vm3, %v6549_v52  ;;  %v3740_v54 = vpop.f32.mrb[197].mxu0 }
 0x3d9   : > { %5363 = vst.msk [vmem:[%s8551_s25 + $0xb40] sm:$0xff] %vm5002_vm3, %v4636_v53  ;;  %v6774_v55 = vpop.f32.mrb[194].mxu1  ;;  %5139 = vst.msk [vmem:[%s8551_s25 + $0x440] sm:$0xff] %vm5002_vm3, %v3740_v54  ;;  %v6550_v56 = vpop.f32.mrb[198].mxu0 }
 0x3da   : > { %5366 = vst.msk [vmem:[%s8551_s25 + $0xb58] sm:$0xff] %vm5002_vm3, %v6774_v55  ;;  %v4639_v57 = vpop.f32.mrb[195].mxu1  ;;  %5142 = vst.msk [vmem:[%s8551_s25 + $0x458] sm:$0xff] %vm5002_vm3, %v6550_v56  ;;  %v3743_v58 = vpop.f32.mrb[199].mxu0 }
 0x3db   : > { %5364 = vst.msk [vmem:[%s8551_s25 + $0xb48] sm:$0xff] %vm5002_vm3, %v4639_v57  ;;  %5140 = vst.msk [vmem:[%s8551_s25 + $0x448] sm:$0xff] %vm5002_vm3, %v3743_v58 }
 0x3df   : > { %v6777_v59 = vpop.f32.mrb[196].mxu1  ;;  %v6553_v60 = vpop.f32.mrb[200].mxu0 }
 0x3e0   : > { %5369 = vst.msk [vmem:[%s8551_s25 + $0xb70] sm:$0xff] %vm5002_vm3, %v6777_v59  ;;  %v4652_v61 = vpop.f32.mrb[197].mxu1  ;;  %5145 = vst.msk [vmem:[%s8551_s25 + $0x470] sm:$0xff] %vm5002_vm3, %v6553_v60  ;;  %v3756_v62 = vpop.f32.mrb[201].mxu0 }
 0x3e1   : > { %5367 = vst.msk [vmem:[%s8551_s25 + $0xb60] sm:$0xff] %vm5002_vm3, %v4652_v61  ;;  %v6778_v63 = vpop.f32.mrb[198].mxu1  ;;  %5143 = vst.msk [vmem:[%s8551_s25 + $0x460] sm:$0xff] %vm5002_vm3, %v3756_v62  ;;  %v6554_v0 = vpop.f32.mrb[202].mxu0 }
 0x3e2   : > { %5370 = vst.msk [vmem:[%s8551_s25 + $0xb78] sm:$0xff] %vm5002_vm3, %v6778_v63  ;;  %v4655_v1 = vpop.f32.mrb[199].mxu1  ;;  %5146 = vst.msk [vmem:[%s8551_s25 + $0x478] sm:$0xff] %vm5002_vm3, %v6554_v0  ;;  %v3759_v2 = vpop.f32.mrb[203].mxu0 }
 0x3e3   : > { %5368 = vst.msk [vmem:[%s8551_s25 + $0xb68] sm:$0xff] %vm5002_vm3, %v4655_v1  ;;  %5144 = vst.msk [vmem:[%s8551_s25 + $0x468] sm:$0xff] %vm5002_vm3, %v3759_v2 }
 0x3e7   : > { %v6781_v3 = vpop.f32.mrb[200].mxu1  ;;  %v6557_v4 = vpop.f32.mrb[204].mxu0 }
 0x3e8   : > { %5373 = vst.msk [vmem:[%s8551_s25 + $0xb90] sm:$0xff] %vm5002_vm3, %v6781_v3  ;;  %v4668_v5 = vpop.f32.mrb[201].mxu1  ;;  %5149 = vst.msk [vmem:[%s8551_s25 + $0x490] sm:$0xff] %vm5002_vm3, %v6557_v4  ;;  %v3772_v6 = vpop.f32.mrb[205].mxu0 }
 0x3e9   : > { %5371 = vst.msk [vmem:[%s8551_s25 + $0xb80] sm:$0xff] %vm5002_vm3, %v4668_v5  ;;  %v6782_v7 = vpop.f32.mrb[202].mxu1  ;;  %5147 = vst.msk [vmem:[%s8551_s25 + $0x480] sm:$0xff] %vm5002_vm3, %v3772_v6  ;;  %v6558_v8 = vpop.f32.mrb[206].mxu0 }
 0x3ea   : > { %5374 = vst.msk [vmem:[%s8551_s25 + $0xb98] sm:$0xff] %vm5002_vm3, %v6782_v7  ;;  %v4671_v9 = vpop.f32.mrb[203].mxu1  ;;  %5150 = vst.msk [vmem:[%s8551_s25 + $0x498] sm:$0xff] %vm5002_vm3, %v6558_v8  ;;  %v3775_v10 = vpop.f32.mrb[207].mxu0 }
 0x3eb   : > { %5372 = vst.msk [vmem:[%s8551_s25 + $0xb88] sm:$0xff] %vm5002_vm3, %v4671_v9  ;;  %5148 = vst.msk [vmem:[%s8551_s25 + $0x488] sm:$0xff] %vm5002_vm3, %v3775_v10 }
 0x3ef   : > { %v6785_v11 = vpop.f32.mrb[204].mxu1  ;;  %v6561_v12 = vpop.f32.mrb[208].mxu0 }
 0x3f0   : > { %5377 = vst.msk [vmem:[%s8551_s25 + $0xbb0] sm:$0xff] %vm5002_vm3, %v6785_v11  ;;  %v4684_v13 = vpop.f32.mrb[205].mxu1  ;;  %5153 = vst.msk [vmem:[%s8551_s25 + $0x4b0] sm:$0xff] %vm5002_vm3, %v6561_v12  ;;  %v3788_v14 = vpop.f32.mrb[209].mxu0 }
 0x3f1   : > { %5375 = vst.msk [vmem:[%s8551_s25 + $0xba0] sm:$0xff] %vm5002_vm3, %v4684_v13  ;;  %v6786_v15 = vpop.f32.mrb[206].mxu1  ;;  %5151 = vst.msk [vmem:[%s8551_s25 + $0x4a0] sm:$0xff] %vm5002_vm3, %v3788_v14  ;;  %v6562_v16 = vpop.f32.mrb[210].mxu0 }
 0x3f2   : > { %5378 = vst.msk [vmem:[%s8551_s25 + $0xbb8] sm:$0xff] %vm5002_vm3, %v6786_v15  ;;  %v4687_v17 = vpop.f32.mrb[207].mxu1  ;;  %5154 = vst.msk [vmem:[%s8551_s25 + $0x4b8] sm:$0xff] %vm5002_vm3, %v6562_v16  ;;  %v3791_v18 = vpop.f32.mrb[211].mxu0 }
 0x3f3   : > { %5376 = vst.msk [vmem:[%s8551_s25 + $0xba8] sm:$0xff] %vm5002_vm3, %v4687_v17  ;;  %5152 = vst.msk [vmem:[%s8551_s25 + $0x4a8] sm:$0xff] %vm5002_vm3, %v3791_v18 }
 0x3f7   : > { %v6789_v19 = vpop.f32.mrb[208].mxu1  ;;  %v6565_v20 = vpop.f32.mrb[212].mxu0 }
 0x3f8   : > { %5381 = vst.msk [vmem:[%s8551_s25 + $0xbd0] sm:$0xff] %vm5002_vm3, %v6789_v19  ;;  %v4700_v21 = vpop.f32.mrb[209].mxu1  ;;  %5157 = vst.msk [vmem:[%s8551_s25 + $0x4d0] sm:$0xff] %vm5002_vm3, %v6565_v20  ;;  %v3804_v22 = vpop.f32.mrb[213].mxu0 }
 0x3f9   : > { %5379 = vst.msk [vmem:[%s8551_s25 + $0xbc0] sm:$0xff] %vm5002_vm3, %v4700_v21  ;;  %v6790_v23 = vpop.f32.mrb[210].mxu1  ;;  %5155 = vst.msk [vmem:[%s8551_s25 + $0x4c0] sm:$0xff] %vm5002_vm3, %v3804_v22  ;;  %v6566_v24 = vpop.f32.mrb[214].mxu0 }
 0x3fa   : > { %5382 = vst.msk [vmem:[%s8551_s25 + $0xbd8] sm:$0xff] %vm5002_vm3, %v6790_v23  ;;  %v4703_v25 = vpop.f32.mrb[211].mxu1  ;;  %5158 = vst.msk [vmem:[%s8551_s25 + $0x4d8] sm:$0xff] %vm5002_vm3, %v6566_v24  ;;  %v3807_v26 = vpop.f32.mrb[215].mxu0 }
 0x3fb   : > { %5380 = vst.msk [vmem:[%s8551_s25 + $0xbc8] sm:$0xff] %vm5002_vm3, %v4703_v25  ;;  %5156 = vst.msk [vmem:[%s8551_s25 + $0x4c8] sm:$0xff] %vm5002_vm3, %v3807_v26 }
 0x3ff   : > { %v6793_v27 = vpop.f32.mrb[212].mxu1  ;;  %v6569_v28 = vpop.f32.mrb[216].mxu0 }
 0x400   : > { %5385 = vst.msk [vmem:[%s8551_s25 + $0xbf0] sm:$0xff] %vm5002_vm3, %v6793_v27  ;;  %v4716_v29 = vpop.f32.mrb[213].mxu1  ;;  %5161 = vst.msk [vmem:[%s8551_s25 + $0x4f0] sm:$0xff] %vm5002_vm3, %v6569_v28  ;;  %v3820_v30 = vpop.f32.mrb[217].mxu0 }
 0x401   : > { %5383 = vst.msk [vmem:[%s8551_s25 + $0xbe0] sm:$0xff] %vm5002_vm3, %v4716_v29  ;;  %v6794_v31 = vpop.f32.mrb[214].mxu1  ;;  %5159 = vst.msk [vmem:[%s8551_s25 + $0x4e0] sm:$0xff] %vm5002_vm3, %v3820_v30  ;;  %v6570_v32 = vpop.f32.mrb[218].mxu0 }
 0x402   : > { %5386 = vst.msk [vmem:[%s8551_s25 + $0xbf8] sm:$0xff] %vm5002_vm3, %v6794_v31  ;;  %v4719_v33 = vpop.f32.mrb[215].mxu1  ;;  %5162 = vst.msk [vmem:[%s8551_s25 + $0x4f8] sm:$0xff] %vm5002_vm3, %v6570_v32  ;;  %v3823_v34 = vpop.f32.mrb[219].mxu0 }
 0x403   : > { %5384 = vst.msk [vmem:[%s8551_s25 + $0xbe8] sm:$0xff] %vm5002_vm3, %v4719_v33  ;;  %5160 = vst.msk [vmem:[%s8551_s25 + $0x4e8] sm:$0xff] %vm5002_vm3, %v3823_v34 }
 0x407   : > { %v6797_v35 = vpop.f32.mrb[216].mxu1  ;;  %v6573_v36 = vpop.f32.mrb[220].mxu0 }
 0x408   : > { %5389 = vst.msk [vmem:[%s8551_s25 + $0xc10] sm:$0xff] %vm5002_vm3, %v6797_v35  ;;  %v4732_v37 = vpop.f32.mrb[217].mxu1  ;;  %5165 = vst.msk [vmem:[%s8551_s25 + $0x510] sm:$0xff] %vm5002_vm3, %v6573_v36  ;;  %v3836_v38 = vpop.f32.mrb[221].mxu0 }
 0x409   : > { %5387 = vst.msk [vmem:[%s8551_s25 + $0xc00] sm:$0xff] %vm5002_vm3, %v4732_v37  ;;  %v6798_v39 = vpop.f32.mrb[218].mxu1  ;;  %5163 = vst.msk [vmem:[%s8551_s25 + $0x500] sm:$0xff] %vm5002_vm3, %v3836_v38  ;;  %v6574_v40 = vpop.f32.mrb[222].mxu0 }
 0x40a   : > { %5390 = vst.msk [vmem:[%s8551_s25 + $0xc18] sm:$0xff] %vm5002_vm3, %v6798_v39  ;;  %v4735_v41 = vpop.f32.mrb[219].mxu1  ;;  %5166 = vst.msk [vmem:[%s8551_s25 + $0x518] sm:$0xff] %vm5002_vm3, %v6574_v40  ;;  %v3839_v42 = vpop.f32.mrb[223].mxu0 }
 0x40b   : > { %5388 = vst.msk [vmem:[%s8551_s25 + $0xc08] sm:$0xff] %vm5002_vm3, %v4735_v41  ;;  %5164 = vst.msk [vmem:[%s8551_s25 + $0x508] sm:$0xff] %vm5002_vm3, %v3839_v42 }
 0x40f   : > { %v6801_v43 = vpop.f32.mrb[220].mxu1  ;;  %v6577_v44 = vpop.f32.mrb[224].mxu0 }
 0x410   : > { %5393 = vst.msk [vmem:[%s8551_s25 + $0xc30] sm:$0xff] %vm5002_vm3, %v6801_v43  ;;  %v4748_v45 = vpop.f32.mrb[221].mxu1  ;;  %5169 = vst.msk [vmem:[%s8551_s25 + $0x530] sm:$0xff] %vm5002_vm3, %v6577_v44  ;;  %v3852_v46 = vpop.f32.mrb[225].mxu0 }
 0x411   : > { %5391 = vst.msk [vmem:[%s8551_s25 + $0xc20] sm:$0xff] %vm5002_vm3, %v4748_v45  ;;  %v6802_v47 = vpop.f32.mrb[222].mxu1  ;;  %5167 = vst.msk [vmem:[%s8551_s25 + $0x520] sm:$0xff] %vm5002_vm3, %v3852_v46  ;;  %v6578_v48 = vpop.f32.mrb[226].mxu0 }
 0x412   : > { %5394 = vst.msk [vmem:[%s8551_s25 + $0xc38] sm:$0xff] %vm5002_vm3, %v6802_v47  ;;  %v4751_v49 = vpop.f32.mrb[223].mxu1  ;;  %5170 = vst.msk [vmem:[%s8551_s25 + $0x538] sm:$0xff] %vm5002_vm3, %v6578_v48  ;;  %v3855_v50 = vpop.f32.mrb[227].mxu0 }
 0x413   : > { %5392 = vst.msk [vmem:[%s8551_s25 + $0xc28] sm:$0xff] %vm5002_vm3, %v4751_v49  ;;  %5168 = vst.msk [vmem:[%s8551_s25 + $0x528] sm:$0xff] %vm5002_vm3, %v3855_v50 }
 0x417   : > { %v6805_v51 = vpop.f32.mrb[224].mxu1  ;;  %v6581_v52 = vpop.f32.mrb[228].mxu0 }
 0x418   : > { %5397 = vst.msk [vmem:[%s8551_s25 + $0xc50] sm:$0xff] %vm5002_vm3, %v6805_v51  ;;  %v4764_v53 = vpop.f32.mrb[225].mxu1  ;;  %5173 = vst.msk [vmem:[%s8551_s25 + $0x550] sm:$0xff] %vm5002_vm3, %v6581_v52  ;;  %v3868_v54 = vpop.f32.mrb[229].mxu0 }
 0x419   : > { %5395 = vst.msk [vmem:[%s8551_s25 + $0xc40] sm:$0xff] %vm5002_vm3, %v4764_v53  ;;  %v6806_v55 = vpop.f32.mrb[226].mxu1  ;;  %5171 = vst.msk [vmem:[%s8551_s25 + $0x540] sm:$0xff] %vm5002_vm3, %v3868_v54  ;;  %v6582_v56 = vpop.f32.mrb[230].mxu0 }
 0x41a   : > { %5398 = vst.msk [vmem:[%s8551_s25 + $0xc58] sm:$0xff] %vm5002_vm3, %v6806_v55  ;;  %v4767_v57 = vpop.f32.mrb[227].mxu1  ;;  %5174 = vst.msk [vmem:[%s8551_s25 + $0x558] sm:$0xff] %vm5002_vm3, %v6582_v56  ;;  %v3871_v58 = vpop.f32.mrb[231].mxu0 }
 0x41b   : > { %5396 = vst.msk [vmem:[%s8551_s25 + $0xc48] sm:$0xff] %vm5002_vm3, %v4767_v57  ;;  %5172 = vst.msk [vmem:[%s8551_s25 + $0x548] sm:$0xff] %vm5002_vm3, %v3871_v58 }
 0x41f   : > { %v6809_v59 = vpop.f32.mrb[228].mxu1  ;;  %v6585_v60 = vpop.f32.mrb[232].mxu0 }
 0x420   : > { %5401 = vst.msk [vmem:[%s8551_s25 + $0xc70] sm:$0xff] %vm5002_vm3, %v6809_v59  ;;  %v4780_v61 = vpop.f32.mrb[229].mxu1  ;;  %5177 = vst.msk [vmem:[%s8551_s25 + $0x570] sm:$0xff] %vm5002_vm3, %v6585_v60  ;;  %v3884_v62 = vpop.f32.mrb[233].mxu0 }
 0x421   : > { %5399 = vst.msk [vmem:[%s8551_s25 + $0xc60] sm:$0xff] %vm5002_vm3, %v4780_v61  ;;  %v6810_v63 = vpop.f32.mrb[230].mxu1  ;;  %5175 = vst.msk [vmem:[%s8551_s25 + $0x560] sm:$0xff] %vm5002_vm3, %v3884_v62  ;;  %v6586_v0 = vpop.f32.mrb[234].mxu0 }
 0x422   : > { %5402 = vst.msk [vmem:[%s8551_s25 + $0xc78] sm:$0xff] %vm5002_vm3, %v6810_v63  ;;  %v4783_v1 = vpop.f32.mrb[231].mxu1  ;;  %5178 = vst.msk [vmem:[%s8551_s25 + $0x578] sm:$0xff] %vm5002_vm3, %v6586_v0  ;;  %v3887_v2 = vpop.f32.mrb[235].mxu0 }
 0x423   : > { %5400 = vst.msk [vmem:[%s8551_s25 + $0xc68] sm:$0xff] %vm5002_vm3, %v4783_v1  ;;  %5176 = vst.msk [vmem:[%s8551_s25 + $0x568] sm:$0xff] %vm5002_vm3, %v3887_v2 }
 0x427   : > { %v6813_v3 = vpop.f32.mrb[232].mxu1  ;;  %v6589_v4 = vpop.f32.mrb[236].mxu0 }
 0x428   : > { %5405 = vst.msk [vmem:[%s8551_s25 + $0xc90] sm:$0xff] %vm5002_vm3, %v6813_v3  ;;  %v4796_v5 = vpop.f32.mrb[233].mxu1  ;;  %5181 = vst.msk [vmem:[%s8551_s25 + $0x590] sm:$0xff] %vm5002_vm3, %v6589_v4  ;;  %v3900_v6 = vpop.f32.mrb[237].mxu0 }
 0x429   : > { %5403 = vst.msk [vmem:[%s8551_s25 + $0xc80] sm:$0xff] %vm5002_vm3, %v4796_v5  ;;  %v6814_v7 = vpop.f32.mrb[234].mxu1  ;;  %5179 = vst.msk [vmem:[%s8551_s25 + $0x580] sm:$0xff] %vm5002_vm3, %v3900_v6  ;;  %v6590_v8 = vpop.f32.mrb[238].mxu0 }
 0x42a   : > { %5406 = vst.msk [vmem:[%s8551_s25 + $0xc98] sm:$0xff] %vm5002_vm3, %v6814_v7  ;;  %v4799_v9 = vpop.f32.mrb[235].mxu1  ;;  %5182 = vst.msk [vmem:[%s8551_s25 + $0x598] sm:$0xff] %vm5002_vm3, %v6590_v8  ;;  %v3903_v10 = vpop.f32.mrb[239].mxu0 }
 0x42b   : > { %5404 = vst.msk [vmem:[%s8551_s25 + $0xc88] sm:$0xff] %vm5002_vm3, %v4799_v9  ;;  %5180 = vst.msk [vmem:[%s8551_s25 + $0x588] sm:$0xff] %vm5002_vm3, %v3903_v10 }
 0x42f   : > { %v6817_v11 = vpop.f32.mrb[236].mxu1  ;;  %v6593_v12 = vpop.f32.mrb[240].mxu0 }
 0x430   : > { %5409 = vst.msk [vmem:[%s8551_s25 + $0xcb0] sm:$0xff] %vm5002_vm3, %v6817_v11  ;;  %v4812_v13 = vpop.f32.mrb[237].mxu1  ;;  %5185 = vst.msk [vmem:[%s8551_s25 + $0x5b0] sm:$0xff] %vm5002_vm3, %v6593_v12  ;;  %v3916_v14 = vpop.f32.mrb[241].mxu0 }
 0x431   : > { %5407 = vst.msk [vmem:[%s8551_s25 + $0xca0] sm:$0xff] %vm5002_vm3, %v4812_v13  ;;  %v6818_v15 = vpop.f32.mrb[238].mxu1  ;;  %5183 = vst.msk [vmem:[%s8551_s25 + $0x5a0] sm:$0xff] %vm5002_vm3, %v3916_v14  ;;  %v6594_v16 = vpop.f32.mrb[242].mxu0 }
 0x432   : > { %5410 = vst.msk [vmem:[%s8551_s25 + $0xcb8] sm:$0xff] %vm5002_vm3, %v6818_v15  ;;  %v4815_v17 = vpop.f32.mrb[239].mxu1  ;;  %5186 = vst.msk [vmem:[%s8551_s25 + $0x5b8] sm:$0xff] %vm5002_vm3, %v6594_v16  ;;  %v3919_v18 = vpop.f32.mrb[243].mxu0 }
 0x433   : > { %5408 = vst.msk [vmem:[%s8551_s25 + $0xca8] sm:$0xff] %vm5002_vm3, %v4815_v17  ;;  %5184 = vst.msk [vmem:[%s8551_s25 + $0x5a8] sm:$0xff] %vm5002_vm3, %v3919_v18 }
 0x437   : > { %v6821_v19 = vpop.f32.mrb[240].mxu1  ;;  %v6597_v20 = vpop.f32.mrb[244].mxu0 }
 0x438   : > { %5413 = vst.msk [vmem:[%s8551_s25 + $0xcd0] sm:$0xff] %vm5002_vm3, %v6821_v19  ;;  %v4828_v21 = vpop.f32.mrb[241].mxu1  ;;  %5189 = vst.msk [vmem:[%s8551_s25 + $0x5d0] sm:$0xff] %vm5002_vm3, %v6597_v20  ;;  %v3932_v22 = vpop.f32.mrb[245].mxu0 }
 0x439   : > { %5411 = vst.msk [vmem:[%s8551_s25 + $0xcc0] sm:$0xff] %vm5002_vm3, %v4828_v21  ;;  %v6822_v23 = vpop.f32.mrb[242].mxu1  ;;  %5187 = vst.msk [vmem:[%s8551_s25 + $0x5c0] sm:$0xff] %vm5002_vm3, %v3932_v22  ;;  %v6598_v24 = vpop.f32.mrb[246].mxu0 }
 0x43a   : > { %5414 = vst.msk [vmem:[%s8551_s25 + $0xcd8] sm:$0xff] %vm5002_vm3, %v6822_v23  ;;  %v4831_v25 = vpop.f32.mrb[243].mxu1  ;;  %5190 = vst.msk [vmem:[%s8551_s25 + $0x5d8] sm:$0xff] %vm5002_vm3, %v6598_v24  ;;  %v3935_v26 = vpop.f32.mrb[247].mxu0 }
 0x43b   : > { %5412 = vst.msk [vmem:[%s8551_s25 + $0xcc8] sm:$0xff] %vm5002_vm3, %v4831_v25  ;;  %5188 = vst.msk [vmem:[%s8551_s25 + $0x5c8] sm:$0xff] %vm5002_vm3, %v3935_v26 }
 0x43f   : > { %v6825_v27 = vpop.f32.mrb[244].mxu1  ;;  %v6601_v28 = vpop.f32.mrb[248].mxu0 }
 0x440   : > { %5417 = vst.msk [vmem:[%s8551_s25 + $0xcf0] sm:$0xff] %vm5002_vm3, %v6825_v27  ;;  %v4844_v29 = vpop.f32.mrb[245].mxu1  ;;  %5193 = vst.msk [vmem:[%s8551_s25 + $0x5f0] sm:$0xff] %vm5002_vm3, %v6601_v28  ;;  %v3948_v30 = vpop.f32.mrb[249].mxu0 }
 0x441   : > { %5415 = vst.msk [vmem:[%s8551_s25 + $0xce0] sm:$0xff] %vm5002_vm3, %v4844_v29  ;;  %v6826_v31 = vpop.f32.mrb[246].mxu1  ;;  %5191 = vst.msk [vmem:[%s8551_s25 + $0x5e0] sm:$0xff] %vm5002_vm3, %v3948_v30  ;;  %v6602_v32 = vpop.f32.mrb[250].mxu0 }
 0x442   : > { %5418 = vst.msk [vmem:[%s8551_s25 + $0xcf8] sm:$0xff] %vm5002_vm3, %v6826_v31  ;;  %v4847_v33 = vpop.f32.mrb[247].mxu1  ;;  %5194 = vst.msk [vmem:[%s8551_s25 + $0x5f8] sm:$0xff] %vm5002_vm3, %v6602_v32  ;;  %v3951_v34 = vpop.f32.mrb[251].mxu0 }
 0x443   : > { %5416 = vst.msk [vmem:[%s8551_s25 + $0xce8] sm:$0xff] %vm5002_vm3, %v4847_v33  ;;  %5192 = vst.msk [vmem:[%s8551_s25 + $0x5e8] sm:$0xff] %vm5002_vm3, %v3951_v34 }
 0x447   : > { %v6829_v35 = vpop.f32.mrb[248].mxu1  ;;  %v6605_v36 = vpop.f32.mrb[252].mxu0 }
 0x448   : > { %5421 = vst.msk [vmem:[%s8551_s25 + $0xd10] sm:$0xff] %vm5002_vm3, %v6829_v35  ;;  %v4860_v37 = vpop.f32.mrb[249].mxu1  ;;  %5197 = vst.msk [vmem:[%s8551_s25 + $0x610] sm:$0xff] %vm5002_vm3, %v6605_v36  ;;  %v3964_v38 = vpop.f32.mrb[253].mxu0 }
 0x449   : > { %5419 = vst.msk [vmem:[%s8551_s25 + $0xd00] sm:$0xff] %vm5002_vm3, %v4860_v37  ;;  %v6830_v39 = vpop.f32.mrb[250].mxu1  ;;  %5195 = vst.msk [vmem:[%s8551_s25 + $0x600] sm:$0xff] %vm5002_vm3, %v3964_v38  ;;  %v6606_v40 = vpop.f32.mrb[254].mxu0 }
 0x44a   : > { %5422 = vst.msk [vmem:[%s8551_s25 + $0xd18] sm:$0xff] %vm5002_vm3, %v6830_v39  ;;  %v4863_v41 = vpop.f32.mrb[251].mxu1  ;;  %5198 = vst.msk [vmem:[%s8551_s25 + $0x618] sm:$0xff] %vm5002_vm3, %v6606_v40  ;;  %v3967_v42 = vpop.f32.mrb[255].mxu0 }
 0x44b   : > { %5420 = vst.msk [vmem:[%s8551_s25 + $0xd08] sm:$0xff] %vm5002_vm3, %v4863_v41  ;;  %5196 = vst.msk [vmem:[%s8551_s25 + $0x608] sm:$0xff] %vm5002_vm3, %v3967_v42 }
 0x44f   : > { %v6833_v43 = vpop.f32.mrb[252].mxu1  ;;  %v6609_v44 = vpop.f32.mrb[0].mxu0 }
 0x450   : > { %5425 = vst.msk [vmem:[%s8551_s25 + $0xd30] sm:$0xff] %vm5002_vm3, %v6833_v43  ;;  %v4876_v45 = vpop.f32.mrb[253].mxu1  ;;  %5201 = vst.msk [vmem:[%s8551_s25 + $0x630] sm:$0xff] %vm5002_vm3, %v6609_v44  ;;  %v3980_v46 = vpop.f32.mrb[1].mxu0 }
 0x451   : > { %5423 = vst.msk [vmem:[%s8551_s25 + $0xd20] sm:$0xff] %vm5002_vm3, %v4876_v45  ;;  %v6834_v47 = vpop.f32.mrb[254].mxu1  ;;  %5199 = vst.msk [vmem:[%s8551_s25 + $0x620] sm:$0xff] %vm5002_vm3, %v3980_v46  ;;  %v6610_v48 = vpop.f32.mrb[2].mxu0 }
 0x452   : > { %5426 = vst.msk [vmem:[%s8551_s25 + $0xd38] sm:$0xff] %vm5002_vm3, %v6834_v47  ;;  %v4879_v49 = vpop.f32.mrb[255].mxu1  ;;  %5202 = vst.msk [vmem:[%s8551_s25 + $0x638] sm:$0xff] %vm5002_vm3, %v6610_v48  ;;  %v3983_v50 = vpop.f32.mrb[3].mxu0 }
 0x453   : > { %5424 = vst.msk [vmem:[%s8551_s25 + $0xd28] sm:$0xff] %vm5002_vm3, %v4879_v49  ;;  %5200 = vst.msk [vmem:[%s8551_s25 + $0x628] sm:$0xff] %vm5002_vm3, %v3983_v50 }
 0x457   : > { %v6837_v51 = vpop.f32.mrb[0].mxu1  ;;  %v6613_v52 = vpop.f32.mrb[4].mxu0 }
 0x458   : > { %5429 = vst.msk [vmem:[%s8551_s25 + $0xd50] sm:$0xff] %vm5002_vm3, %v6837_v51  ;;  %v4892_v53 = vpop.f32.mrb[1].mxu1  ;;  %5205 = vst.msk [vmem:[%s8551_s25 + $0x650] sm:$0xff] %vm5002_vm3, %v6613_v52  ;;  %v3996_v54 = vpop.f32.mrb[5].mxu0 }
 0x459   : > { %5427 = vst.msk [vmem:[%s8551_s25 + $0xd40] sm:$0xff] %vm5002_vm3, %v4892_v53  ;;  %v6838_v55 = vpop.f32.mrb[2].mxu1  ;;  %5203 = vst.msk [vmem:[%s8551_s25 + $0x640] sm:$0xff] %vm5002_vm3, %v3996_v54  ;;  %v6614_v56 = vpop.f32.mrb[6].mxu0 }
 0x45a   : > { %5430 = vst.msk [vmem:[%s8551_s25 + $0xd58] sm:$0xff] %vm5002_vm3, %v6838_v55  ;;  %v4895_v57 = vpop.f32.mrb[3].mxu1  ;;  %5206 = vst.msk [vmem:[%s8551_s25 + $0x658] sm:$0xff] %vm5002_vm3, %v6614_v56  ;;  %v3999_v58 = vpop.f32.mrb[7].mxu0 }
 0x45b   : > { %5428 = vst.msk [vmem:[%s8551_s25 + $0xd48] sm:$0xff] %vm5002_vm3, %v4895_v57  ;;  %5204 = vst.msk [vmem:[%s8551_s25 + $0x648] sm:$0xff] %vm5002_vm3, %v3999_v58 }
 0x45f   : > { %v6841_v59 = vpop.f32.mrb[4].mxu1  ;;  %v6617_v60 = vpop.f32.mrb[8].mxu0 }
 0x460   : > { %5433 = vst.msk [vmem:[%s8551_s25 + $0xd70] sm:$0xff] %vm5002_vm3, %v6841_v59  ;;  %v4908_v61 = vpop.f32.mrb[5].mxu1  ;;  %5209 = vst.msk [vmem:[%s8551_s25 + $0x670] sm:$0xff] %vm5002_vm3, %v6617_v60  ;;  %v4012_v62 = vpop.f32.mrb[9].mxu0 }
 0x461   : > { %5431 = vst.msk [vmem:[%s8551_s25 + $0xd60] sm:$0xff] %vm5002_vm3, %v4908_v61  ;;  %v6842_v63 = vpop.f32.mrb[6].mxu1  ;;  %5207 = vst.msk [vmem:[%s8551_s25 + $0x660] sm:$0xff] %vm5002_vm3, %v4012_v62  ;;  %v6618_v0 = vpop.f32.mrb[10].mxu0 }
 0x462   : > { %5434 = vst.msk [vmem:[%s8551_s25 + $0xd78] sm:$0xff] %vm5002_vm3, %v6842_v63  ;;  %v4911_v1 = vpop.f32.mrb[7].mxu1  ;;  %5210 = vst.msk [vmem:[%s8551_s25 + $0x678] sm:$0xff] %vm5002_vm3, %v6618_v0  ;;  %v4015_v2 = vpop.f32.mrb[11].mxu0 }
 0x463   : > { %5432 = vst.msk [vmem:[%s8551_s25 + $0xd68] sm:$0xff] %vm5002_vm3, %v4911_v1  ;;  %5208 = vst.msk [vmem:[%s8551_s25 + $0x668] sm:$0xff] %vm5002_vm3, %v4015_v2 }
 0x467   : > { %v6845_v3 = vpop.f32.mrb[8].mxu1  ;;  %v6621_v4 = vpop.f32.mrb[12].mxu0 }
 0x468   : > { %5437 = vst.msk [vmem:[%s8551_s25 + $0xd90] sm:$0xff] %vm5002_vm3, %v6845_v3  ;;  %v4924_v5 = vpop.f32.mrb[9].mxu1  ;;  %5213 = vst.msk [vmem:[%s8551_s25 + $0x690] sm:$0xff] %vm5002_vm3, %v6621_v4  ;;  %v4028_v6 = vpop.f32.mrb[13].mxu0 }
 0x469   : > { %5435 = vst.msk [vmem:[%s8551_s25 + $0xd80] sm:$0xff] %vm5002_vm3, %v4924_v5  ;;  %v6846_v7 = vpop.f32.mrb[10].mxu1  ;;  %5211 = vst.msk [vmem:[%s8551_s25 + $0x680] sm:$0xff] %vm5002_vm3, %v4028_v6  ;;  %v6622_v8 = vpop.f32.mrb[14].mxu0 }
 0x46a   : > { %5438 = vst.msk [vmem:[%s8551_s25 + $0xd98] sm:$0xff] %vm5002_vm3, %v6846_v7  ;;  %v4927_v9 = vpop.f32.mrb[11].mxu1  ;;  %5214 = vst.msk [vmem:[%s8551_s25 + $0x698] sm:$0xff] %vm5002_vm3, %v6622_v8  ;;  %v4031_v10 = vpop.f32.mrb[15].mxu0 }
 0x46b   : > { %5436 = vst.msk [vmem:[%s8551_s25 + $0xd88] sm:$0xff] %vm5002_vm3, %v4927_v9  ;;  %5212 = vst.msk [vmem:[%s8551_s25 + $0x688] sm:$0xff] %vm5002_vm3, %v4031_v10 }
 0x46f   : > { %v6849_v11 = vpop.f32.mrb[12].mxu1  ;;  %v6625_v12 = vpop.f32.mrb[16].mxu0 }
 0x470   : > { %5441 = vst.msk [vmem:[%s8551_s25 + $0xdb0] sm:$0xff] %vm5002_vm3, %v6849_v11  ;;  %v4940_v13 = vpop.f32.mrb[13].mxu1  ;;  %5217 = vst.msk [vmem:[%s8551_s25 + $0x6b0] sm:$0xff] %vm5002_vm3, %v6625_v12  ;;  %v4044_v14 = vpop.f32.mrb[17].mxu0 }
 0x471   : > { %5439 = vst.msk [vmem:[%s8551_s25 + $0xda0] sm:$0xff] %vm5002_vm3, %v4940_v13  ;;  %v6850_v15 = vpop.f32.mrb[14].mxu1  ;;  %5215 = vst.msk [vmem:[%s8551_s25 + $0x6a0] sm:$0xff] %vm5002_vm3, %v4044_v14  ;;  %v6626_v16 = vpop.f32.mrb[18].mxu0 }
 0x472   : > { %5442 = vst.msk [vmem:[%s8551_s25 + $0xdb8] sm:$0xff] %vm5002_vm3, %v6850_v15  ;;  %v4943_v17 = vpop.f32.mrb[15].mxu1  ;;  %5218 = vst.msk [vmem:[%s8551_s25 + $0x6b8] sm:$0xff] %vm5002_vm3, %v6626_v16  ;;  %v4047_v18 = vpop.f32.mrb[19].mxu0 }
 0x473   : > { %5440 = vst.msk [vmem:[%s8551_s25 + $0xda8] sm:$0xff] %vm5002_vm3, %v4943_v17  ;;  %5216 = vst.msk [vmem:[%s8551_s25 + $0x6a8] sm:$0xff] %vm5002_vm3, %v4047_v18 }
 0x477   : > { %v6853_v19 = vpop.f32.mrb[16].mxu1  ;;  %v6629_v20 = vpop.f32.mrb[20].mxu0 }
 0x478   : > { %5445 = vst.msk [vmem:[%s8551_s25 + $0xdd0] sm:$0xff] %vm5002_vm3, %v6853_v19  ;;  %v4956_v21 = vpop.f32.mrb[17].mxu1  ;;  %5221 = vst.msk [vmem:[%s8551_s25 + $0x6d0] sm:$0xff] %vm5002_vm3, %v6629_v20  ;;  %v4060_v22 = vpop.f32.mrb[21].mxu0 }
 0x479   : > { %5443 = vst.msk [vmem:[%s8551_s25 + $0xdc0] sm:$0xff] %vm5002_vm3, %v4956_v21  ;;  %v6854_v23 = vpop.f32.mrb[18].mxu1  ;;  %5219 = vst.msk [vmem:[%s8551_s25 + $0x6c0] sm:$0xff] %vm5002_vm3, %v4060_v22  ;;  %v6630_v24 = vpop.f32.mrb[22].mxu0 }
 0x47a   : > { %5446 = vst.msk [vmem:[%s8551_s25 + $0xdd8] sm:$0xff] %vm5002_vm3, %v6854_v23  ;;  %v4959_v25 = vpop.f32.mrb[19].mxu1  ;;  %5222 = vst.msk [vmem:[%s8551_s25 + $0x6d8] sm:$0xff] %vm5002_vm3, %v6630_v24  ;;  %v4063_v26 = vpop.f32.mrb[23].mxu0 }
 0x47b   : > { %5444 = vst.msk [vmem:[%s8551_s25 + $0xdc8] sm:$0xff] %vm5002_vm3, %v4959_v25  ;;  %5220 = vst.msk [vmem:[%s8551_s25 + $0x6c8] sm:$0xff] %vm5002_vm3, %v4063_v26 }
 0x47f   : > { %v6857_v27 = vpop.f32.mrb[20].mxu1  ;;  %v6633_v28 = vpop.f32.mrb[24].mxu0 }
 0x480   : > { %5449 = vst.msk [vmem:[%s8551_s25 + $0xdf0] sm:$0xff] %vm5002_vm3, %v6857_v27  ;;  %v4972_v29 = vpop.f32.mrb[21].mxu1  ;;  %5225 = vst.msk [vmem:[%s8551_s25 + $0x6f0] sm:$0xff] %vm5002_vm3, %v6633_v28  ;;  %v4076_v30 = vpop.f32.mrb[25].mxu0 }
 0x481   : > { %5447 = vst.msk [vmem:[%s8551_s25 + $0xde0] sm:$0xff] %vm5002_vm3, %v4972_v29  ;;  %v6858_v31 = vpop.f32.mrb[22].mxu1  ;;  %5223 = vst.msk [vmem:[%s8551_s25 + $0x6e0] sm:$0xff] %vm5002_vm3, %v4076_v30  ;;  %v6634_v32 = vpop.f32.mrb[26].mxu0 }
 0x482   : > { %5450 = vst.msk [vmem:[%s8551_s25 + $0xdf8] sm:$0xff] %vm5002_vm3, %v6858_v31  ;;  %v4975_v33 = vpop.f32.mrb[23].mxu1  ;;  %5226 = vst.msk [vmem:[%s8551_s25 + $0x6f8] sm:$0xff] %vm5002_vm3, %v6634_v32  ;;  %v4079_v34 = vpop.f32.mrb[27].mxu0 }
 0x483   : > { %5448 = vst.msk [vmem:[%s8551_s25 + $0xde8] sm:$0xff] %vm5002_vm3, %v4975_v33  ;;  %5224 = vst.msk [vmem:[%s8551_s25 + $0x6e8] sm:$0xff] %vm5002_vm3, %v4079_v34 }
 0x487   : > { %v6861_v35 = vpop.f32.mrb[24].mxu1 }
 0x488   : > { %5454 = vst.msk [vmem:[%s8551_s25 + $0xe10] sm:$0x3f] %vm5453_vm4, %v6861_v35  ;;  %v4988_v36 = vpop.f32.mrb[25].mxu1 }
 0x489   : > { %5451 = vst.msk [vmem:[%s8551_s25 + $0xe00] sm:$0xff] %vm5002_vm3, %v4988_v36  ;;  %v6862_v37 = vpop.f32.mrb[26].mxu1 }
 0x48a   : > { %v4991_v38 = vpop.f32.mrb[27].mxu1 }
 0x48b   : > { %5452 = vst.msk [vmem:[%s8551_s25 + $0xe08] sm:$0xff] %vm5002_vm3, %v4991_v38 }
 0x48c PF: > { %s13_s14 = sadd.s32 1, %s6923_s14   ;;  %s10272_s12 = smov %s6919_s13 }
 0x48d   : > { %p10_p5 = scmp.ge.s32.totalorder %s13_s14, 4   ;;  %s10273_s13 = smov %s10275_s15 }
 0x48f   :  { %12 = sbr.rel (!%p10_p5) target bundleno = 2 (0x2), region = 62 }

</bundles_post_ra>
